<compile_context>
chip_gen: v6e
topology: v6e:2x2x1
jax: 0.10.0
libtpu: 0.0.40
codegen_flags: <defaults>
</compile_context>

<pallas_src>
import jax
import jax.numpy as jnp
import numpy as np
from jax import lax
from jax.experimental import pallas as pl
from jax.experimental.pallas import tpu as pltpu

BN_EPS = 1e-5
LRELU_SLOPE = 0.2


# ----------------------------- kernel helpers ------------------------------

def _lrelu(y):
    return jnp.where(y > 0, y, LRELU_SLOPE * y)


def _dot_bf16(a, b):
    # bf16 MXU inputs, f32 accumulation (per-generation perf feedback).
    return jnp.dot(a.astype(jnp.bfloat16), b.astype(jnp.bfloat16),
                   preferred_element_type=jnp.float32)


# ----------------------------- Pallas kernels ------------------------------

def _conv_lrelu_kernel(a_ref, b_ref, o_ref):
    # Layer 1: Conv (as matmul) + LeakyReLU, no BatchNorm.
    y = _dot_bf16(a_ref[...], b_ref[...])
    o_ref[...] = _lrelu(y)


def _conv_bn_lrelu_kernel(a_ref, b_ref, gamma_ref, beta_ref, o_ref):
    # Whole layer in one block: Conv -> BatchNorm (batch stats) -> LeakyReLU.
    y = _dot_bf16(a_ref[...], b_ref[...])                 # (M, OC) f32
    mean = jnp.mean(y, axis=0, keepdims=True)             # per-channel
    c = y - mean
    var = jnp.mean(c * c, axis=0, keepdims=True)          # biased, like PyTorch
    scale = gamma_ref[...] * lax.rsqrt(var + BN_EPS)      # EUP rsqrt
    o_ref[...] = _lrelu(c * scale + beta_ref[...])


def _final_kernel(a_ref, b_ref, gamma_ref, beta_ref, w5_ref, sel_ref, o_ref):
    # Layer 4 (Conv+BN+LeakyReLU) fused with layer 5 (4x4 valid conv, OC=1,
    # Sigmoid).  Layer 5 collapses to a weighted reduction over layer 4's
    # whole (per-sample) feature map.
    y = _dot_bf16(a_ref[...], b_ref[...])                 # (M4, OC4)
    mean = jnp.mean(y, axis=0, keepdims=True)
    c = y - mean
    var = jnp.mean(c * c, axis=0, keepdims=True)
    scale = gamma_ref[...] * lax.rsqrt(var + BN_EPS)
    h = _lrelu(c * scale + beta_ref[...])                 # (M4, OC4)

    prod = h * w5_ref[...]                                # (M4, OC4)
    per_sample = jnp.dot(sel_ref[...], prod,
                         preferred_element_type=jnp.float32)   # (N, OC4)
    logits = jnp.sum(per_sample, axis=1, keepdims=True)   # (N, 1)
    o_ref[...] = jax.nn.sigmoid(logits)


# ---------------------------- pallas_call wrappers --------------------------

def _conv_lrelu(a, b):
    M, K = a.shape
    OC = b.shape[1]
    # 2 grid steps on the only large-M layer so v7x's two TCs both get work;
    # single block otherwise.
    n_blk = 2 if (M % 2 == 0 and (M // 2) % 8 == 0) else 1
    tm = M // n_blk
    return pl.pallas_call(
        _conv_lrelu_kernel,
        out_shape=jax.ShapeDtypeStruct((M, OC), jnp.float32),
        grid_spec=pltpu.PrefetchScalarGridSpec(
            num_scalar_prefetch=0, grid=(n_blk,),
            in_specs=[pl.BlockSpec((tm, K), lambda i: (i, 0)),
                      pl.BlockSpec((K, OC), lambda i: (0, 0))],
            out_specs=pl.BlockSpec((tm, OC), lambda i: (i, 0))),
        compiler_params=pltpu.CompilerParams(
            dimension_semantics=("parallel",)),
    )(a, b)


def _conv_bn_lrelu(a, b, gamma, beta):
    M, K = a.shape
    OC = b.shape[1]
    return pl.pallas_call(
        _conv_bn_lrelu_kernel,
        out_shape=jax.ShapeDtypeStruct((M, OC), jnp.float32),
        grid_spec=pltpu.PrefetchScalarGridSpec(
            num_scalar_prefetch=0, grid=(1,),
            in_specs=[pl.BlockSpec((M, K), lambda i: (0, 0)),
                      pl.BlockSpec((K, OC), lambda i: (0, 0)),
                      pl.BlockSpec((1, OC), lambda i: (0, 0)),
                      pl.BlockSpec((1, OC), lambda i: (0, 0))],
            out_specs=pl.BlockSpec((M, OC), lambda i: (0, 0))),
        compiler_params=pltpu.CompilerParams(
            dimension_semantics=("arbitrary",)),
    )(a, b, gamma, beta)


def _final_layer(a, b, gamma, beta, w5t, sel):
    M, K = a.shape
    OC = b.shape[1]
    N = sel.shape[0]
    return pl.pallas_call(
        _final_kernel,
        out_shape=jax.ShapeDtypeStruct((N, 1), jnp.float32),
        grid_spec=pltpu.PrefetchScalarGridSpec(
            num_scalar_prefetch=0, grid=(1,),
            in_specs=[pl.BlockSpec((M, K), lambda i: (0, 0)),
                      pl.BlockSpec((K, OC), lambda i: (0, 0)),
                      pl.BlockSpec((1, OC), lambda i: (0, 0)),
                      pl.BlockSpec((1, OC), lambda i: (0, 0)),
                      pl.BlockSpec((M, OC), lambda i: (0, 0)),
                      pl.BlockSpec((N, M), lambda i: (0, 0))],
            out_specs=pl.BlockSpec((N, 1), lambda i: (0, 0))),
        compiler_params=pltpu.CompilerParams(
            dimension_semantics=("arbitrary",)),
    )(a, b, gamma, beta, w5t, sel)


# ------------------------------ layer plumbing ------------------------------

def _im2col_nhwc(x, k, stride, pad):
    # x: (N, H, W, C) -> (N*OH*OW, KH*KW*C), patch flattening (kh, kw, c),
    # matching the pre-transposed weight layout (KH, KW, IC, OC).
    if pad:
        x = jnp.pad(x, ((0, 0), (pad, pad), (pad, pad), (0, 0)))
    N, H, W, C = x.shape
    OH = (H - k) // stride + 1
    OW = (W - k) // stride + 1
    rows = (jnp.arange(OH) * stride)[:, None] + jnp.arange(k)[None, :]  # (OH, k)
    cols = (jnp.arange(OW) * stride)[:, None] + jnp.arange(k)[None, :]  # (OW, k)
    p = x[:, rows]                     # (N, OH, kh, W, C)
    p = p[:, :, :, cols]               # (N, OH, kh, OW, kw, C)
    p = jnp.transpose(p, (0, 1, 3, 2, 4, 5))     # (N, OH, OW, kh, kw, C)
    return p.reshape(N * OH * OW, k * k * C), OH, OW


# --------------------------- parameters & forward ---------------------------

def init_params(key, ndf=16, nc=3):
    ks = jax.random.split(key, 11)

    def w(k, shape):
        return 0.02 * jax.random.normal(k, shape, jnp.float32)

    return {
        "w1": w(ks[0], (ndf, nc, 4, 4)),
        "w2": w(ks[1], (ndf * 2, ndf, 4, 4)),
        "g2": 1.0 + 0.1 * jax.random.normal(ks[2], (ndf * 2,), jnp.float32),
        "b2": 0.1 * jax.random.normal(ks[3], (ndf * 2,), jnp.float32),
        "w3": w(ks[4], (ndf * 4, ndf * 2, 4, 4)),
        "g3": 1.0 + 0.1 * jax.random.normal(ks[5], (ndf * 4,), jnp.float32),
        "b3": 0.1 * jax.random.normal(ks[6], (ndf * 4,), jnp.float32),
        "w4": w(ks[7], (ndf * 8, ndf * 4, 4, 4)),
        "g4": 1.0 + 0.1 * jax.random.normal(ks[8], (ndf * 8,), jnp.float32),
        "b4": 0.1 * jax.random.normal(ks[9], (ndf * 8,), jnp.float32),
        "w5": w(ks[10], (1, ndf * 8, 4, 4)),
    }


def prepare_params(p):
    """One-time conversion of PyTorch-layout weights into matmul-ready form."""
    def wm(w):  # (OC, IC, KH, KW) -> (KH*KW*IC, OC)
        OC, IC, KH, KW = w.shape
        return jnp.transpose(w, (2, 3, 1, 0)).reshape(KH * KW * IC, OC)

    w5 = p["w5"]                                      # (1, IC5, 4, 4)
    KH5, KW5 = w5.shape[2], w5.shape[3]
    return {
        "b1": wm(p["w1"]),
        "b2": wm(p["w2"]), "g2": p["g2"].reshape(1, -1), "be2": p["b2"].reshape(1, -1),
        "b3": wm(p["w3"]), "g3": p["g3"].reshape(1, -1), "be3": p["b3"].reshape(1, -1),
        "b4": wm(p["w4"]), "g4": p["g4"].reshape(1, -1), "be4": p["b4"].reshape(1, -1),
        # layer-5 kernel as (KH*KW, IC): row kh*KW+kw, col c
        "w5m": jnp.transpose(w5, (2, 3, 1, 0)).reshape(KH5 * KW5, -1),
    }


def discriminator_forward(prep, x_nchw):
    # (N, nc, 64, 64) -> (N, 1, 1, 1)
    x = jnp.transpose(x_nchw, (0, 2, 3, 1))           # NHWC, once
    N = x.shape[0]

    # layer 1: Conv(4,2,1) + LeakyReLU
    a, OH, OW = _im2col_nhwc(x, 4, 2, 1)
    h = _conv_lrelu(a, prep["b1"]).reshape(N, OH, OW, -1)

    # layers 2, 3: Conv(4,2,1) + BN + LeakyReLU, fully fused, single block
    for i in (2, 3):
        a, OH, OW = _im2col_nhwc(h, 4, 2, 1)
        h = _conv_bn_lrelu(a, prep[f"b{i}"], prep[f"g{i}"],
                           prep[f"be{i}"]).reshape(N, OH, OW, -1)

    # layer 4 (Conv+BN+LeakyReLU) with layer 5 (4x4 conv + Sigmoid) folded in
    a, OH, OW = _im2col_nhwc(h, 4, 2, 1)
    rows_per_sample = OH * OW
    assert rows_per_sample == prep["w5m"].shape[0]     # final conv covers 4x4 map
    w5t = jnp.tile(prep["w5m"], (N, 1))                # (N*OH*OW, ndf*8)
    sel = (jnp.arange(N)[:, None]
           == (jnp.arange(N * rows_per_sample)[None, :] // rows_per_sample)
           ).astype(jnp.float32)                       # (N, N*OH*OW)
    out = _final_layer(a, prep["b4"], prep["g4"], prep["be4"], w5t, sel)
    return out.reshape(N, 1, 1, 1)


# --------------------------- plain-JAX reference ----------------------------

def ref_forward(params, x):
    def conv(h, w, stride, pad):
        return lax.conv_general_dilated(
            h, w, (stride, stride), [(pad, pad), (pad, pad)],
            dimension_numbers=("NCHW", "OIHW", "NCHW"),
            precision=lax.Precision.HIGHEST)

    def bn(h, g, b):
        mean = h.mean(axis=(0, 2, 3), keepdims=True)
        var = h.var(axis=(0, 2, 3), keepdims=True)     # biased, like PyTorch BN
        return ((h - mean) / jnp.sqrt(var + BN_EPS)
                * g.reshape(1, -1, 1, 1) + b.reshape(1, -1, 1, 1))

    lrelu = lambda v: jnp.where(v > 0, v, LRELU_SLOPE * v)
    h = lrelu(conv(x, params["w1"], 2, 1))
    h = lrelu(bn(conv(h, params["w2"], 2, 1), params["g2"], params["b2"]))
    h = lrelu(bn(conv(h, params["w3"], 2, 1), params["g3"], params["b3"]))
    h = lrelu(bn(conv(h, params["w4"], 2, 1), params["g4"], params["b4"]))
    return jax.nn.sigmoid(conv(h, params["w5"], 1, 0))


# ----------------------------------- main -----------------------------------

if __name__ == "__main__":
    key = jax.random.PRNGKey(0)
    pkey, xkey = jax.random.split(key)

    ndf, nc, batch, size = 16, 3, 2, 64   # 64x64 input so the final 4x4 conv -> 1x1
    params = init_params(pkey, ndf=ndf, nc=nc)
    prep = prepare_params(params)          # one-time weight prep (not per forward)
    x = jax.random.normal(xkey, (batch, nc, size, size), jnp.float32)

    out = jax.jit(discriminator_forward)(prep, x)
    out = jax.block_until_ready(out)
    assert out.shape == (batch, 1, 1, 1), out.shape

    ref = ref_forward(params, x)
    # bf16 MXU inputs (f32 accumulate) vs f32 HIGHEST reference -> loosened tol.
    np.testing.assert_allclose(np.asarray(out), np.asarray(ref),
                               atol=2e-2, rtol=2e-2)
    print("KERNEL_OK")
</pallas_src>

<mosaic_0001>
module attributes {stable_mosaic.version = 11 : i64} {
  func.func @_conv_lrelu_kernel(%arg0: i32, %arg1: memref<1024x48xf32, #tpu.memory_space<vmem>>, %arg2: memref<48x16xf32, #tpu.memory_space<vmem>>, %arg3: memref<1024x16xf32, #tpu.memory_space<vmem>>) attributes {dimension_semantics = [#tpu.dimension_semantics<parallel>], iteration_bounds = array<i64: 2>, scalar_prefetch = 0 : i64, scratch_operands = 0 : i64, tpu.core_type = #tpu.core_type<tc>, window_params = [{transform_indices = @transform_0, window_bounds = array<i64: 1024, 48>}, {pipeline_mode = #tpu.pipeline_mode<synchronous>, transform_indices = @transform_1, window_bounds = array<i64: 48, 16>}, {transform_indices = @transform_2, window_bounds = array<i64: 1024, 16>}]} {
    %c0 = arith.constant 0 : index
    %c0_0 = arith.constant 0 : index
    %0 = vector.load %arg1[%c0, %c0_0] : memref<1024x48xf32, #tpu.memory_space<vmem>>, vector<1024x48xf32>
    %c0_1 = arith.constant 0 : index
    %c0_2 = arith.constant 0 : index
    %1 = vector.load %arg2[%c0_1, %c0_2] : memref<48x16xf32, #tpu.memory_space<vmem>>, vector<48x16xf32>
    %2 = arith.truncf %0 : vector<1024x48xf32> to vector<1024x48xbf16>
    %3 = arith.truncf %1 : vector<48x16xf32> to vector<48x16xbf16>
    %cst = arith.constant dense<0.000000e+00> : vector<1024x16xf32>
    %4 = tpu.matmul %2, %3, %cst {dimension_numbers = #tpu.dot_dimension_numbers<[1], [0], [0], [1], [0, 0, 1, 1], [], []>} : vector<1024x48xbf16>, vector<48x16xbf16>, vector<1024x16xf32> -> vector<1024x16xf32>
    %cst_3 = arith.constant 0.000000e+00 : f32
    %5 = vector.broadcast %cst_3 : f32 to vector<1024x16xf32>
    %6 = arith.cmpf ogt, %4, %5 : vector<1024x16xf32>
    %cst_4 = arith.constant 2.000000e-01 : f32
    %7 = vector.broadcast %cst_4 : f32 to vector<1024x16xf32>
    %8 = arith.mulf %7, %4 : vector<1024x16xf32>
    %9 = arith.select %6, %4, %8 : vector<1024x16xi1>, vector<1024x16xf32>
    %c0_5 = arith.constant 0 : index
    %c0_6 = arith.constant 0 : index
    %10 = vector.load %arg3[%c0_5, %c0_6] : memref<1024x16xf32, #tpu.memory_space<vmem>>, vector<1024x16xf32>
    tpu.vector_store %arg3[%c0_5, %c0_6], %9 {strides = array<i32>} : memref<1024x16xf32, #tpu.memory_space<vmem>>, vector<1024x16xf32>,
    return
  }
  func.func @transform_0(%arg0: i32) -> (i32, i32) {
    %c0_i32 = arith.constant 0 : i32
    %c0_i32_0 = arith.constant 0 : i32
    return %arg0, %c0_i32 : i32, i32
  }
  func.func @transform_1(%arg0: i32) -> (i32, i32) {
    %c0_i32 = arith.constant 0 : i32
    %c0_i32_0 = arith.constant 0 : i32
    %c0_i32_1 = arith.constant 0 : i32
    return %c0_i32, %c0_i32_0 : i32, i32
  }
  func.func @transform_2(%arg0: i32) -> (i32, i32) {
    %c0_i32 = arith.constant 0 : i32
    %c0_i32_0 = arith.constant 0 : i32
    return %arg0, %c0_i32 : i32, i32
  }
}

module attributes {stable_mosaic.version = 11 : i64} {
  func.func @_conv_bn_lrelu_kernel(%arg0: i32, %arg1: memref<512x256xf32, #tpu.memory_space<vmem>>, %arg2: memref<256x32xf32, #tpu.memory_space<vmem>>, %arg3: memref<1x32xf32, #tpu.memory_space<vmem>>, %arg4: memref<1x32xf32, #tpu.memory_space<vmem>>, %arg5: memref<512x32xf32, #tpu.memory_space<vmem>>) attributes {dimension_semantics = [#tpu.dimension_semantics<arbitrary>], iteration_bounds = array<i64: 1>, scalar_prefetch = 0 : i64, scratch_operands = 0 : i64, tpu.core_type = #tpu.core_type<tc>, window_params = [{pipeline_mode = #tpu.pipeline_mode<synchronous>, transform_indices = @transform_0, window_bounds = array<i64: 512, 256>}, {pipeline_mode = #tpu.pipeline_mode<synchronous>, transform_indices = @transform_1, window_bounds = array<i64: 256, 32>}, {pipeline_mode = #tpu.pipeline_mode<synchronous>, transform_indices = @transform_2, window_bounds = array<i64: 1, 32>}, {pipeline_mode = #tpu.pipeline_mode<synchronous>, transform_indices = @transform_3, window_bounds = array<i64: 1, 32>}, {pipeline_mode = #tpu.pipeline_mode<synchronous>, transform_indices = @transform_4, window_bounds = array<i64: 512, 32>}]} {
    %c0 = arith.constant 0 : index
    %c0_0 = arith.constant 0 : index
    %0 = vector.load %arg1[%c0, %c0_0] : memref<512x256xf32, #tpu.memory_space<vmem>>, vector<512x256xf32>
    %c0_1 = arith.constant 0 : index
    %c0_2 = arith.constant 0 : index
    %1 = vector.load %arg2[%c0_1, %c0_2] : memref<256x32xf32, #tpu.memory_space<vmem>>, vector<256x32xf32>
    %2 = arith.truncf %0 : vector<512x256xf32> to vector<512x256xbf16>
    %3 = arith.truncf %1 : vector<256x32xf32> to vector<256x32xbf16>
    %cst = arith.constant dense<0.000000e+00> : vector<512x32xf32>
    %4 = tpu.matmul %2, %3, %cst {dimension_numbers = #tpu.dot_dimension_numbers<[1], [0], [0], [1], [0, 0, 1, 1], [], []>} : vector<512x256xbf16>, vector<256x32xbf16>, vector<512x32xf32> -> vector<512x32xf32>
    %cst_3 = arith.constant dense<0.000000e+00> : vector<32xf32>
    %5 = vector.multi_reduction <add>, %4, %cst_3 [0] : vector<512x32xf32> to vector<32xf32>
    %6 = vector.shape_cast %5 : vector<32xf32> to vector<1x32xf32>
    %cst_4 = arith.constant 5.120000e+02 : f32
    %7 = vector.broadcast %cst_4 : f32 to vector<1x32xf32>
    %8 = arith.divf %6, %7 : vector<1x32xf32>
    %9 = vector.broadcast %8 : vector<1x32xf32> to vector<512x32xf32>
    %10 = arith.subf %4, %9 : vector<512x32xf32>
    %11 = arith.mulf %10, %10 : vector<512x32xf32>
    %cst_5 = arith.constant dense<0.000000e+00> : vector<32xf32>
    %12 = vector.multi_reduction <add>, %11, %cst_5 [0] : vector<512x32xf32> to vector<32xf32>
    %13 = vector.shape_cast %12 : vector<32xf32> to vector<1x32xf32>
    %cst_6 = arith.constant 5.120000e+02 : f32
    %14 = vector.broadcast %cst_6 : f32 to vector<1x32xf32>
    %15 = arith.divf %13, %14 : vector<1x32xf32>
    %c0_7 = arith.constant 0 : index
    %c0_8 = arith.constant 0 : index
    %16 = vector.load %arg3[%c0_7, %c0_8] : memref<1x32xf32, #tpu.memory_space<vmem>>, vector<1x32xf32>
    %cst_9 = arith.constant 9.99999974E-6 : f32
    %17 = vector.broadcast %cst_9 : f32 to vector<1x32xf32>
    %18 = arith.addf %15, %17 : vector<1x32xf32>
    %19 = math.rsqrt %18 : vector<1x32xf32>
    %20 = arith.mulf %16, %19 : vector<1x32xf32>
    %21 = vector.broadcast %20 : vector<1x32xf32> to vector<512x32xf32>
    %22 = arith.mulf %10, %21 : vector<512x32xf32>
    %c0_10 = arith.constant 0 : index
    %c0_11 = arith.constant 0 : index
    %23 = vector.load %arg4[%c0_10, %c0_11] : memref<1x32xf32, #tpu.memory_space<vmem>>, vector<1x32xf32>
    %24 = vector.broadcast %23 : vector<1x32xf32> to vector<512x32xf32>
    %25 = arith.addf %22, %24 : vector<512x32xf32>
    %cst_12 = arith.constant 0.000000e+00 : f32
    %26 = vector.broadcast %cst_12 : f32 to vector<512x32xf32>
    %27 = arith.cmpf ogt, %25, %26 : vector<512x32xf32>
    %cst_13 = arith.constant 2.000000e-01 : f32
    %28 = vector.broadcast %cst_13 : f32 to vector<512x32xf32>
    %29 = arith.mulf %28, %25 : vector<512x32xf32>
    %30 = arith.select %27, %25, %29 : vector<512x32xi1>, vector<512x32xf32>
    %c0_14 = arith.constant 0 : index
    %c0_15 = arith.constant 0 : index
    %31 = vector.load %arg5[%c0_14, %c0_15] : memref<512x32xf32, #tpu.memory_space<vmem>>, vector<512x32xf32>
    tpu.vector_store %arg5[%c0_14, %c0_15], %30 {strides = array<i32>} : memref<512x32xf32, #tpu.memory_space<vmem>>, vector<512x32xf32>,
    return
  }
  func.func @transform_0(%arg0: i32) -> (i32, i32) {
    %c0_i32 = arith.constant 0 : i32
    %c0_i32_0 = arith.constant 0 : i32
    %c0_i32_1 = arith.constant 0 : i32
    return %c0_i32, %c0_i32_0 : i32, i32
  }
  func.func @transform_1(%arg0: i32) -> (i32, i32) {
    %c0_i32 = arith.constant 0 : i32
    %c0_i32_0 = arith.constant 0 : i32
    %c0_i32_1 = arith.constant 0 : i32
    return %c0_i32, %c0_i32_0 : i32, i32
  }
  func.func @transform_2(%arg0: i32) -> (i32, i32) {
    %c0_i32 = arith.constant 0 : i32
    %c0_i32_0 = arith.constant 0 : i32
    %c0_i32_1 = arith.constant 0 : i32
    return %c0_i32, %c0_i32_0 : i32, i32
  }
  func.func @transform_3(%arg0: i32) -> (i32, i32) {
    %c0_i32 = arith.constant 0 : i32
    %c0_i32_0 = arith.constant 0 : i32
    %c0_i32_1 = arith.constant 0 : i32
    return %c0_i32, %c0_i32_0 : i32, i32
  }
  func.func @transform_4(%arg0: i32) -> (i32, i32) {
    %c0_i32 = arith.constant 0 : i32
    %c0_i32_0 = arith.constant 0 : i32
    %c0_i32_1 = arith.constant 0 : i32
    return %c0_i32, %c0_i32_0 : i32, i32
  }
}

module attributes {stable_mosaic.version = 11 : i64} {
  func.func @_conv_bn_lrelu_kernel(%arg0: i32, %arg1: memref<128x512xf32, #tpu.memory_space<vmem>>, %arg2: memref<512x64xf32, #tpu.memory_space<vmem>>, %arg3: memref<1x64xf32, #tpu.memory_space<vmem>>, %arg4: memref<1x64xf32, #tpu.memory_space<vmem>>, %arg5: memref<128x64xf32, #tpu.memory_space<vmem>>) attributes {dimension_semantics = [#tpu.dimension_semantics<arbitrary>], iteration_bounds = array<i64: 1>, scalar_prefetch = 0 : i64, scratch_operands = 0 : i64, tpu.core_type = #tpu.core_type<tc>, window_params = [{pipeline_mode = #tpu.pipeline_mode<synchronous>, transform_indices = @transform_0, window_bounds = array<i64: 128, 512>}, {pipeline_mode = #tpu.pipeline_mode<synchronous>, transform_indices = @transform_1, window_bounds = array<i64: 512, 64>}, {pipeline_mode = #tpu.pipeline_mode<synchronous>, transform_indices = @transform_2, window_bounds = array<i64: 1, 64>}, {pipeline_mode = #tpu.pipeline_mode<synchronous>, transform_indices = @transform_3, window_bounds = array<i64: 1, 64>}, {pipeline_mode = #tpu.pipeline_mode<synchronous>, transform_indices = @transform_4, window_bounds = array<i64: 128, 64>}]} {
    %c0 = arith.constant 0 : index
    %c0_0 = arith.constant 0 : index
    %0 = vector.load %arg1[%c0, %c0_0] : memref<128x512xf32, #tpu.memory_space<vmem>>, vector<128x512xf32>
    %c0_1 = arith.constant 0 : index
    %c0_2 = arith.constant 0 : index
    %1 = vector.load %arg2[%c0_1, %c0_2] : memref<512x64xf32, #tpu.memory_space<vmem>>, vector<512x64xf32>
    %2 = arith.truncf %0 : vector<128x512xf32> to vector<128x512xbf16>
    %3 = arith.truncf %1 : vector<512x64xf32> to vector<512x64xbf16>
    %cst = arith.constant dense<0.000000e+00> : vector<128x64xf32>
    %4 = tpu.matmul %2, %3, %cst {dimension_numbers = #tpu.dot_dimension_numbers<[1], [0], [0], [1], [0, 0, 1, 1], [], []>} : vector<128x512xbf16>, vector<512x64xbf16>, vector<128x64xf32> -> vector<128x64xf32>
    %cst_3 = arith.constant dense<0.000000e+00> : vector<64xf32>
    %5 = vector.multi_reduction <add>, %4, %cst_3 [0] : vector<128x64xf32> to vector<64xf32>
    %6 = vector.shape_cast %5 : vector<64xf32> to vector<1x64xf32>
    %cst_4 = arith.constant 1.280000e+02 : f32
    %7 = vector.broadcast %cst_4 : f32 to vector<1x64xf32>
    %8 = arith.divf %6, %7 : vector<1x64xf32>
    %9 = vector.broadcast %8 : vector<1x64xf32> to vector<128x64xf32>
    %10 = arith.subf %4, %9 : vector<128x64xf32>
    %11 = arith.mulf %10, %10 : vector<128x64xf32>
    %cst_5 = arith.constant dense<0.000000e+00> : vector<64xf32>
    %12 = vector.multi_reduction <add>, %11, %cst_5 [0] : vector<128x64xf32> to vector<64xf32>
    %13 = vector.shape_cast %12 : vector<64xf32> to vector<1x64xf32>
    %cst_6 = arith.constant 1.280000e+02 : f32
    %14 = vector.broadcast %cst_6 : f32 to vector<1x64xf32>
    %15 = arith.divf %13, %14 : vector<1x64xf32>
    %c0_7 = arith.constant 0 : index
    %c0_8 = arith.constant 0 : index
    %16 = vector.load %arg3[%c0_7, %c0_8] : memref<1x64xf32, #tpu.memory_space<vmem>>, vector<1x64xf32>
    %cst_9 = arith.constant 9.99999974E-6 : f32
    %17 = vector.broadcast %cst_9 : f32 to vector<1x64xf32>
    %18 = arith.addf %15, %17 : vector<1x64xf32>
    %19 = math.rsqrt %18 : vector<1x64xf32>
    %20 = arith.mulf %16, %19 : vector<1x64xf32>
    %21 = vector.broadcast %20 : vector<1x64xf32> to vector<128x64xf32>
    %22 = arith.mulf %10, %21 : vector<128x64xf32>
    %c0_10 = arith.constant 0 : index
    %c0_11 = arith.constant 0 : index
    %23 = vector.load %arg4[%c0_10, %c0_11] : memref<1x64xf32, #tpu.memory_space<vmem>>, vector<1x64xf32>
    %24 = vector.broadcast %23 : vector<1x64xf32> to vector<128x64xf32>
    %25 = arith.addf %22, %24 : vector<128x64xf32>
    %cst_12 = arith.constant 0.000000e+00 : f32
    %26 = vector.broadcast %cst_12 : f32 to vector<128x64xf32>
    %27 = arith.cmpf ogt, %25, %26 : vector<128x64xf32>
    %cst_13 = arith.constant 2.000000e-01 : f32
    %28 = vector.broadcast %cst_13 : f32 to vector<128x64xf32>
    %29 = arith.mulf %28, %25 : vector<128x64xf32>
    %30 = arith.select %27, %25, %29 : vector<128x64xi1>, vector<128x64xf32>
    %c0_14 = arith.constant 0 : index
    %c0_15 = arith.constant 0 : index
    %31 = vector.load %arg5[%c0_14, %c0_15] : memref<128x64xf32, #tpu.memory_space<vmem>>, vector<128x64xf32>
    tpu.vector_store %arg5[%c0_14, %c0_15], %30 {strides = array<i32>} : memref<128x64xf32, #tpu.memory_space<vmem>>, vector<128x64xf32>,
    return
  }
  func.func @transform_0(%arg0: i32) -> (i32, i32) {
    %c0_i32 = arith.constant 0 : i32
    %c0_i32_0 = arith.constant 0 : i32
    %c0_i32_1 = arith.constant 0 : i32
    return %c0_i32, %c0_i32_0 : i32, i32
  }
  func.func @transform_1(%arg0: i32) -> (i32, i32) {
    %c0_i32 = arith.constant 0 : i32
    %c0_i32_0 = arith.constant 0 : i32
    %c0_i32_1 = arith.constant 0 : i32
    return %c0_i32, %c0_i32_0 : i32, i32
  }
  func.func @transform_2(%arg0: i32) -> (i32, i32) {
    %c0_i32 = arith.constant 0 : i32
    %c0_i32_0 = arith.constant 0 : i32
    %c0_i32_1 = arith.constant 0 : i32
    return %c0_i32, %c0_i32_0 : i32, i32
  }
  func.func @transform_3(%arg0: i32) -> (i32, i32) {
    %c0_i32 = arith.constant 0 : i32
    %c0_i32_0 = arith.constant 0 : i32
    %c0_i32_1 = arith.constant 0 : i32
    return %c0_i32, %c0_i32_0 : i32, i32
  }
  func.func @transform_4(%arg0: i32) -> (i32, i32) {
    %c0_i32 = arith.constant 0 : i32
    %c0_i32_0 = arith.constant 0 : i32
    %c0_i32_1 = arith.constant 0 : i32
    return %c0_i32, %c0_i32_0 : i32, i32
  }
}

module attributes {stable_mosaic.version = 11 : i64} {
  func.func @_final_kernel(%arg0: i32, %arg1: memref<32x1024xf32, #tpu.memory_space<vmem>>, %arg2: memref<1024x128xf32, #tpu.memory_space<vmem>>, %arg3: memref<1x128xf32, #tpu.memory_space<vmem>>, %arg4: memref<1x128xf32, #tpu.memory_space<vmem>>, %arg5: memref<32x128xf32, #tpu.memory_space<vmem>>, %arg6: memref<2x32xf32, #tpu.memory_space<vmem>>, %arg7: memref<2x1xf32, #tpu.memory_space<vmem>>) attributes {dimension_semantics = [#tpu.dimension_semantics<arbitrary>], iteration_bounds = array<i64: 1>, scalar_prefetch = 0 : i64, scratch_operands = 0 : i64, tpu.core_type = #tpu.core_type<tc>, window_params = [{pipeline_mode = #tpu.pipeline_mode<synchronous>, transform_indices = @transform_0, window_bounds = array<i64: 32, 1024>}, {pipeline_mode = #tpu.pipeline_mode<synchronous>, transform_indices = @transform_1, window_bounds = array<i64: 1024, 128>}, {pipeline_mode = #tpu.pipeline_mode<synchronous>, transform_indices = @transform_2, window_bounds = array<i64: 1, 128>}, {pipeline_mode = #tpu.pipeline_mode<synchronous>, transform_indices = @transform_3, window_bounds = array<i64: 1, 128>}, {pipeline_mode = #tpu.pipeline_mode<synchronous>, transform_indices = @transform_4, window_bounds = array<i64: 32, 128>}, {pipeline_mode = #tpu.pipeline_mode<synchronous>, transform_indices = @transform_5, window_bounds = array<i64: 2, 32>}, {pipeline_mode = #tpu.pipeline_mode<synchronous>, transform_indices = @transform_6, window_bounds = array<i64: 2, 1>}]} {
    %c0 = arith.constant 0 : index
    %c0_0 = arith.constant 0 : index
    %0 = vector.load %arg1[%c0, %c0_0] : memref<32x1024xf32, #tpu.memory_space<vmem>>, vector<32x1024xf32>
    %c0_1 = arith.constant 0 : index
    %c0_2 = arith.constant 0 : index
    %1 = vector.load %arg2[%c0_1, %c0_2] : memref<1024x128xf32, #tpu.memory_space<vmem>>, vector<1024x128xf32>
    %2 = arith.truncf %0 : vector<32x1024xf32> to vector<32x1024xbf16>
    %3 = arith.truncf %1 : vector<1024x128xf32> to vector<1024x128xbf16>
    %cst = arith.constant dense<0.000000e+00> : vector<32x128xf32>
    %4 = tpu.matmul %2, %3, %cst {dimension_numbers = #tpu.dot_dimension_numbers<[1], [0], [0], [1], [0, 0, 1, 1], [], []>} : vector<32x1024xbf16>, vector<1024x128xbf16>, vector<32x128xf32> -> vector<32x128xf32>
    %cst_3 = arith.constant dense<0.000000e+00> : vector<128xf32>
    %5 = vector.multi_reduction <add>, %4, %cst_3 [0] : vector<32x128xf32> to vector<128xf32>
    %6 = vector.shape_cast %5 : vector<128xf32> to vector<1x128xf32>
    %cst_4 = arith.constant 3.200000e+01 : f32
    %7 = vector.broadcast %cst_4 : f32 to vector<1x128xf32>
    %8 = arith.divf %6, %7 : vector<1x128xf32>
    %9 = vector.broadcast %8 : vector<1x128xf32> to vector<32x128xf32>
    %10 = arith.subf %4, %9 : vector<32x128xf32>
    %11 = arith.mulf %10, %10 : vector<32x128xf32>
    %cst_5 = arith.constant dense<0.000000e+00> : vector<128xf32>
    %12 = vector.multi_reduction <add>, %11, %cst_5 [0] : vector<32x128xf32> to vector<128xf32>
    %13 = vector.shape_cast %12 : vector<128xf32> to vector<1x128xf32>
    %cst_6 = arith.constant 3.200000e+01 : f32
    %14 = vector.broadcast %cst_6 : f32 to vector<1x128xf32>
    %15 = arith.divf %13, %14 : vector<1x128xf32>
    %c0_7 = arith.constant 0 : index
    %c0_8 = arith.constant 0 : index
    %16 = vector.load %arg3[%c0_7, %c0_8] : memref<1x128xf32, #tpu.memory_space<vmem>>, vector<1x128xf32>
    %cst_9 = arith.constant 9.99999974E-6 : f32
    %17 = vector.broadcast %cst_9 : f32 to vector<1x128xf32>
    %18 = arith.addf %15, %17 : vector<1x128xf32>
    %19 = math.rsqrt %18 : vector<1x128xf32>
    %20 = arith.mulf %16, %19 : vector<1x128xf32>
    %21 = vector.broadcast %20 : vector<1x128xf32> to vector<32x128xf32>
    %22 = arith.mulf %10, %21 : vector<32x128xf32>
    %c0_10 = arith.constant 0 : index
    %c0_11 = arith.constant 0 : index
    %23 = vector.load %arg4[%c0_10, %c0_11] : memref<1x128xf32, #tpu.memory_space<vmem>>, vector<1x128xf32>
    %24 = vector.broadcast %23 : vector<1x128xf32> to vector<32x128xf32>
    %25 = arith.addf %22, %24 : vector<32x128xf32>
    %cst_12 = arith.constant 0.000000e+00 : f32
    %26 = vector.broadcast %cst_12 : f32 to vector<32x128xf32>
    %27 = arith.cmpf ogt, %25, %26 : vector<32x128xf32>
    %cst_13 = arith.constant 2.000000e-01 : f32
    %28 = vector.broadcast %cst_13 : f32 to vector<32x128xf32>
    %29 = arith.mulf %28, %25 : vector<32x128xf32>
    %30 = arith.select %27, %25, %29 : vector<32x128xi1>, vector<32x128xf32>
    %c0_14 = arith.constant 0 : index
    %c0_15 = arith.constant 0 : index
    %31 = vector.load %arg5[%c0_14, %c0_15] : memref<32x128xf32, #tpu.memory_space<vmem>>, vector<32x128xf32>
    %32 = arith.mulf %30, %31 : vector<32x128xf32>
    %c0_16 = arith.constant 0 : index
    %c0_17 = arith.constant 0 : index
    %33 = vector.load %arg6[%c0_16, %c0_17] : memref<2x32xf32, #tpu.memory_space<vmem>>, vector<2x32xf32>
    %cst_18 = arith.constant dense<0.000000e+00> : vector<2x128xf32>
    %34 = tpu.matmul %33, %32, %cst_18 {dimension_numbers = #tpu.dot_dimension_numbers<[1], [0], [0], [1], [0, 0, 1, 1], [], []>} : vector<2x32xf32>, vector<32x128xf32>, vector<2x128xf32> -> vector<2x128xf32>
    %cst_19 = arith.constant dense<0.000000e+00> : vector<2xf32>
    %35 = vector.multi_reduction <add>, %34, %cst_19 [1] : vector<2x128xf32> to vector<2xf32>
    %36 = vector.shape_cast %35 : vector<2xf32> to vector<2x1xf32>
    %37 = arith.negf %36 : vector<2x1xf32>
    %38 = math.exp %37 : vector<2x1xf32>
    %cst_20 = arith.constant 1.000000e+00 : f32
    %39 = vector.broadcast %cst_20 : f32 to vector<2x1xf32>
    %40 = arith.addf %39, %38 : vector<2x1xf32>
    %41 = arith.divf %39, %40 : vector<2x1xf32>
    %c0_21 = arith.constant 0 : index
    %c0_22 = arith.constant 0 : index
    %42 = vector.load %arg7[%c0_21, %c0_22] : memref<2x1xf32, #tpu.memory_space<vmem>>, vector<2x1xf32>
    tpu.vector_store %arg7[%c0_21, %c0_22], %41 {strides = array<i32>} : memref<2x1xf32, #tpu.memory_space<vmem>>, vector<2x1xf32>,
    return
  }
  func.func @transform_0(%arg0: i32) -> (i32, i32) {
    %c0_i32 = arith.constant 0 : i32
    %c0_i32_0 = arith.constant 0 : i32
    %c0_i32_1 = arith.constant 0 : i32
    return %c0_i32, %c0_i32_0 : i32, i32
  }
  func.func @transform_1(%arg0: i32) -> (i32, i32) {
    %c0_i32 = arith.constant 0 : i32
    %c0_i32_0 = arith.constant 0 : i32
    %c0_i32_1 = arith.constant 0 : i32
    return %c0_i32, %c0_i32_0 : i32, i32
  }
  func.func @transform_2(%arg0: i32) -> (i32, i32) {
    %c0_i32 = arith.constant 0 : i32
    %c0_i32_0 = arith.constant 0 : i32
    %c0_i32_1 = arith.constant 0 : i32
    return %c0_i32, %c0_i32_0 : i32, i32
  }
  func.func @transform_3(%arg0: i32) -> (i32, i32) {
    %c0_i32 = arith.constant 0 : i32
    %c0_i32_0 = arith.constant 0 : i32
    %c0_i32_1 = arith.constant 0 : i32
    return %c0_i32, %c0_i32_0 : i32, i32
  }
  func.func @transform_4(%arg0: i32) -> (i32, i32) {
    %c0_i32 = arith.constant 0 : i32
    %c0_i32_0 = arith.constant 0 : i32
    %c0_i32_1 = arith.constant 0 : i32
    return %c0_i32, %c0_i32_0 : i32, i32
  }
  func.func @transform_5(%arg0: i32) -> (i32, i32) {
    %c0_i32 = arith.constant 0 : i32
    %c0_i32_0 = arith.constant 0 : i32
    %c0_i32_1 = arith.constant 0 : i32
    return %c0_i32, %c0_i32_0 : i32, i32
  }
  func.func @transform_6(%arg0: i32) -> (i32, i32) {
    %c0_i32 = arith.constant 0 : i32
    %c0_i32_0 = arith.constant 0 : i32
    %c0_i32_1 = arith.constant 0 : i32
    return %c0_i32, %c0_i32_0 : i32, i32
  }
}

</mosaic_0001>

<bundles_post_ra>
// kernel: discriminator_forward.4
= control target key start
LH: loop header
LB: loop body
LE: loop exit
PB: predicated region body
PF: predicated region fallthrough
CT: control target
= control target key end

     0   :  { %s1969_s9 = smov 0   ;;  %s2463_s0 = inlined_call_operand.vmem [shape: f32[2048,48], index: 0, kind: input, shape index: {}]   ;;  %s2464_s1 = inlined_call_operand.vmem [shape: f32[48,16], index: 1, kind: input, shape index: {}]   ;;  %s2465_s2 = inlined_call_operand.vmem [shape: f32[2048,16], index: 2, kind: output, shape index: {}]  }
   0x1 LB: > { %s1656_s10 = sadd.s32 4294967295, %s1952_s9   ;;  %p1660_p0 = scmp.ge.s32.totalorder %s1952_s9, 1  ;;  %s1952_s9 = sphi %s1969_s9, %s12_s9  }
   0x2   : > { %p113_p1 = scmp.lt.s32.totalorder %s1952_s9, 3 }
   0x4   : > { %p114_p2 = pnand %p1660_p0, %p113_p1 }
   0x5   : > { %s1661_s17 = sshll.u32 (!%p114_p2), %s1656_s10, 7 }
   0x6   : > { %117 = sbr.rel (%p114_p2) target bundleno = 350 (0x15e), region = 28  ;;  %p136_p3 = scmp.lt.s32.totalorder (!%p114_p2), %s1661_s17, 255 }
   0xb   : > { %v280_v0 = vld [vmem:[%s2464_s1 + $0x20] sm:$0xff]  ;;  %v281_v1 = vld [vmem:[%s2464_s1 + $0x28] sm:$0xff]  ;;  %v278_v2 = vld [vmem:[%s2464_s1 + $0x10] sm:$0xff]  ;;  %s2467_s17 = smov (!%p136_p3, %s1661_s17), 255  ;;  %vm349_vm0 = vcmask 392192   ;;  %vm1471_vm1 = vcmask 130048  }
   0xc   : > { %v348_v3 = vpack.c.bf16 %v281_v1, %v280_v0  ;;  %v279_v4 = vld [vmem:[%s2464_s1 + $0x18] sm:$0xff]  ;;  %v276_v6 = vld [vmem:[%s2464_s1] sm:$0xff]  ;;  %v277_v7 = vld [vmem:[%s2464_s1 + $0x8] sm:$0xff]  ;;  %s1662_s24 = sshll.u32 %s2467_s17, 3 }
   0xd   : > { %v347_v5 = vpack.c.bf16 %v279_v4, %v278_v2  ;;  %v346_v8 = vpack.c.bf16 %v277_v7, %v276_v6  ;;  %s2003_s27 = scalar_lea.vmem %s2463_s0, %s1662_s24  ;;  %s2202_s30 = scalar_lea.vmem %s2465_s2, %s1662_s24 }
   0xe   : > { %1798 = vmatprep.subr.bf16.mxu0 %v348_v3  ;;  %1932 = vmatprep.subr.bf16.mxu1 %v348_v3  ;;  %v148_v9 = vld [vmem:[%s2003_s27] sm:$0xff]  ;;  %v149_v10 = vld [vmem:[%s2003_s27 + $0x8] sm:$0xff]  ;;  %v150_v14 = vld [vmem:[%s2003_s27 + $0x10] sm:$0xff] }
   0xf   : > { %1799 = vmatpush3.bf16.msra.mxu0 %v348_v3  ;;  %1935 = vmatpush3.bf16.msra.mxu1 %v348_v3  ;;  %v212_v11 = vld [vmem:[%s2003_s27 + $0x200] sm:$0xff]  ;;  %v282_v12 = vpack.c.bf16 %v149_v10, %v148_v9  ;;  %v213_v13 = vld [vmem:[%s2003_s27 + $0x208] sm:$0xff]  ;;  %v151_v15 = vld [vmem:[%s2003_s27 + $0x18] sm:$0xff] }
  0x10   : > { %1800 = vmatprep.subr.bf16.mxu0 %v347_v5  ;;  %1933 = vmatprep.subr.bf16.mxu1 %v347_v5  ;;  %v314_v16 = vpack.c.bf16 %v213_v13, %v212_v11  ;;  %v214_v17 = vld [vmem:[%s2003_s27 + $0x210] sm:$0xff]  ;;  %v215_v18 = vld [vmem:[%s2003_s27 + $0x218] sm:$0xff]  ;;  %v152_v19 = vld [vmem:[%s2003_s27 + $0x20] sm:$0xff]  ;;  %v283_v23 = vpack.c.bf16 %v151_v15, %v150_v14 }
  0x11   : > { %1804 = vmatprep.mubr.msk.bf16.mxu0 %vm349_vm0, %v282_v12  ;;  %v153_v20 = vld [vmem:[%s2003_s27 + $0x28] sm:$0xff]  ;;  %v216_v21 = vld [vmem:[%s2003_s27 + $0x220] sm:$0xff]  ;;  %v315_v24 = vpack.c.bf16 %v215_v18, %v214_v17  ;;  %v154_v27 = vld [vmem:[%s2003_s27 + $0x30] sm:$0xff] }
  0x12   : > { %v217_v22 = vld [vmem:[%s2003_s27 + $0x228] sm:$0xff]  ;;  %1868 = vmatprep.mubr.msk.bf16.mxu1 %vm349_vm0, %v314_v16  ;;  %v284_v25 = vpack.c.bf16 %v153_v20, %v152_v19  ;;  %v155_v28 = vld [vmem:[%s2003_s27 + $0x38] sm:$0xff]  ;;  %v218_v29 = vld [vmem:[%s2003_s27 + $0x230] sm:$0xff] }
  0x13   : > { %1801 = vmatpush3.bf16.msra.mxu0 %v347_v5  ;;  %1936 = vmatpush3.bf16.msra.mxu1 %v347_v5  ;;  %v316_v26 = vpack.c.bf16 %v217_v22, %v216_v21  ;;  %v219_v30 = vld [vmem:[%s2003_s27 + $0x238] sm:$0xff]  ;;  %v156_v31 = vld [vmem:[%s2003_s27 + $0x40] sm:$0xff]  ;;  %v157_v32 = vld [vmem:[%s2003_s27 + $0x48] sm:$0xff]  ;;  %v285_v35 = vpack.c.bf16 %v155_v28, %v154_v27 }
  0x14   : > { %1802 = vmatprep.subr.bf16.mxu0 %v346_v8  ;;  %1934 = vmatprep.subr.bf16.mxu1 %v346_v8  ;;  %v220_v33 = vld [vmem:[%s2003_s27 + $0x240] sm:$0xff]  ;;  %v221_v34 = vld [vmem:[%s2003_s27 + $0x248] sm:$0xff]  ;;  %v317_v36 = vpack.c.bf16 %v219_v30, %v218_v29  ;;  %v286_v37 = vpack.c.bf16 %v157_v32, %v156_v31  ;;  %v158_v39 = vld [vmem:[%s2003_s27 + $0x50] sm:$0xff] }
  0x15   : > { %v318_v38 = vpack.c.bf16 %v221_v34, %v220_v33  ;;  %v159_v40 = vld [vmem:[%s2003_s27 + $0x58] sm:$0xff]  ;;  %v222_v41 = vld [vmem:[%s2003_s27 + $0x250] sm:$0xff]  ;;  %v160_v43 = vld [vmem:[%s2003_s27 + $0x60] sm:$0xff] }
  0x16   : > { %v223_v42 = vld [vmem:[%s2003_s27 + $0x258] sm:$0xff]  ;;  %v161_v44 = vld [vmem:[%s2003_s27 + $0x68] sm:$0xff]  ;;  %v224_v45 = vld [vmem:[%s2003_s27 + $0x260] sm:$0xff]  ;;  %v287_v47 = vpack.c.bf16 %v159_v40, %v158_v39 }
  0x17   : > { %1803 = vmatpush3.bf16.msra.mxu0 %v346_v8  ;;  %1937 = vmatpush3.bf16.msra.mxu1 %v346_v8  ;;  %v225_v46 = vld [vmem:[%s2003_s27 + $0x268] sm:$0xff]  ;;  %v319_v48 = vpack.c.bf16 %v223_v42, %v222_v41  ;;  %v288_v49 = vpack.c.bf16 %v161_v44, %v160_v43  ;;  %v162_v51 = vld [vmem:[%s2003_s27 + $0x70] sm:$0xff]  ;;  %v163_v52 = vld [vmem:[%s2003_s27 + $0x78] sm:$0xff] }
  0x18   : > { %v320_v50 = vpack.c.bf16 %v225_v46, %v224_v45  ;;  %v226_v53 = vld [vmem:[%s2003_s27 + $0x270] sm:$0xff]  ;;  %v227_v54 = vld [vmem:[%s2003_s27 + $0x278] sm:$0xff]  ;;  %v164_v55 = vld [vmem:[%s2003_s27 + $0x80] sm:$0xff]  ;;  %v289_v59 = vpack.c.bf16 %v163_v52, %v162_v51 }
  0x19   : > { %v165_v56 = vld [vmem:[%s2003_s27 + $0x88] sm:$0xff]  ;;  %v228_v57 = vld [vmem:[%s2003_s27 + $0x280] sm:$0xff]  ;;  %v321_v60 = vpack.c.bf16 %v227_v54, %v226_v53  ;;  %v166_v63 = vld [vmem:[%s2003_s27 + $0x90] sm:$0xff] }
  0x1a   : > { %1805 = vmatmul.mubr.msk.bf16.vlgmr.msra.gmra.mxu0 %vm349_vm0, %v283_v23  ;;  %1869 = vmatmul.mubr.msk.bf16.vlgmr.msra.gmra.mxu1 %vm349_vm0, %v315_v24  ;;  %v229_v58 = vld [vmem:[%s2003_s27 + $0x288] sm:$0xff]  ;;  %v290_v61 = vpack.c.bf16 %v165_v56, %v164_v55  ;;  %v167_v0 = vld [vmem:[%s2003_s27 + $0x98] sm:$0xff]  ;;  %v230_v1 = vld [vmem:[%s2003_s27 + $0x290] sm:$0xff] }
  0x1b   : > { %1808 = vmatprep.mubr.msk.bf16.mxu0 %vm349_vm0, %v284_v25  ;;  %1872 = vmatprep.mubr.msk.bf16.mxu1 %vm349_vm0, %v316_v26  ;;  %v322_v62 = vpack.c.bf16 %v229_v58, %v228_v57  ;;  %v231_v2 = vld [vmem:[%s2003_s27 + $0x298] sm:$0xff]  ;;  %v168_v3 = vld [vmem:[%s2003_s27 + $0xa0] sm:$0xff]  ;;  %v169_v4 = vld [vmem:[%s2003_s27 + $0xa8] sm:$0xff]  ;;  %v291_v7 = vpack.c.bf16 %v167_v0, %v166_v63 }
  0x1c   : > { %v232_v5 = vld [vmem:[%s2003_s27 + $0x2a0] sm:$0xff]  ;;  %v233_v6 = vld [vmem:[%s2003_s27 + $0x2a8] sm:$0xff]  ;;  %v323_v8 = vpack.c.bf16 %v231_v2, %v230_v1  ;;  %v292_v9 = vpack.c.bf16 %v169_v4, %v168_v3  ;;  %v170_v11 = vld [vmem:[%s2003_s27 + $0xb0] sm:$0xff] }
  0x1d   : > { %v324_v10 = vpack.c.bf16 %v233_v6, %v232_v5  ;;  %v171_v12 = vld [vmem:[%s2003_s27 + $0xb8] sm:$0xff]  ;;  %v234_v13 = vld [vmem:[%s2003_s27 + $0x2b0] sm:$0xff]  ;;  %v172_v15 = vld [vmem:[%s2003_s27 + $0xc0] sm:$0xff] }
  0x1e   : > { %v235_v14 = vld [vmem:[%s2003_s27 + $0x2b8] sm:$0xff]  ;;  %v173_v16 = vld [vmem:[%s2003_s27 + $0xc8] sm:$0xff]  ;;  %v236_v17 = vld [vmem:[%s2003_s27 + $0x2c0] sm:$0xff]  ;;  %v293_v19 = vpack.c.bf16 %v171_v12, %v170_v11 }
  0x1f   : > { %v237_v18 = vld [vmem:[%s2003_s27 + $0x2c8] sm:$0xff]  ;;  %v325_v20 = vpack.c.bf16 %v235_v14, %v234_v13  ;;  %v294_v21 = vpack.c.bf16 %v173_v16, %v172_v15  ;;  %v174_v23 = vld [vmem:[%s2003_s27 + $0xd0] sm:$0xff]  ;;  %v175_v24 = vld [vmem:[%s2003_s27 + $0xd8] sm:$0xff] }
  0x20   : > { %v326_v22 = vpack.c.bf16 %v237_v18, %v236_v17  ;;  %v238_v25 = vld [vmem:[%s2003_s27 + $0x2d0] sm:$0xff]  ;;  %v239_v26 = vld [vmem:[%s2003_s27 + $0x2d8] sm:$0xff]  ;;  %v176_v27 = vld [vmem:[%s2003_s27 + $0xe0] sm:$0xff]  ;;  %v295_v31 = vpack.c.bf16 %v175_v24, %v174_v23 }
  0x21   : > { %v177_v28 = vld [vmem:[%s2003_s27 + $0xe8] sm:$0xff]  ;;  %v240_v29 = vld [vmem:[%s2003_s27 + $0x2e0] sm:$0xff]  ;;  %v327_v32 = vpack.c.bf16 %v239_v26, %v238_v25 }
  0x22   : > { %1809 = vmatmul.mubr.msk.bf16.gmra.mxu0 %vm349_vm0, %v285_v35  ;;  %1873 = vmatmul.mubr.msk.bf16.gmra.mxu1 %vm349_vm0, %v317_v36  ;;  %v241_v30 = vld [vmem:[%s2003_s27 + $0x2e8] sm:$0xff]  ;;  %v296_v33 = vpack.c.bf16 %v177_v28, %v176_v27  ;;  %v178_v35 = vld [vmem:[%s2003_s27 + $0xf0] sm:$0xff]  ;;  %v179_v36 = vld [vmem:[%s2003_s27 + $0xf8] sm:$0xff] }
  0x23   : > { %1812 = vmatprep.mubr.msk.bf16.mxu0 %vm349_vm0, %v286_v37  ;;  %1876 = vmatprep.mubr.msk.bf16.mxu1 %vm349_vm0, %v318_v38  ;;  %v328_v34 = vpack.c.bf16 %v241_v30, %v240_v29  ;;  %v242_v37 = vld [vmem:[%s2003_s27 + $0x2f0] sm:$0xff]  ;;  %v243_v38 = vld [vmem:[%s2003_s27 + $0x2f8] sm:$0xff]  ;;  %v180_v39 = vld [vmem:[%s2003_s27 + $0x100] sm:$0xff]  ;;  %v297_v43 = vpack.c.bf16 %v179_v36, %v178_v35 }
  0x24   : > { %v181_v40 = vld [vmem:[%s2003_s27 + $0x108] sm:$0xff]  ;;  %v244_v41 = vld [vmem:[%s2003_s27 + $0x300] sm:$0xff]  ;;  %v329_v44 = vpack.c.bf16 %v243_v38, %v242_v37 }
  0x25   : > { %v245_v42 = vld [vmem:[%s2003_s27 + $0x308] sm:$0xff]  ;;  %v298_v45 = vpack.c.bf16 %v181_v40, %v180_v39  ;;  %v184_v51 = vld [vmem:[%s2003_s27 + $0x120] sm:$0xff] }
  0x26   : > { %v330_v46 = vpack.c.bf16 %v245_v42, %v244_v41  ;;  %v185_v52 = vld [vmem:[%s2003_s27 + $0x128] sm:$0xff]  ;;  %v248_v53 = vld [vmem:[%s2003_s27 + $0x320] sm:$0xff] }
  0x27   : > { %v249_v54 = vld [vmem:[%s2003_s27 + $0x328] sm:$0xff]  ;;  %v300_v57 = vpack.c.bf16 %v185_v52, %v184_v51  ;;  %v188_v63 = vld [vmem:[%s2003_s27 + $0x140] sm:$0xff] }
  0x28   : > { %v332_v58 = vpack.c.bf16 %v249_v54, %v248_v53  ;;  %v189_v0 = vld [vmem:[%s2003_s27 + $0x148] sm:$0xff]  ;;  %v252_v1 = vld [vmem:[%s2003_s27 + $0x340] sm:$0xff] }
  0x29   : > { %v253_v2 = vld [vmem:[%s2003_s27 + $0x348] sm:$0xff]  ;;  %v302_v5 = vpack.c.bf16 %v189_v0, %v188_v63  ;;  %v192_v11 = vld [vmem:[%s2003_s27 + $0x160] sm:$0xff] }
  0x2a   : > { %1813 = vmatmul.mubr.msk.bf16.gmra.mxu0 %vm349_vm0, %v287_v47  ;;  %1877 = vmatmul.mubr.msk.bf16.gmra.mxu1 %vm349_vm0, %v319_v48  ;;  %v182_v47 = vld [vmem:[%s2003_s27 + $0x110] sm:$0xff]  ;;  %v183_v48 = vld [vmem:[%s2003_s27 + $0x118] sm:$0xff]  ;;  %v334_v6 = vpack.c.bf16 %v253_v2, %v252_v1  ;;  %v193_v12 = vld [vmem:[%s2003_s27 + $0x168] sm:$0xff] }
  0x2b   : > { %1816 = vmatprep.mubr.msk.bf16.mxu0 %vm349_vm0, %v288_v49  ;;  %1880 = vmatprep.mubr.msk.bf16.mxu1 %vm349_vm0, %v320_v50  ;;  %v246_v49 = vld [vmem:[%s2003_s27 + $0x310] sm:$0xff]  ;;  %v247_v50 = vld [vmem:[%s2003_s27 + $0x318] sm:$0xff]  ;;  %v299_v55 = vpack.c.bf16 %v183_v48, %v182_v47  ;;  %v256_v13 = vld [vmem:[%s2003_s27 + $0x360] sm:$0xff]  ;;  %v304_v17 = vpack.c.bf16 %v193_v12, %v192_v11 }
  0x2c   : > { %v331_v56 = vpack.c.bf16 %v247_v50, %v246_v49  ;;  %v257_v14 = vld [vmem:[%s2003_s27 + $0x368] sm:$0xff]  ;;  %v196_v23 = vld [vmem:[%s2003_s27 + $0x180] sm:$0xff] }
  0x2d   : > { %v336_v18 = vpack.c.bf16 %v257_v14, %v256_v13  ;;  %v197_v24 = vld [vmem:[%s2003_s27 + $0x188] sm:$0xff]  ;;  %v260_v25 = vld [vmem:[%s2003_s27 + $0x380] sm:$0xff] }
  0x2e   : > { %v261_v26 = vld [vmem:[%s2003_s27 + $0x388] sm:$0xff]  ;;  %v306_v29 = vpack.c.bf16 %v197_v24, %v196_v23  ;;  %v200_v35 = vld [vmem:[%s2003_s27 + $0x1a0] sm:$0xff] }
  0x2f   : > { %v338_v30 = vpack.c.bf16 %v261_v26, %v260_v25  ;;  %v201_v36 = vld [vmem:[%s2003_s27 + $0x1a8] sm:$0xff]  ;;  %v264_v37 = vld [vmem:[%s2003_s27 + $0x3a0] sm:$0xff] }
  0x30   : > { %v265_v38 = vld [vmem:[%s2003_s27 + $0x3a8] sm:$0xff]  ;;  %v308_v41 = vpack.c.bf16 %v201_v36, %v200_v35  ;;  %v204_v47 = vld [vmem:[%s2003_s27 + $0x1c0] sm:$0xff] }
  0x31   : > { %v340_v42 = vpack.c.bf16 %v265_v38, %v264_v37  ;;  %v205_v48 = vld [vmem:[%s2003_s27 + $0x1c8] sm:$0xff]  ;;  %v268_v49 = vld [vmem:[%s2003_s27 + $0x3c0] sm:$0xff] }
  0x32   : > { %1817 = vmatmul.mubr.msk.bf16.gmra.mxu0 %vm349_vm0, %v289_v59  ;;  %1881 = vmatmul.mubr.msk.bf16.gmra.mxu1 %vm349_vm0, %v321_v60  ;;  %v186_v59 = vld [vmem:[%s2003_s27 + $0x130] sm:$0xff]  ;;  %v187_v60 = vld [vmem:[%s2003_s27 + $0x138] sm:$0xff]  ;;  %v269_v50 = vld [vmem:[%s2003_s27 + $0x3c8] sm:$0xff]  ;;  %v310_v53 = vpack.c.bf16 %v205_v48, %v204_v47 }
  0x33   : > { %1820 = vmatprep.mubr.msk.bf16.mxu0 %vm349_vm0, %v290_v61  ;;  %1884 = vmatprep.mubr.msk.bf16.mxu1 %vm349_vm0, %v322_v62  ;;  %v250_v61 = vld [vmem:[%s2003_s27 + $0x330] sm:$0xff]  ;;  %v251_v62 = vld [vmem:[%s2003_s27 + $0x338] sm:$0xff]  ;;  %v301_v3 = vpack.c.bf16 %v187_v60, %v186_v59  ;;  %v342_v54 = vpack.c.bf16 %v269_v50, %v268_v49  ;;  %v208_v59 = vld [vmem:[%s2003_s27 + $0x1e0] sm:$0xff] }
  0x34   : > { %v333_v4 = vpack.c.bf16 %v251_v62, %v250_v61  ;;  %v209_v60 = vld [vmem:[%s2003_s27 + $0x1e8] sm:$0xff]  ;;  %v272_v61 = vld [vmem:[%s2003_s27 + $0x3e0] sm:$0xff] }
  0x35   : > { %v273_v62 = vld [vmem:[%s2003_s27 + $0x3e8] sm:$0xff]  ;;  %v312_v1 = vpack.c.bf16 %v209_v60, %v208_v59 }
  0x36   : > { %v344_v2 = vpack.c.bf16 %v273_v62, %v272_v61 }
  0x3a   : > { %1821 = vmatmul.mubr.msk.bf16.gmra.mxu0 %vm349_vm0, %v291_v7  ;;  %1885 = vmatmul.mubr.msk.bf16.gmra.mxu1 %vm349_vm0, %v323_v8  ;;  %v190_v7 = vld [vmem:[%s2003_s27 + $0x150] sm:$0xff]  ;;  %v191_v8 = vld [vmem:[%s2003_s27 + $0x158] sm:$0xff] }
  0x3b   : > { %1824 = vmatprep.mubr.msk.bf16.mxu0 %vm349_vm0, %v292_v9  ;;  %1888 = vmatprep.mubr.msk.bf16.mxu1 %vm349_vm0, %v324_v10  ;;  %v254_v9 = vld [vmem:[%s2003_s27 + $0x350] sm:$0xff]  ;;  %v255_v10 = vld [vmem:[%s2003_s27 + $0x358] sm:$0xff]  ;;  %v303_v15 = vpack.c.bf16 %v191_v8, %v190_v7 }
  0x3c   : > { %v335_v16 = vpack.c.bf16 %v255_v10, %v254_v9 }
  0x42   : > { %1825 = vmatmul.mubr.msk.bf16.gmra.mxu0 %vm349_vm0, %v293_v19  ;;  %1889 = vmatmul.mubr.msk.bf16.gmra.mxu1 %vm349_vm0, %v325_v20  ;;  %v194_v19 = vld [vmem:[%s2003_s27 + $0x170] sm:$0xff]  ;;  %v195_v20 = vld [vmem:[%s2003_s27 + $0x178] sm:$0xff] }
  0x43   : > { %1828 = vmatprep.mubr.msk.bf16.mxu0 %vm349_vm0, %v294_v21  ;;  %1892 = vmatprep.mubr.msk.bf16.mxu1 %vm349_vm0, %v326_v22  ;;  %v258_v21 = vld [vmem:[%s2003_s27 + $0x370] sm:$0xff]  ;;  %v259_v22 = vld [vmem:[%s2003_s27 + $0x378] sm:$0xff]  ;;  %v305_v27 = vpack.c.bf16 %v195_v20, %v194_v19 }
  0x44   : > { %v337_v28 = vpack.c.bf16 %v259_v22, %v258_v21 }
  0x4a   : > { %1829 = vmatmul.mubr.msk.bf16.gmra.mxu0 %vm349_vm0, %v295_v31  ;;  %1893 = vmatmul.mubr.msk.bf16.gmra.mxu1 %vm349_vm0, %v327_v32  ;;  %v198_v31 = vld [vmem:[%s2003_s27 + $0x190] sm:$0xff]  ;;  %v199_v32 = vld [vmem:[%s2003_s27 + $0x198] sm:$0xff] }
  0x4b   : > { %1832 = vmatprep.mubr.msk.bf16.mxu0 %vm349_vm0, %v296_v33  ;;  %1896 = vmatprep.mubr.msk.bf16.mxu1 %vm349_vm0, %v328_v34  ;;  %v262_v33 = vld [vmem:[%s2003_s27 + $0x390] sm:$0xff]  ;;  %v263_v34 = vld [vmem:[%s2003_s27 + $0x398] sm:$0xff]  ;;  %v307_v39 = vpack.c.bf16 %v199_v32, %v198_v31 }
  0x4c   : > { %v339_v40 = vpack.c.bf16 %v263_v34, %v262_v33 }
  0x52   : > { %1833 = vmatmul.mubr.msk.bf16.gmra.mxu0 %vm349_vm0, %v297_v43  ;;  %1897 = vmatmul.mubr.msk.bf16.gmra.mxu1 %vm349_vm0, %v329_v44  ;;  %v202_v43 = vld [vmem:[%s2003_s27 + $0x1b0] sm:$0xff]  ;;  %v203_v44 = vld [vmem:[%s2003_s27 + $0x1b8] sm:$0xff] }
  0x53   : > { %1836 = vmatprep.mubr.msk.bf16.mxu0 %vm349_vm0, %v298_v45  ;;  %1900 = vmatprep.mubr.msk.bf16.mxu1 %vm349_vm0, %v330_v46  ;;  %v266_v45 = vld [vmem:[%s2003_s27 + $0x3b0] sm:$0xff]  ;;  %v267_v46 = vld [vmem:[%s2003_s27 + $0x3b8] sm:$0xff]  ;;  %v309_v51 = vpack.c.bf16 %v203_v44, %v202_v43 }
  0x54   : > { %v341_v52 = vpack.c.bf16 %v267_v46, %v266_v45 }
  0x5a   : > { %1837 = vmatmul.mubr.msk.bf16.gmra.mxu0 %vm349_vm0, %v299_v55  ;;  %1901 = vmatmul.mubr.msk.bf16.gmra.mxu1 %vm349_vm0, %v331_v56  ;;  %v206_v55 = vld [vmem:[%s2003_s27 + $0x1d0] sm:$0xff]  ;;  %v207_v56 = vld [vmem:[%s2003_s27 + $0x1d8] sm:$0xff] }
  0x5b   : > { %1840 = vmatprep.mubr.msk.bf16.mxu0 %vm349_vm0, %v300_v57  ;;  %1904 = vmatprep.mubr.msk.bf16.mxu1 %vm349_vm0, %v332_v58  ;;  %v270_v57 = vld [vmem:[%s2003_s27 + $0x3d0] sm:$0xff]  ;;  %v271_v58 = vld [vmem:[%s2003_s27 + $0x3d8] sm:$0xff]  ;;  %v311_v63 = vpack.c.bf16 %v207_v56, %v206_v55 }
  0x5c   : > { %v343_v0 = vpack.c.bf16 %v271_v58, %v270_v57 }
  0x62   : > { %1841 = vmatmul.mubr.msk.bf16.gmra.mxu0 %vm349_vm0, %v301_v3  ;;  %1905 = vmatmul.mubr.msk.bf16.gmra.mxu1 %vm349_vm0, %v333_v4  ;;  %v210_v3 = vld [vmem:[%s2003_s27 + $0x1f0] sm:$0xff]  ;;  %v211_v4 = vld [vmem:[%s2003_s27 + $0x1f8] sm:$0xff] }
  0x63   : > { %1844 = vmatprep.mubr.msk.bf16.mxu0 %vm349_vm0, %v302_v5  ;;  %1908 = vmatprep.mubr.msk.bf16.mxu1 %vm349_vm0, %v334_v6  ;;  %v274_v5 = vld [vmem:[%s2003_s27 + $0x3f0] sm:$0xff]  ;;  %v275_v6 = vld [vmem:[%s2003_s27 + $0x3f8] sm:$0xff]  ;;  %v313_v7 = vpack.c.bf16 %v211_v4, %v210_v3 }
  0x64   : > { %v345_v8 = vpack.c.bf16 %v275_v6, %v274_v5 }
  0x6a   : > { %1845 = vmatmul.mubr.msk.bf16.gmra.mxu0 %vm349_vm0, %v303_v15  ;;  %1909 = vmatmul.mubr.msk.bf16.gmra.mxu1 %vm349_vm0, %v335_v16 }
  0x6b   : > { %1848 = vmatprep.mubr.msk.bf16.mxu0 %vm349_vm0, %v304_v17  ;;  %1912 = vmatprep.mubr.msk.bf16.mxu1 %vm349_vm0, %v336_v18 }
  0x72   : > { %1849 = vmatmul.mubr.msk.bf16.gmra.mxu0 %vm349_vm0, %v305_v27  ;;  %1913 = vmatmul.mubr.msk.bf16.gmra.mxu1 %vm349_vm0, %v337_v28 }
  0x73   : > { %1852 = vmatprep.mubr.msk.bf16.mxu0 %vm349_vm0, %v306_v29  ;;  %1916 = vmatprep.mubr.msk.bf16.mxu1 %vm349_vm0, %v338_v30 }
  0x7a   : > { %1853 = vmatmul.mubr.msk.bf16.gmra.mxu0 %vm349_vm0, %v307_v39  ;;  %1917 = vmatmul.mubr.msk.bf16.gmra.mxu1 %vm349_vm0, %v339_v40 }
  0x7b   : > { %1856 = vmatprep.mubr.msk.bf16.mxu0 %vm349_vm0, %v308_v41  ;;  %1920 = vmatprep.mubr.msk.bf16.mxu1 %vm349_vm0, %v340_v42 }
  0x82   : > { %1857 = vmatmul.mubr.msk.bf16.gmra.mxu0 %vm349_vm0, %v309_v51  ;;  %1921 = vmatmul.mubr.msk.bf16.gmra.mxu1 %vm349_vm0, %v341_v52 }
  0x83   : > { %1860 = vmatprep.mubr.msk.bf16.mxu0 %vm349_vm0, %v310_v53  ;;  %1924 = vmatprep.mubr.msk.bf16.mxu1 %vm349_vm0, %v342_v54 }
  0x8a   : > { %1861 = vmatmul.mubr.msk.bf16.gmra.mxu0 %vm349_vm0, %v311_v63  ;;  %1925 = vmatmul.mubr.msk.bf16.gmra.mxu1 %vm349_vm0, %v343_v0 }
  0x8b   : > { %1864 = vmatprep.mubr.msk.bf16.mxu0 %vm349_vm0, %v312_v1  ;;  %1928 = vmatprep.mubr.msk.bf16.mxu1 %vm349_vm0, %v344_v2 }
  0x92   : > { %1865 = vmatmul.mubr.msk.bf16.gmra.mxu0 %vm349_vm0, %v313_v7  ;;  %1929 = vmatmul.mubr.msk.bf16.gmra.mxu1 %vm349_vm0, %v345_v8 }
  0xda   : > { %v1806_v9 = vpop.f32.mrf.mxu0  ;;  %v1870_v10 = vpop.f32.mrf.mxu1 }
  0xdb   : > { %vm1089_vm2 = vcmp.gt.f32.partialorder %v1806_v9, 0.0  ;;  %v1217_v11 = vmul.f32 0.2, %v1806_v9  ;;  %vm1153_vm3 = vcmp.gt.f32.partialorder %v1870_v10, 0.0  ;;  %v1281_v12 = vmul.f32 0.2, %v1870_v10 }
  0xdc   : > { %v576_v13 = vpop.f32.mrf.mxu0  ;;  %v832_v14 = vpop.f32.mrf.mxu1 }
  0xdd   : > { %v1345_v15 = vsel %vm1089_vm2, %v1806_v9, %v1217_v11  ;;  %v1409_v16 = vsel %vm1153_vm3, %v1870_v10, %v1281_v12  ;;  %vm1087_vm4 = vcmp.gt.f32.partialorder %v576_v13, 0.0  ;;  %v1215_v17 = vmul.f32 0.2, %v576_v13 }
  0xde   : > { %1474 = vst.msk [vmem:[%s2202_s30 + $0x10] sm:$0xff] %vm1471_vm1, %v1345_v15  ;;  %1538 = vst.msk [vmem:[%s2202_s30 + $0x210] sm:$0xff] %vm1471_vm1, %v1409_v16  ;;  %vm1151_vm5 = vcmp.gt.f32.partialorder %v832_v14, 0.0  ;;  %v1279_v18 = vmul.f32 0.2, %v832_v14  ;;  %v1807_v19 = vpop.f32.mrf.mxu0  ;;  %v1871_v20 = vpop.f32.mrf.mxu1 }
  0xdf   : > { %v1343_v21 = vsel %vm1087_vm4, %v576_v13, %v1215_v17  ;;  %vm1090_vm6 = vcmp.gt.f32.partialorder %v1807_v19, 0.0  ;;  %v1218_v22 = vmul.f32 0.2, %v1807_v19  ;;  %vm1154_vm7 = vcmp.gt.f32.partialorder %v1871_v20, 0.0 }
  0xe0   : > { %1472 = vst.msk [vmem:[%s2202_s30] sm:$0xff] %vm1471_vm1, %v1343_v21  ;;  %v1407_v23 = vsel %vm1151_vm5, %v832_v14, %v1279_v18  ;;  %v1282_v24 = vmul.f32 0.2, %v1871_v20  ;;  %v579_v25 = vpop.f32.mrf.mxu0  ;;  %v835_v26 = vpop.f32.mrf.mxu1 }
  0xe1   : > { %1536 = vst.msk [vmem:[%s2202_s30 + $0x200] sm:$0xff] %vm1471_vm1, %v1407_v23  ;;  %v1346_v27 = vsel %vm1090_vm6, %v1807_v19, %v1218_v22  ;;  %vm1088_vm8 = vcmp.gt.f32.partialorder %v579_v25, 0.0  ;;  %v1216_v28 = vmul.f32 0.2, %v579_v25  ;;  %vm1152_vm9 = vcmp.gt.f32.partialorder %v835_v26, 0.0 }
  0xe2   : > { %1475 = vst.msk [vmem:[%s2202_s30 + $0x18] sm:$0xff] %vm1471_vm1, %v1346_v27  ;;  %v1410_v29 = vsel %vm1154_vm7, %v1871_v20, %v1282_v24  ;;  %v1280_v30 = vmul.f32 0.2, %v835_v26  ;;  %v1810_v31 = vpop.f32.mrf.mxu0  ;;  %v1874_v32 = vpop.f32.mrf.mxu1 }
  0xe3   : > { %1539 = vst.msk [vmem:[%s2202_s30 + $0x218] sm:$0xff] %vm1471_vm1, %v1410_v29  ;;  %v1344_v33 = vsel %vm1088_vm8, %v579_v25, %v1216_v28  ;;  %vm1093_vm10 = vcmp.gt.f32.partialorder %v1810_v31, 0.0  ;;  %v1221_v34 = vmul.f32 0.2, %v1810_v31  ;;  %vm1157_vm11 = vcmp.gt.f32.partialorder %v1874_v32, 0.0 }
  0xe4   : > { %1473 = vst.msk [vmem:[%s2202_s30 + $0x8] sm:$0xff] %vm1471_vm1, %v1344_v33  ;;  %v1408_v35 = vsel %vm1152_vm9, %v835_v26, %v1280_v30  ;;  %v1285_v36 = vmul.f32 0.2, %v1874_v32  ;;  %v592_v37 = vpop.f32.mrf.mxu0  ;;  %v848_v38 = vpop.f32.mrf.mxu1 }
  0xe5   : > { %1537 = vst.msk [vmem:[%s2202_s30 + $0x208] sm:$0xff] %vm1471_vm1, %v1408_v35  ;;  %v1349_v39 = vsel %vm1093_vm10, %v1810_v31, %v1221_v34  ;;  %vm1091_vm12 = vcmp.gt.f32.partialorder %v592_v37, 0.0  ;;  %v1219_v40 = vmul.f32 0.2, %v592_v37  ;;  %vm1155_vm13 = vcmp.gt.f32.partialorder %v848_v38, 0.0 }
  0xe6   : > { %1478 = vst.msk [vmem:[%s2202_s30 + $0x30] sm:$0xff] %vm1471_vm1, %v1349_v39  ;;  %v1413_v41 = vsel %vm1157_vm11, %v1874_v32, %v1285_v36  ;;  %v1283_v42 = vmul.f32 0.2, %v848_v38  ;;  %v1811_v43 = vpop.f32.mrf.mxu0  ;;  %v1875_v44 = vpop.f32.mrf.mxu1 }
  0xe7   : > { %1542 = vst.msk [vmem:[%s2202_s30 + $0x230] sm:$0xff] %vm1471_vm1, %v1413_v41  ;;  %v1347_v45 = vsel %vm1091_vm12, %v592_v37, %v1219_v40  ;;  %vm1094_vm14 = vcmp.gt.f32.partialorder %v1811_v43, 0.0  ;;  %v1222_v46 = vmul.f32 0.2, %v1811_v43  ;;  %vm1158_vm15 = vcmp.gt.f32.partialorder %v1875_v44, 0.0 }
  0xe8   : > { %1476 = vst.msk [vmem:[%s2202_s30 + $0x20] sm:$0xff] %vm1471_vm1, %v1347_v45  ;;  %v1411_v47 = vsel %vm1155_vm13, %v848_v38, %v1283_v42  ;;  %v1286_v48 = vmul.f32 0.2, %v1875_v44  ;;  %v595_v49 = vpop.f32.mrf.mxu0  ;;  %v851_v50 = vpop.f32.mrf.mxu1 }
  0xe9   : > { %1540 = vst.msk [vmem:[%s2202_s30 + $0x220] sm:$0xff] %vm1471_vm1, %v1411_v47  ;;  %v1350_v51 = vsel %vm1094_vm14, %v1811_v43, %v1222_v46  ;;  %vm1092_vm0 = vcmp.gt.f32.partialorder %v595_v49, 0.0  ;;  %v1220_v52 = vmul.f32 0.2, %v595_v49  ;;  %vm1156_vm2 = vcmp.gt.f32.partialorder %v851_v50, 0.0 }
  0xea   : > { %1479 = vst.msk [vmem:[%s2202_s30 + $0x38] sm:$0xff] %vm1471_vm1, %v1350_v51  ;;  %v1414_v53 = vsel %vm1158_vm15, %v1875_v44, %v1286_v48  ;;  %v1284_v54 = vmul.f32 0.2, %v851_v50  ;;  %v1814_v55 = vpop.f32.mrf.mxu0  ;;  %v1878_v56 = vpop.f32.mrf.mxu1 }
  0xeb   : > { %1543 = vst.msk [vmem:[%s2202_s30 + $0x238] sm:$0xff] %vm1471_vm1, %v1414_v53  ;;  %v1348_v57 = vsel %vm1092_vm0, %v595_v49, %v1220_v52  ;;  %vm1097_vm3 = vcmp.gt.f32.partialorder %v1814_v55, 0.0  ;;  %v1225_v58 = vmul.f32 0.2, %v1814_v55  ;;  %vm1161_vm4 = vcmp.gt.f32.partialorder %v1878_v56, 0.0 }
  0xec   : > { %1477 = vst.msk [vmem:[%s2202_s30 + $0x28] sm:$0xff] %vm1471_vm1, %v1348_v57  ;;  %v1412_v59 = vsel %vm1156_vm2, %v851_v50, %v1284_v54  ;;  %v1289_v60 = vmul.f32 0.2, %v1878_v56  ;;  %v608_v61 = vpop.f32.mrf.mxu0  ;;  %v864_v62 = vpop.f32.mrf.mxu1 }
  0xed   : > { %1541 = vst.msk [vmem:[%s2202_s30 + $0x228] sm:$0xff] %vm1471_vm1, %v1412_v59  ;;  %v1353_v63 = vsel %vm1097_vm3, %v1814_v55, %v1225_v58  ;;  %vm1095_vm5 = vcmp.gt.f32.partialorder %v608_v61, 0.0  ;;  %v1223_v0 = vmul.f32 0.2, %v608_v61  ;;  %vm1159_vm6 = vcmp.gt.f32.partialorder %v864_v62, 0.0 }
  0xee   : > { %1482 = vst.msk [vmem:[%s2202_s30 + $0x50] sm:$0xff] %vm1471_vm1, %v1353_v63  ;;  %v1417_v1 = vsel %vm1161_vm4, %v1878_v56, %v1289_v60  ;;  %v1287_v2 = vmul.f32 0.2, %v864_v62  ;;  %v1815_v3 = vpop.f32.mrf.mxu0  ;;  %v1879_v4 = vpop.f32.mrf.mxu1 }
  0xef   : > { %1546 = vst.msk [vmem:[%s2202_s30 + $0x250] sm:$0xff] %vm1471_vm1, %v1417_v1  ;;  %v1351_v5 = vsel %vm1095_vm5, %v608_v61, %v1223_v0  ;;  %vm1098_vm7 = vcmp.gt.f32.partialorder %v1815_v3, 0.0  ;;  %v1226_v6 = vmul.f32 0.2, %v1815_v3  ;;  %vm1162_vm8 = vcmp.gt.f32.partialorder %v1879_v4, 0.0 }
  0xf0   : > { %1480 = vst.msk [vmem:[%s2202_s30 + $0x40] sm:$0xff] %vm1471_vm1, %v1351_v5  ;;  %v1415_v7 = vsel %vm1159_vm6, %v864_v62, %v1287_v2  ;;  %v1290_v8 = vmul.f32 0.2, %v1879_v4  ;;  %v611_v9 = vpop.f32.mrf.mxu0  ;;  %v867_v10 = vpop.f32.mrf.mxu1 }
  0xf1   : > { %1544 = vst.msk [vmem:[%s2202_s30 + $0x240] sm:$0xff] %vm1471_vm1, %v1415_v7  ;;  %v1354_v11 = vsel %vm1098_vm7, %v1815_v3, %v1226_v6  ;;  %vm1096_vm9 = vcmp.gt.f32.partialorder %v611_v9, 0.0  ;;  %v1224_v12 = vmul.f32 0.2, %v611_v9  ;;  %vm1160_vm10 = vcmp.gt.f32.partialorder %v867_v10, 0.0 }
  0xf2   : > { %1483 = vst.msk [vmem:[%s2202_s30 + $0x58] sm:$0xff] %vm1471_vm1, %v1354_v11  ;;  %v1418_v13 = vsel %vm1162_vm8, %v1879_v4, %v1290_v8  ;;  %v1288_v14 = vmul.f32 0.2, %v867_v10  ;;  %v1818_v15 = vpop.f32.mrf.mxu0  ;;  %v1882_v16 = vpop.f32.mrf.mxu1 }
  0xf3   : > { %1547 = vst.msk [vmem:[%s2202_s30 + $0x258] sm:$0xff] %vm1471_vm1, %v1418_v13  ;;  %v1352_v17 = vsel %vm1096_vm9, %v611_v9, %v1224_v12  ;;  %vm1101_vm11 = vcmp.gt.f32.partialorder %v1818_v15, 0.0  ;;  %v1229_v18 = vmul.f32 0.2, %v1818_v15  ;;  %vm1165_vm12 = vcmp.gt.f32.partialorder %v1882_v16, 0.0 }
  0xf4   : > { %1481 = vst.msk [vmem:[%s2202_s30 + $0x48] sm:$0xff] %vm1471_vm1, %v1352_v17  ;;  %v1416_v19 = vsel %vm1160_vm10, %v867_v10, %v1288_v14  ;;  %v1293_v20 = vmul.f32 0.2, %v1882_v16  ;;  %v624_v21 = vpop.f32.mrf.mxu0  ;;  %v880_v22 = vpop.f32.mrf.mxu1 }
  0xf5   : > { %1545 = vst.msk [vmem:[%s2202_s30 + $0x248] sm:$0xff] %vm1471_vm1, %v1416_v19  ;;  %v1357_v23 = vsel %vm1101_vm11, %v1818_v15, %v1229_v18  ;;  %vm1099_vm13 = vcmp.gt.f32.partialorder %v624_v21, 0.0  ;;  %v1227_v24 = vmul.f32 0.2, %v624_v21  ;;  %vm1163_vm14 = vcmp.gt.f32.partialorder %v880_v22, 0.0 }
  0xf6   : > { %1486 = vst.msk [vmem:[%s2202_s30 + $0x70] sm:$0xff] %vm1471_vm1, %v1357_v23  ;;  %v1421_v25 = vsel %vm1165_vm12, %v1882_v16, %v1293_v20  ;;  %v1291_v26 = vmul.f32 0.2, %v880_v22  ;;  %v1819_v27 = vpop.f32.mrf.mxu0  ;;  %v1883_v28 = vpop.f32.mrf.mxu1 }
  0xf7   : > { %1550 = vst.msk [vmem:[%s2202_s30 + $0x270] sm:$0xff] %vm1471_vm1, %v1421_v25  ;;  %v1355_v29 = vsel %vm1099_vm13, %v624_v21, %v1227_v24  ;;  %vm1102_vm15 = vcmp.gt.f32.partialorder %v1819_v27, 0.0  ;;  %v1230_v30 = vmul.f32 0.2, %v1819_v27  ;;  %vm1166_vm0 = vcmp.gt.f32.partialorder %v1883_v28, 0.0 }
  0xf8   : > { %1484 = vst.msk [vmem:[%s2202_s30 + $0x60] sm:$0xff] %vm1471_vm1, %v1355_v29  ;;  %v1419_v31 = vsel %vm1163_vm14, %v880_v22, %v1291_v26  ;;  %v1294_v32 = vmul.f32 0.2, %v1883_v28  ;;  %v627_v33 = vpop.f32.mrf.mxu0  ;;  %v883_v34 = vpop.f32.mrf.mxu1 }
  0xf9   : > { %1548 = vst.msk [vmem:[%s2202_s30 + $0x260] sm:$0xff] %vm1471_vm1, %v1419_v31  ;;  %v1358_v35 = vsel %vm1102_vm15, %v1819_v27, %v1230_v30  ;;  %vm1100_vm2 = vcmp.gt.f32.partialorder %v627_v33, 0.0  ;;  %v1228_v36 = vmul.f32 0.2, %v627_v33  ;;  %vm1164_vm3 = vcmp.gt.f32.partialorder %v883_v34, 0.0 }
  0xfa   : > { %1487 = vst.msk [vmem:[%s2202_s30 + $0x78] sm:$0xff] %vm1471_vm1, %v1358_v35  ;;  %v1422_v37 = vsel %vm1166_vm0, %v1883_v28, %v1294_v32  ;;  %v1292_v38 = vmul.f32 0.2, %v883_v34  ;;  %v1822_v39 = vpop.f32.mrf.mxu0  ;;  %v1886_v40 = vpop.f32.mrf.mxu1 }
  0xfb   : > { %1551 = vst.msk [vmem:[%s2202_s30 + $0x278] sm:$0xff] %vm1471_vm1, %v1422_v37  ;;  %v1356_v41 = vsel %vm1100_vm2, %v627_v33, %v1228_v36  ;;  %vm1105_vm4 = vcmp.gt.f32.partialorder %v1822_v39, 0.0  ;;  %v1233_v42 = vmul.f32 0.2, %v1822_v39  ;;  %vm1169_vm5 = vcmp.gt.f32.partialorder %v1886_v40, 0.0 }
  0xfc   : > { %1485 = vst.msk [vmem:[%s2202_s30 + $0x68] sm:$0xff] %vm1471_vm1, %v1356_v41  ;;  %v1420_v43 = vsel %vm1164_vm3, %v883_v34, %v1292_v38  ;;  %v1297_v44 = vmul.f32 0.2, %v1886_v40  ;;  %v640_v45 = vpop.f32.mrf.mxu0  ;;  %v896_v46 = vpop.f32.mrf.mxu1 }
  0xfd   : > { %1549 = vst.msk [vmem:[%s2202_s30 + $0x268] sm:$0xff] %vm1471_vm1, %v1420_v43  ;;  %v1361_v47 = vsel %vm1105_vm4, %v1822_v39, %v1233_v42  ;;  %vm1103_vm6 = vcmp.gt.f32.partialorder %v640_v45, 0.0  ;;  %v1231_v48 = vmul.f32 0.2, %v640_v45  ;;  %vm1167_vm7 = vcmp.gt.f32.partialorder %v896_v46, 0.0 }
  0xfe   : > { %1490 = vst.msk [vmem:[%s2202_s30 + $0x90] sm:$0xff] %vm1471_vm1, %v1361_v47  ;;  %v1425_v49 = vsel %vm1169_vm5, %v1886_v40, %v1297_v44  ;;  %v1295_v50 = vmul.f32 0.2, %v896_v46  ;;  %v1823_v51 = vpop.f32.mrf.mxu0  ;;  %v1887_v52 = vpop.f32.mrf.mxu1 }
  0xff   : > { %1554 = vst.msk [vmem:[%s2202_s30 + $0x290] sm:$0xff] %vm1471_vm1, %v1425_v49  ;;  %v1359_v53 = vsel %vm1103_vm6, %v640_v45, %v1231_v48  ;;  %vm1106_vm8 = vcmp.gt.f32.partialorder %v1823_v51, 0.0  ;;  %v1234_v54 = vmul.f32 0.2, %v1823_v51  ;;  %vm1170_vm9 = vcmp.gt.f32.partialorder %v1887_v52, 0.0 }
 0x100   : > { %1488 = vst.msk [vmem:[%s2202_s30 + $0x80] sm:$0xff] %vm1471_vm1, %v1359_v53  ;;  %v1423_v55 = vsel %vm1167_vm7, %v896_v46, %v1295_v50  ;;  %v1298_v56 = vmul.f32 0.2, %v1887_v52  ;;  %v643_v57 = vpop.f32.mrf.mxu0  ;;  %v899_v58 = vpop.f32.mrf.mxu1 }
 0x101   : > { %1552 = vst.msk [vmem:[%s2202_s30 + $0x280] sm:$0xff] %vm1471_vm1, %v1423_v55  ;;  %v1362_v59 = vsel %vm1106_vm8, %v1823_v51, %v1234_v54  ;;  %vm1104_vm10 = vcmp.gt.f32.partialorder %v643_v57, 0.0  ;;  %v1232_v60 = vmul.f32 0.2, %v643_v57  ;;  %vm1168_vm11 = vcmp.gt.f32.partialorder %v899_v58, 0.0 }
 0x102   : > { %1491 = vst.msk [vmem:[%s2202_s30 + $0x98] sm:$0xff] %vm1471_vm1, %v1362_v59  ;;  %v1426_v61 = vsel %vm1170_vm9, %v1887_v52, %v1298_v56  ;;  %v1296_v62 = vmul.f32 0.2, %v899_v58  ;;  %v1826_v63 = vpop.f32.mrf.mxu0  ;;  %v1890_v0 = vpop.f32.mrf.mxu1 }
 0x103   : > { %1555 = vst.msk [vmem:[%s2202_s30 + $0x298] sm:$0xff] %vm1471_vm1, %v1426_v61  ;;  %v1360_v1 = vsel %vm1104_vm10, %v643_v57, %v1232_v60  ;;  %vm1109_vm12 = vcmp.gt.f32.partialorder %v1826_v63, 0.0  ;;  %v1237_v2 = vmul.f32 0.2, %v1826_v63  ;;  %vm1173_vm13 = vcmp.gt.f32.partialorder %v1890_v0, 0.0 }
 0x104   : > { %1489 = vst.msk [vmem:[%s2202_s30 + $0x88] sm:$0xff] %vm1471_vm1, %v1360_v1  ;;  %v1424_v3 = vsel %vm1168_vm11, %v899_v58, %v1296_v62  ;;  %v1301_v4 = vmul.f32 0.2, %v1890_v0  ;;  %v656_v5 = vpop.f32.mrf.mxu0  ;;  %v912_v6 = vpop.f32.mrf.mxu1 }
 0x105   : > { %1553 = vst.msk [vmem:[%s2202_s30 + $0x288] sm:$0xff] %vm1471_vm1, %v1424_v3  ;;  %v1365_v7 = vsel %vm1109_vm12, %v1826_v63, %v1237_v2  ;;  %vm1107_vm14 = vcmp.gt.f32.partialorder %v656_v5, 0.0  ;;  %v1235_v8 = vmul.f32 0.2, %v656_v5  ;;  %vm1171_vm15 = vcmp.gt.f32.partialorder %v912_v6, 0.0 }
 0x106   : > { %1494 = vst.msk [vmem:[%s2202_s30 + $0xb0] sm:$0xff] %vm1471_vm1, %v1365_v7  ;;  %v1429_v9 = vsel %vm1173_vm13, %v1890_v0, %v1301_v4  ;;  %v1299_v10 = vmul.f32 0.2, %v912_v6  ;;  %v1827_v11 = vpop.f32.mrf.mxu0  ;;  %v1891_v12 = vpop.f32.mrf.mxu1 }
 0x107   : > { %1558 = vst.msk [vmem:[%s2202_s30 + $0x2b0] sm:$0xff] %vm1471_vm1, %v1429_v9  ;;  %v1363_v13 = vsel %vm1107_vm14, %v656_v5, %v1235_v8  ;;  %vm1110_vm0 = vcmp.gt.f32.partialorder %v1827_v11, 0.0  ;;  %v1238_v14 = vmul.f32 0.2, %v1827_v11  ;;  %vm1174_vm2 = vcmp.gt.f32.partialorder %v1891_v12, 0.0 }
 0x108   : > { %1492 = vst.msk [vmem:[%s2202_s30 + $0xa0] sm:$0xff] %vm1471_vm1, %v1363_v13  ;;  %v1427_v15 = vsel %vm1171_vm15, %v912_v6, %v1299_v10  ;;  %v1302_v16 = vmul.f32 0.2, %v1891_v12  ;;  %v659_v17 = vpop.f32.mrf.mxu0  ;;  %v915_v18 = vpop.f32.mrf.mxu1 }
 0x109   : > { %1556 = vst.msk [vmem:[%s2202_s30 + $0x2a0] sm:$0xff] %vm1471_vm1, %v1427_v15  ;;  %v1366_v19 = vsel %vm1110_vm0, %v1827_v11, %v1238_v14  ;;  %vm1108_vm3 = vcmp.gt.f32.partialorder %v659_v17, 0.0  ;;  %v1236_v20 = vmul.f32 0.2, %v659_v17  ;;  %vm1172_vm4 = vcmp.gt.f32.partialorder %v915_v18, 0.0 }
 0x10a   : > { %1495 = vst.msk [vmem:[%s2202_s30 + $0xb8] sm:$0xff] %vm1471_vm1, %v1366_v19  ;;  %v1430_v21 = vsel %vm1174_vm2, %v1891_v12, %v1302_v16  ;;  %v1300_v22 = vmul.f32 0.2, %v915_v18  ;;  %v1830_v23 = vpop.f32.mrf.mxu0  ;;  %v1894_v24 = vpop.f32.mrf.mxu1 }
 0x10b   : > { %1559 = vst.msk [vmem:[%s2202_s30 + $0x2b8] sm:$0xff] %vm1471_vm1, %v1430_v21  ;;  %v1364_v25 = vsel %vm1108_vm3, %v659_v17, %v1236_v20  ;;  %vm1113_vm5 = vcmp.gt.f32.partialorder %v1830_v23, 0.0  ;;  %v1241_v26 = vmul.f32 0.2, %v1830_v23  ;;  %vm1177_vm6 = vcmp.gt.f32.partialorder %v1894_v24, 0.0 }
 0x10c   : > { %1493 = vst.msk [vmem:[%s2202_s30 + $0xa8] sm:$0xff] %vm1471_vm1, %v1364_v25  ;;  %v1428_v27 = vsel %vm1172_vm4, %v915_v18, %v1300_v22  ;;  %v1305_v28 = vmul.f32 0.2, %v1894_v24  ;;  %v672_v29 = vpop.f32.mrf.mxu0  ;;  %v928_v30 = vpop.f32.mrf.mxu1 }
 0x10d   : > { %1557 = vst.msk [vmem:[%s2202_s30 + $0x2a8] sm:$0xff] %vm1471_vm1, %v1428_v27  ;;  %v1369_v31 = vsel %vm1113_vm5, %v1830_v23, %v1241_v26  ;;  %vm1111_vm7 = vcmp.gt.f32.partialorder %v672_v29, 0.0  ;;  %v1239_v32 = vmul.f32 0.2, %v672_v29  ;;  %vm1175_vm8 = vcmp.gt.f32.partialorder %v928_v30, 0.0 }
 0x10e   : > { %1498 = vst.msk [vmem:[%s2202_s30 + $0xd0] sm:$0xff] %vm1471_vm1, %v1369_v31  ;;  %v1433_v33 = vsel %vm1177_vm6, %v1894_v24, %v1305_v28  ;;  %v1303_v34 = vmul.f32 0.2, %v928_v30  ;;  %v1831_v35 = vpop.f32.mrf.mxu0  ;;  %v1895_v36 = vpop.f32.mrf.mxu1 }
 0x10f   : > { %1562 = vst.msk [vmem:[%s2202_s30 + $0x2d0] sm:$0xff] %vm1471_vm1, %v1433_v33  ;;  %v1367_v37 = vsel %vm1111_vm7, %v672_v29, %v1239_v32  ;;  %vm1114_vm9 = vcmp.gt.f32.partialorder %v1831_v35, 0.0  ;;  %v1242_v38 = vmul.f32 0.2, %v1831_v35  ;;  %vm1178_vm10 = vcmp.gt.f32.partialorder %v1895_v36, 0.0 }
 0x110   : > { %1496 = vst.msk [vmem:[%s2202_s30 + $0xc0] sm:$0xff] %vm1471_vm1, %v1367_v37  ;;  %v1431_v39 = vsel %vm1175_vm8, %v928_v30, %v1303_v34  ;;  %v1306_v40 = vmul.f32 0.2, %v1895_v36  ;;  %v675_v41 = vpop.f32.mrf.mxu0  ;;  %v931_v42 = vpop.f32.mrf.mxu1 }
 0x111   : > { %1560 = vst.msk [vmem:[%s2202_s30 + $0x2c0] sm:$0xff] %vm1471_vm1, %v1431_v39  ;;  %v1370_v43 = vsel %vm1114_vm9, %v1831_v35, %v1242_v38  ;;  %vm1112_vm11 = vcmp.gt.f32.partialorder %v675_v41, 0.0  ;;  %v1240_v44 = vmul.f32 0.2, %v675_v41  ;;  %vm1176_vm12 = vcmp.gt.f32.partialorder %v931_v42, 0.0 }
 0x112   : > { %1499 = vst.msk [vmem:[%s2202_s30 + $0xd8] sm:$0xff] %vm1471_vm1, %v1370_v43  ;;  %v1434_v45 = vsel %vm1178_vm10, %v1895_v36, %v1306_v40  ;;  %v1304_v46 = vmul.f32 0.2, %v931_v42  ;;  %v1834_v47 = vpop.f32.mrf.mxu0  ;;  %v1898_v48 = vpop.f32.mrf.mxu1 }
 0x113   : > { %1563 = vst.msk [vmem:[%s2202_s30 + $0x2d8] sm:$0xff] %vm1471_vm1, %v1434_v45  ;;  %v1368_v49 = vsel %vm1112_vm11, %v675_v41, %v1240_v44  ;;  %vm1117_vm13 = vcmp.gt.f32.partialorder %v1834_v47, 0.0  ;;  %v1245_v50 = vmul.f32 0.2, %v1834_v47  ;;  %vm1181_vm14 = vcmp.gt.f32.partialorder %v1898_v48, 0.0 }
 0x114   : > { %1497 = vst.msk [vmem:[%s2202_s30 + $0xc8] sm:$0xff] %vm1471_vm1, %v1368_v49  ;;  %v1432_v51 = vsel %vm1176_vm12, %v931_v42, %v1304_v46  ;;  %v1309_v52 = vmul.f32 0.2, %v1898_v48  ;;  %v688_v53 = vpop.f32.mrf.mxu0  ;;  %v944_v54 = vpop.f32.mrf.mxu1 }
 0x115   : > { %1561 = vst.msk [vmem:[%s2202_s30 + $0x2c8] sm:$0xff] %vm1471_vm1, %v1432_v51  ;;  %v1373_v55 = vsel %vm1117_vm13, %v1834_v47, %v1245_v50  ;;  %vm1115_vm15 = vcmp.gt.f32.partialorder %v688_v53, 0.0  ;;  %v1243_v56 = vmul.f32 0.2, %v688_v53  ;;  %vm1179_vm0 = vcmp.gt.f32.partialorder %v944_v54, 0.0 }
 0x116   : > { %1502 = vst.msk [vmem:[%s2202_s30 + $0xf0] sm:$0xff] %vm1471_vm1, %v1373_v55  ;;  %v1437_v57 = vsel %vm1181_vm14, %v1898_v48, %v1309_v52  ;;  %v1307_v58 = vmul.f32 0.2, %v944_v54  ;;  %v1835_v59 = vpop.f32.mrf.mxu0  ;;  %v1899_v60 = vpop.f32.mrf.mxu1 }
 0x117   : > { %1566 = vst.msk [vmem:[%s2202_s30 + $0x2f0] sm:$0xff] %vm1471_vm1, %v1437_v57  ;;  %v1371_v61 = vsel %vm1115_vm15, %v688_v53, %v1243_v56  ;;  %vm1118_vm2 = vcmp.gt.f32.partialorder %v1835_v59, 0.0  ;;  %v1246_v62 = vmul.f32 0.2, %v1835_v59  ;;  %vm1182_vm3 = vcmp.gt.f32.partialorder %v1899_v60, 0.0 }
 0x118   : > { %1500 = vst.msk [vmem:[%s2202_s30 + $0xe0] sm:$0xff] %vm1471_vm1, %v1371_v61  ;;  %v1435_v63 = vsel %vm1179_vm0, %v944_v54, %v1307_v58  ;;  %v1310_v0 = vmul.f32 0.2, %v1899_v60  ;;  %v691_v1 = vpop.f32.mrf.mxu0  ;;  %v947_v2 = vpop.f32.mrf.mxu1 }
 0x119   : > { %1564 = vst.msk [vmem:[%s2202_s30 + $0x2e0] sm:$0xff] %vm1471_vm1, %v1435_v63  ;;  %v1374_v3 = vsel %vm1118_vm2, %v1835_v59, %v1246_v62  ;;  %vm1116_vm4 = vcmp.gt.f32.partialorder %v691_v1, 0.0  ;;  %v1244_v4 = vmul.f32 0.2, %v691_v1  ;;  %vm1180_vm5 = vcmp.gt.f32.partialorder %v947_v2, 0.0 }
 0x11a   : > { %1503 = vst.msk [vmem:[%s2202_s30 + $0xf8] sm:$0xff] %vm1471_vm1, %v1374_v3  ;;  %v1438_v5 = vsel %vm1182_vm3, %v1899_v60, %v1310_v0  ;;  %v1308_v6 = vmul.f32 0.2, %v947_v2  ;;  %v1838_v7 = vpop.f32.mrf.mxu0  ;;  %v1902_v8 = vpop.f32.mrf.mxu1 }
 0x11b   : > { %1567 = vst.msk [vmem:[%s2202_s30 + $0x2f8] sm:$0xff] %vm1471_vm1, %v1438_v5  ;;  %v1372_v9 = vsel %vm1116_vm4, %v691_v1, %v1244_v4  ;;  %vm1121_vm6 = vcmp.gt.f32.partialorder %v1838_v7, 0.0  ;;  %v1249_v10 = vmul.f32 0.2, %v1838_v7  ;;  %vm1185_vm7 = vcmp.gt.f32.partialorder %v1902_v8, 0.0 }
 0x11c   : > { %1501 = vst.msk [vmem:[%s2202_s30 + $0xe8] sm:$0xff] %vm1471_vm1, %v1372_v9  ;;  %v1436_v11 = vsel %vm1180_vm5, %v947_v2, %v1308_v6  ;;  %v1313_v12 = vmul.f32 0.2, %v1902_v8  ;;  %v704_v13 = vpop.f32.mrf.mxu0  ;;  %v960_v14 = vpop.f32.mrf.mxu1 }
 0x11d   : > { %1565 = vst.msk [vmem:[%s2202_s30 + $0x2e8] sm:$0xff] %vm1471_vm1, %v1436_v11  ;;  %v1377_v15 = vsel %vm1121_vm6, %v1838_v7, %v1249_v10  ;;  %vm1119_vm8 = vcmp.gt.f32.partialorder %v704_v13, 0.0  ;;  %v1247_v16 = vmul.f32 0.2, %v704_v13  ;;  %vm1183_vm9 = vcmp.gt.f32.partialorder %v960_v14, 0.0 }
 0x11e   : > { %1506 = vst.msk [vmem:[%s2202_s30 + $0x110] sm:$0xff] %vm1471_vm1, %v1377_v15  ;;  %v1441_v17 = vsel %vm1185_vm7, %v1902_v8, %v1313_v12  ;;  %v1311_v18 = vmul.f32 0.2, %v960_v14  ;;  %v1839_v19 = vpop.f32.mrf.mxu0  ;;  %v1903_v20 = vpop.f32.mrf.mxu1 }
 0x11f   : > { %1570 = vst.msk [vmem:[%s2202_s30 + $0x310] sm:$0xff] %vm1471_vm1, %v1441_v17  ;;  %v1375_v21 = vsel %vm1119_vm8, %v704_v13, %v1247_v16  ;;  %vm1122_vm10 = vcmp.gt.f32.partialorder %v1839_v19, 0.0  ;;  %v1250_v22 = vmul.f32 0.2, %v1839_v19  ;;  %vm1186_vm11 = vcmp.gt.f32.partialorder %v1903_v20, 0.0 }
 0x120   : > { %1504 = vst.msk [vmem:[%s2202_s30 + $0x100] sm:$0xff] %vm1471_vm1, %v1375_v21  ;;  %v1439_v23 = vsel %vm1183_vm9, %v960_v14, %v1311_v18  ;;  %v1314_v24 = vmul.f32 0.2, %v1903_v20  ;;  %v707_v25 = vpop.f32.mrf.mxu0  ;;  %v963_v26 = vpop.f32.mrf.mxu1 }
 0x121   : > { %1568 = vst.msk [vmem:[%s2202_s30 + $0x300] sm:$0xff] %vm1471_vm1, %v1439_v23  ;;  %v1378_v27 = vsel %vm1122_vm10, %v1839_v19, %v1250_v22  ;;  %vm1120_vm12 = vcmp.gt.f32.partialorder %v707_v25, 0.0  ;;  %v1248_v28 = vmul.f32 0.2, %v707_v25  ;;  %vm1184_vm13 = vcmp.gt.f32.partialorder %v963_v26, 0.0 }
 0x122   : > { %1507 = vst.msk [vmem:[%s2202_s30 + $0x118] sm:$0xff] %vm1471_vm1, %v1378_v27  ;;  %v1442_v29 = vsel %vm1186_vm11, %v1903_v20, %v1314_v24  ;;  %v1312_v30 = vmul.f32 0.2, %v963_v26  ;;  %v1842_v31 = vpop.f32.mrf.mxu0  ;;  %v1906_v32 = vpop.f32.mrf.mxu1 }
 0x123   : > { %1571 = vst.msk [vmem:[%s2202_s30 + $0x318] sm:$0xff] %vm1471_vm1, %v1442_v29  ;;  %v1376_v33 = vsel %vm1120_vm12, %v707_v25, %v1248_v28  ;;  %vm1125_vm14 = vcmp.gt.f32.partialorder %v1842_v31, 0.0  ;;  %v1253_v34 = vmul.f32 0.2, %v1842_v31  ;;  %vm1189_vm15 = vcmp.gt.f32.partialorder %v1906_v32, 0.0 }
 0x124   : > { %1505 = vst.msk [vmem:[%s2202_s30 + $0x108] sm:$0xff] %vm1471_vm1, %v1376_v33  ;;  %v1440_v35 = vsel %vm1184_vm13, %v963_v26, %v1312_v30  ;;  %v1317_v36 = vmul.f32 0.2, %v1906_v32  ;;  %v720_v37 = vpop.f32.mrf.mxu0  ;;  %v976_v38 = vpop.f32.mrf.mxu1 }
 0x125   : > { %1569 = vst.msk [vmem:[%s2202_s30 + $0x308] sm:$0xff] %vm1471_vm1, %v1440_v35  ;;  %v1381_v39 = vsel %vm1125_vm14, %v1842_v31, %v1253_v34  ;;  %vm1123_vm0 = vcmp.gt.f32.partialorder %v720_v37, 0.0  ;;  %v1251_v40 = vmul.f32 0.2, %v720_v37  ;;  %vm1187_vm2 = vcmp.gt.f32.partialorder %v976_v38, 0.0 }
 0x126   : > { %1510 = vst.msk [vmem:[%s2202_s30 + $0x130] sm:$0xff] %vm1471_vm1, %v1381_v39  ;;  %v1445_v41 = vsel %vm1189_vm15, %v1906_v32, %v1317_v36  ;;  %v1315_v42 = vmul.f32 0.2, %v976_v38  ;;  %v1843_v43 = vpop.f32.mrf.mxu0  ;;  %v1907_v44 = vpop.f32.mrf.mxu1 }
 0x127   : > { %1574 = vst.msk [vmem:[%s2202_s30 + $0x330] sm:$0xff] %vm1471_vm1, %v1445_v41  ;;  %v1379_v45 = vsel %vm1123_vm0, %v720_v37, %v1251_v40  ;;  %vm1126_vm3 = vcmp.gt.f32.partialorder %v1843_v43, 0.0  ;;  %v1254_v46 = vmul.f32 0.2, %v1843_v43  ;;  %vm1190_vm4 = vcmp.gt.f32.partialorder %v1907_v44, 0.0 }
 0x128   : > { %1508 = vst.msk [vmem:[%s2202_s30 + $0x120] sm:$0xff] %vm1471_vm1, %v1379_v45  ;;  %v1443_v47 = vsel %vm1187_vm2, %v976_v38, %v1315_v42  ;;  %v1318_v48 = vmul.f32 0.2, %v1907_v44  ;;  %v723_v49 = vpop.f32.mrf.mxu0  ;;  %v979_v50 = vpop.f32.mrf.mxu1 }
 0x129   : > { %1572 = vst.msk [vmem:[%s2202_s30 + $0x320] sm:$0xff] %vm1471_vm1, %v1443_v47  ;;  %v1382_v51 = vsel %vm1126_vm3, %v1843_v43, %v1254_v46  ;;  %vm1124_vm5 = vcmp.gt.f32.partialorder %v723_v49, 0.0  ;;  %v1252_v52 = vmul.f32 0.2, %v723_v49  ;;  %vm1188_vm6 = vcmp.gt.f32.partialorder %v979_v50, 0.0 }
 0x12a   : > { %1511 = vst.msk [vmem:[%s2202_s30 + $0x138] sm:$0xff] %vm1471_vm1, %v1382_v51  ;;  %v1446_v53 = vsel %vm1190_vm4, %v1907_v44, %v1318_v48  ;;  %v1316_v54 = vmul.f32 0.2, %v979_v50  ;;  %v1846_v55 = vpop.f32.mrf.mxu0  ;;  %v1910_v56 = vpop.f32.mrf.mxu1 }
 0x12b   : > { %1575 = vst.msk [vmem:[%s2202_s30 + $0x338] sm:$0xff] %vm1471_vm1, %v1446_v53  ;;  %v1380_v57 = vsel %vm1124_vm5, %v723_v49, %v1252_v52  ;;  %vm1129_vm7 = vcmp.gt.f32.partialorder %v1846_v55, 0.0  ;;  %v1257_v58 = vmul.f32 0.2, %v1846_v55  ;;  %vm1193_vm8 = vcmp.gt.f32.partialorder %v1910_v56, 0.0 }
 0x12c   : > { %1509 = vst.msk [vmem:[%s2202_s30 + $0x128] sm:$0xff] %vm1471_vm1, %v1380_v57  ;;  %v1444_v59 = vsel %vm1188_vm6, %v979_v50, %v1316_v54  ;;  %v1321_v60 = vmul.f32 0.2, %v1910_v56  ;;  %v736_v61 = vpop.f32.mrf.mxu0  ;;  %v992_v62 = vpop.f32.mrf.mxu1 }
 0x12d   : > { %1573 = vst.msk [vmem:[%s2202_s30 + $0x328] sm:$0xff] %vm1471_vm1, %v1444_v59  ;;  %v1385_v63 = vsel %vm1129_vm7, %v1846_v55, %v1257_v58  ;;  %vm1127_vm9 = vcmp.gt.f32.partialorder %v736_v61, 0.0  ;;  %v1255_v0 = vmul.f32 0.2, %v736_v61  ;;  %vm1191_vm10 = vcmp.gt.f32.partialorder %v992_v62, 0.0 }
 0x12e   : > { %1514 = vst.msk [vmem:[%s2202_s30 + $0x150] sm:$0xff] %vm1471_vm1, %v1385_v63  ;;  %v1449_v1 = vsel %vm1193_vm8, %v1910_v56, %v1321_v60  ;;  %v1319_v2 = vmul.f32 0.2, %v992_v62  ;;  %v1847_v3 = vpop.f32.mrf.mxu0  ;;  %v1911_v4 = vpop.f32.mrf.mxu1 }
 0x12f   : > { %1578 = vst.msk [vmem:[%s2202_s30 + $0x350] sm:$0xff] %vm1471_vm1, %v1449_v1  ;;  %v1383_v5 = vsel %vm1127_vm9, %v736_v61, %v1255_v0  ;;  %vm1130_vm11 = vcmp.gt.f32.partialorder %v1847_v3, 0.0  ;;  %v1258_v6 = vmul.f32 0.2, %v1847_v3  ;;  %vm1194_vm12 = vcmp.gt.f32.partialorder %v1911_v4, 0.0 }
 0x130   : > { %1512 = vst.msk [vmem:[%s2202_s30 + $0x140] sm:$0xff] %vm1471_vm1, %v1383_v5  ;;  %v1447_v7 = vsel %vm1191_vm10, %v992_v62, %v1319_v2  ;;  %v1322_v8 = vmul.f32 0.2, %v1911_v4  ;;  %v739_v9 = vpop.f32.mrf.mxu0  ;;  %v995_v10 = vpop.f32.mrf.mxu1 }
 0x131   : > { %1576 = vst.msk [vmem:[%s2202_s30 + $0x340] sm:$0xff] %vm1471_vm1, %v1447_v7  ;;  %v1386_v11 = vsel %vm1130_vm11, %v1847_v3, %v1258_v6  ;;  %vm1128_vm13 = vcmp.gt.f32.partialorder %v739_v9, 0.0  ;;  %v1256_v12 = vmul.f32 0.2, %v739_v9  ;;  %vm1192_vm14 = vcmp.gt.f32.partialorder %v995_v10, 0.0 }
 0x132   : > { %1515 = vst.msk [vmem:[%s2202_s30 + $0x158] sm:$0xff] %vm1471_vm1, %v1386_v11  ;;  %v1450_v13 = vsel %vm1194_vm12, %v1911_v4, %v1322_v8  ;;  %v1320_v14 = vmul.f32 0.2, %v995_v10  ;;  %v1850_v15 = vpop.f32.mrf.mxu0  ;;  %v1914_v16 = vpop.f32.mrf.mxu1 }
 0x133   : > { %1579 = vst.msk [vmem:[%s2202_s30 + $0x358] sm:$0xff] %vm1471_vm1, %v1450_v13  ;;  %v1384_v17 = vsel %vm1128_vm13, %v739_v9, %v1256_v12  ;;  %vm1133_vm15 = vcmp.gt.f32.partialorder %v1850_v15, 0.0  ;;  %v1261_v18 = vmul.f32 0.2, %v1850_v15  ;;  %vm1197_vm0 = vcmp.gt.f32.partialorder %v1914_v16, 0.0 }
 0x134   : > { %1513 = vst.msk [vmem:[%s2202_s30 + $0x148] sm:$0xff] %vm1471_vm1, %v1384_v17  ;;  %v1448_v19 = vsel %vm1192_vm14, %v995_v10, %v1320_v14  ;;  %v1325_v20 = vmul.f32 0.2, %v1914_v16  ;;  %v752_v21 = vpop.f32.mrf.mxu0  ;;  %v1008_v22 = vpop.f32.mrf.mxu1 }
 0x135   : > { %1577 = vst.msk [vmem:[%s2202_s30 + $0x348] sm:$0xff] %vm1471_vm1, %v1448_v19  ;;  %v1389_v23 = vsel %vm1133_vm15, %v1850_v15, %v1261_v18  ;;  %vm1131_vm2 = vcmp.gt.f32.partialorder %v752_v21, 0.0  ;;  %v1259_v24 = vmul.f32 0.2, %v752_v21  ;;  %vm1195_vm3 = vcmp.gt.f32.partialorder %v1008_v22, 0.0 }
 0x136   : > { %1518 = vst.msk [vmem:[%s2202_s30 + $0x170] sm:$0xff] %vm1471_vm1, %v1389_v23  ;;  %v1453_v25 = vsel %vm1197_vm0, %v1914_v16, %v1325_v20  ;;  %v1323_v26 = vmul.f32 0.2, %v1008_v22  ;;  %v1851_v27 = vpop.f32.mrf.mxu0  ;;  %v1915_v28 = vpop.f32.mrf.mxu1 }
 0x137   : > { %1582 = vst.msk [vmem:[%s2202_s30 + $0x370] sm:$0xff] %vm1471_vm1, %v1453_v25  ;;  %v1387_v29 = vsel %vm1131_vm2, %v752_v21, %v1259_v24  ;;  %vm1134_vm4 = vcmp.gt.f32.partialorder %v1851_v27, 0.0  ;;  %v1262_v30 = vmul.f32 0.2, %v1851_v27  ;;  %vm1198_vm5 = vcmp.gt.f32.partialorder %v1915_v28, 0.0 }
 0x138   : > { %1516 = vst.msk [vmem:[%s2202_s30 + $0x160] sm:$0xff] %vm1471_vm1, %v1387_v29  ;;  %v1451_v31 = vsel %vm1195_vm3, %v1008_v22, %v1323_v26  ;;  %v1326_v32 = vmul.f32 0.2, %v1915_v28  ;;  %v755_v33 = vpop.f32.mrf.mxu0  ;;  %v1011_v34 = vpop.f32.mrf.mxu1 }
 0x139   : > { %1580 = vst.msk [vmem:[%s2202_s30 + $0x360] sm:$0xff] %vm1471_vm1, %v1451_v31  ;;  %v1390_v35 = vsel %vm1134_vm4, %v1851_v27, %v1262_v30  ;;  %vm1132_vm6 = vcmp.gt.f32.partialorder %v755_v33, 0.0  ;;  %v1260_v36 = vmul.f32 0.2, %v755_v33  ;;  %vm1196_vm7 = vcmp.gt.f32.partialorder %v1011_v34, 0.0 }
 0x13a   : > { %1519 = vst.msk [vmem:[%s2202_s30 + $0x178] sm:$0xff] %vm1471_vm1, %v1390_v35  ;;  %v1454_v37 = vsel %vm1198_vm5, %v1915_v28, %v1326_v32  ;;  %v1324_v38 = vmul.f32 0.2, %v1011_v34  ;;  %v1854_v39 = vpop.f32.mrf.mxu0  ;;  %v1918_v40 = vpop.f32.mrf.mxu1 }
 0x13b   : > { %1583 = vst.msk [vmem:[%s2202_s30 + $0x378] sm:$0xff] %vm1471_vm1, %v1454_v37  ;;  %v1388_v41 = vsel %vm1132_vm6, %v755_v33, %v1260_v36  ;;  %vm1137_vm8 = vcmp.gt.f32.partialorder %v1854_v39, 0.0  ;;  %v1265_v42 = vmul.f32 0.2, %v1854_v39  ;;  %vm1201_vm9 = vcmp.gt.f32.partialorder %v1918_v40, 0.0 }
 0x13c   : > { %1517 = vst.msk [vmem:[%s2202_s30 + $0x168] sm:$0xff] %vm1471_vm1, %v1388_v41  ;;  %v1452_v43 = vsel %vm1196_vm7, %v1011_v34, %v1324_v38  ;;  %v1329_v44 = vmul.f32 0.2, %v1918_v40  ;;  %v768_v45 = vpop.f32.mrf.mxu0  ;;  %v1024_v46 = vpop.f32.mrf.mxu1 }
 0x13d   : > { %1581 = vst.msk [vmem:[%s2202_s30 + $0x368] sm:$0xff] %vm1471_vm1, %v1452_v43  ;;  %v1393_v47 = vsel %vm1137_vm8, %v1854_v39, %v1265_v42  ;;  %vm1135_vm10 = vcmp.gt.f32.partialorder %v768_v45, 0.0  ;;  %v1263_v48 = vmul.f32 0.2, %v768_v45  ;;  %vm1199_vm11 = vcmp.gt.f32.partialorder %v1024_v46, 0.0 }
 0x13e   : > { %1522 = vst.msk [vmem:[%s2202_s30 + $0x190] sm:$0xff] %vm1471_vm1, %v1393_v47  ;;  %v1457_v49 = vsel %vm1201_vm9, %v1918_v40, %v1329_v44  ;;  %v1327_v50 = vmul.f32 0.2, %v1024_v46  ;;  %v1855_v51 = vpop.f32.mrf.mxu0  ;;  %v1919_v52 = vpop.f32.mrf.mxu1 }
 0x13f   : > { %1586 = vst.msk [vmem:[%s2202_s30 + $0x390] sm:$0xff] %vm1471_vm1, %v1457_v49  ;;  %v1391_v53 = vsel %vm1135_vm10, %v768_v45, %v1263_v48  ;;  %vm1138_vm12 = vcmp.gt.f32.partialorder %v1855_v51, 0.0  ;;  %v1266_v54 = vmul.f32 0.2, %v1855_v51  ;;  %vm1202_vm13 = vcmp.gt.f32.partialorder %v1919_v52, 0.0 }
 0x140   : > { %1520 = vst.msk [vmem:[%s2202_s30 + $0x180] sm:$0xff] %vm1471_vm1, %v1391_v53  ;;  %v1455_v55 = vsel %vm1199_vm11, %v1024_v46, %v1327_v50  ;;  %v1330_v56 = vmul.f32 0.2, %v1919_v52  ;;  %v771_v57 = vpop.f32.mrf.mxu0  ;;  %v1027_v58 = vpop.f32.mrf.mxu1 }
 0x141   : > { %1584 = vst.msk [vmem:[%s2202_s30 + $0x380] sm:$0xff] %vm1471_vm1, %v1455_v55  ;;  %v1394_v59 = vsel %vm1138_vm12, %v1855_v51, %v1266_v54  ;;  %vm1136_vm14 = vcmp.gt.f32.partialorder %v771_v57, 0.0  ;;  %v1264_v60 = vmul.f32 0.2, %v771_v57  ;;  %vm1200_vm15 = vcmp.gt.f32.partialorder %v1027_v58, 0.0 }
 0x142   : > { %1523 = vst.msk [vmem:[%s2202_s30 + $0x198] sm:$0xff] %vm1471_vm1, %v1394_v59  ;;  %v1458_v61 = vsel %vm1202_vm13, %v1919_v52, %v1330_v56  ;;  %v1328_v62 = vmul.f32 0.2, %v1027_v58  ;;  %v1858_v63 = vpop.f32.mrf.mxu0  ;;  %v1922_v0 = vpop.f32.mrf.mxu1 }
 0x143   : > { %1587 = vst.msk [vmem:[%s2202_s30 + $0x398] sm:$0xff] %vm1471_vm1, %v1458_v61  ;;  %v1392_v1 = vsel %vm1136_vm14, %v771_v57, %v1264_v60  ;;  %vm1141_vm0 = vcmp.gt.f32.partialorder %v1858_v63, 0.0  ;;  %v1269_v2 = vmul.f32 0.2, %v1858_v63  ;;  %vm1205_vm2 = vcmp.gt.f32.partialorder %v1922_v0, 0.0 }
 0x144   : > { %1521 = vst.msk [vmem:[%s2202_s30 + $0x188] sm:$0xff] %vm1471_vm1, %v1392_v1  ;;  %v1456_v3 = vsel %vm1200_vm15, %v1027_v58, %v1328_v62  ;;  %v1333_v4 = vmul.f32 0.2, %v1922_v0  ;;  %v784_v5 = vpop.f32.mrf.mxu0  ;;  %v1040_v6 = vpop.f32.mrf.mxu1 }
 0x145   : > { %1585 = vst.msk [vmem:[%s2202_s30 + $0x388] sm:$0xff] %vm1471_vm1, %v1456_v3  ;;  %v1397_v7 = vsel %vm1141_vm0, %v1858_v63, %v1269_v2  ;;  %vm1139_vm3 = vcmp.gt.f32.partialorder %v784_v5, 0.0  ;;  %v1267_v8 = vmul.f32 0.2, %v784_v5  ;;  %vm1203_vm4 = vcmp.gt.f32.partialorder %v1040_v6, 0.0 }
 0x146   : > { %1526 = vst.msk [vmem:[%s2202_s30 + $0x1b0] sm:$0xff] %vm1471_vm1, %v1397_v7  ;;  %v1461_v9 = vsel %vm1205_vm2, %v1922_v0, %v1333_v4  ;;  %v1331_v10 = vmul.f32 0.2, %v1040_v6  ;;  %v1859_v11 = vpop.f32.mrf.mxu0  ;;  %v1923_v12 = vpop.f32.mrf.mxu1 }
 0x147   : > { %1590 = vst.msk [vmem:[%s2202_s30 + $0x3b0] sm:$0xff] %vm1471_vm1, %v1461_v9  ;;  %v1395_v13 = vsel %vm1139_vm3, %v784_v5, %v1267_v8  ;;  %vm1142_vm5 = vcmp.gt.f32.partialorder %v1859_v11, 0.0  ;;  %v1270_v14 = vmul.f32 0.2, %v1859_v11  ;;  %vm1206_vm6 = vcmp.gt.f32.partialorder %v1923_v12, 0.0 }
 0x148   : > { %1524 = vst.msk [vmem:[%s2202_s30 + $0x1a0] sm:$0xff] %vm1471_vm1, %v1395_v13  ;;  %v1459_v15 = vsel %vm1203_vm4, %v1040_v6, %v1331_v10  ;;  %v1334_v16 = vmul.f32 0.2, %v1923_v12  ;;  %v787_v17 = vpop.f32.mrf.mxu0  ;;  %v1043_v18 = vpop.f32.mrf.mxu1 }
 0x149   : > { %1588 = vst.msk [vmem:[%s2202_s30 + $0x3a0] sm:$0xff] %vm1471_vm1, %v1459_v15  ;;  %v1398_v19 = vsel %vm1142_vm5, %v1859_v11, %v1270_v14  ;;  %vm1140_vm7 = vcmp.gt.f32.partialorder %v787_v17, 0.0  ;;  %v1268_v20 = vmul.f32 0.2, %v787_v17  ;;  %vm1204_vm8 = vcmp.gt.f32.partialorder %v1043_v18, 0.0 }
 0x14a   : > { %1527 = vst.msk [vmem:[%s2202_s30 + $0x1b8] sm:$0xff] %vm1471_vm1, %v1398_v19  ;;  %v1462_v21 = vsel %vm1206_vm6, %v1923_v12, %v1334_v16  ;;  %v1332_v22 = vmul.f32 0.2, %v1043_v18  ;;  %v1862_v23 = vpop.f32.mrf.mxu0  ;;  %v1926_v24 = vpop.f32.mrf.mxu1 }
 0x14b   : > { %1591 = vst.msk [vmem:[%s2202_s30 + $0x3b8] sm:$0xff] %vm1471_vm1, %v1462_v21  ;;  %v1396_v25 = vsel %vm1140_vm7, %v787_v17, %v1268_v20  ;;  %vm1145_vm9 = vcmp.gt.f32.partialorder %v1862_v23, 0.0  ;;  %v1273_v26 = vmul.f32 0.2, %v1862_v23  ;;  %vm1209_vm10 = vcmp.gt.f32.partialorder %v1926_v24, 0.0 }
 0x14c   : > { %1525 = vst.msk [vmem:[%s2202_s30 + $0x1a8] sm:$0xff] %vm1471_vm1, %v1396_v25  ;;  %v1460_v27 = vsel %vm1204_vm8, %v1043_v18, %v1332_v22  ;;  %v1337_v28 = vmul.f32 0.2, %v1926_v24  ;;  %v800_v29 = vpop.f32.mrf.mxu0  ;;  %v1056_v30 = vpop.f32.mrf.mxu1 }
 0x14d   : > { %1589 = vst.msk [vmem:[%s2202_s30 + $0x3a8] sm:$0xff] %vm1471_vm1, %v1460_v27  ;;  %v1401_v31 = vsel %vm1145_vm9, %v1862_v23, %v1273_v26  ;;  %vm1143_vm11 = vcmp.gt.f32.partialorder %v800_v29, 0.0  ;;  %v1271_v32 = vmul.f32 0.2, %v800_v29  ;;  %vm1207_vm12 = vcmp.gt.f32.partialorder %v1056_v30, 0.0 }
 0x14e   : > { %1530 = vst.msk [vmem:[%s2202_s30 + $0x1d0] sm:$0xff] %vm1471_vm1, %v1401_v31  ;;  %v1465_v33 = vsel %vm1209_vm10, %v1926_v24, %v1337_v28  ;;  %v1335_v34 = vmul.f32 0.2, %v1056_v30  ;;  %v1863_v35 = vpop.f32.mrf.mxu0  ;;  %v1927_v36 = vpop.f32.mrf.mxu1 }
 0x14f   : > { %1594 = vst.msk [vmem:[%s2202_s30 + $0x3d0] sm:$0xff] %vm1471_vm1, %v1465_v33  ;;  %v1399_v37 = vsel %vm1143_vm11, %v800_v29, %v1271_v32  ;;  %vm1146_vm13 = vcmp.gt.f32.partialorder %v1863_v35, 0.0  ;;  %v1274_v38 = vmul.f32 0.2, %v1863_v35  ;;  %vm1210_vm14 = vcmp.gt.f32.partialorder %v1927_v36, 0.0 }
 0x150   : > { %1528 = vst.msk [vmem:[%s2202_s30 + $0x1c0] sm:$0xff] %vm1471_vm1, %v1399_v37  ;;  %v1463_v39 = vsel %vm1207_vm12, %v1056_v30, %v1335_v34  ;;  %v1338_v40 = vmul.f32 0.2, %v1927_v36  ;;  %v803_v41 = vpop.f32.mrf.mxu0  ;;  %v1059_v42 = vpop.f32.mrf.mxu1 }
 0x151   : > { %1592 = vst.msk [vmem:[%s2202_s30 + $0x3c0] sm:$0xff] %vm1471_vm1, %v1463_v39  ;;  %v1402_v43 = vsel %vm1146_vm13, %v1863_v35, %v1274_v38  ;;  %vm1144_vm15 = vcmp.gt.f32.partialorder %v803_v41, 0.0  ;;  %v1272_v44 = vmul.f32 0.2, %v803_v41  ;;  %vm1208_vm0 = vcmp.gt.f32.partialorder %v1059_v42, 0.0 }
 0x152   : > { %1531 = vst.msk [vmem:[%s2202_s30 + $0x1d8] sm:$0xff] %vm1471_vm1, %v1402_v43  ;;  %v1466_v45 = vsel %vm1210_vm14, %v1927_v36, %v1338_v40  ;;  %v1336_v46 = vmul.f32 0.2, %v1059_v42  ;;  %v1866_v47 = vpop.f32.mrf.mxu0  ;;  %v1930_v48 = vpop.f32.mrf.mxu1 }
 0x153   : > { %1595 = vst.msk [vmem:[%s2202_s30 + $0x3d8] sm:$0xff] %vm1471_vm1, %v1466_v45  ;;  %v1400_v49 = vsel %vm1144_vm15, %v803_v41, %v1272_v44  ;;  %vm1149_vm2 = vcmp.gt.f32.partialorder %v1866_v47, 0.0  ;;  %v1277_v50 = vmul.f32 0.2, %v1866_v47  ;;  %vm1213_vm3 = vcmp.gt.f32.partialorder %v1930_v48, 0.0 }
 0x154   : > { %1529 = vst.msk [vmem:[%s2202_s30 + $0x1c8] sm:$0xff] %vm1471_vm1, %v1400_v49  ;;  %v1464_v51 = vsel %vm1208_vm0, %v1059_v42, %v1336_v46  ;;  %v1341_v52 = vmul.f32 0.2, %v1930_v48  ;;  %v816_v53 = vpop.f32.mrf.mxu0  ;;  %v1072_v54 = vpop.f32.mrf.mxu1 }
 0x155   : > { %1593 = vst.msk [vmem:[%s2202_s30 + $0x3c8] sm:$0xff] %vm1471_vm1, %v1464_v51  ;;  %v1405_v55 = vsel %vm1149_vm2, %v1866_v47, %v1277_v50  ;;  %vm1147_vm4 = vcmp.gt.f32.partialorder %v816_v53, 0.0  ;;  %v1275_v56 = vmul.f32 0.2, %v816_v53  ;;  %vm1211_vm5 = vcmp.gt.f32.partialorder %v1072_v54, 0.0 }
 0x156   : > { %1534 = vst.msk [vmem:[%s2202_s30 + $0x1f0] sm:$0xff] %vm1471_vm1, %v1405_v55  ;;  %v1469_v57 = vsel %vm1213_vm3, %v1930_v48, %v1341_v52  ;;  %v1339_v58 = vmul.f32 0.2, %v1072_v54  ;;  %v1867_v59 = vpop.f32.mrf.mxu0  ;;  %v1931_v60 = vpop.f32.mrf.mxu1 }
 0x157   : > { %1598 = vst.msk [vmem:[%s2202_s30 + $0x3f0] sm:$0xff] %vm1471_vm1, %v1469_v57  ;;  %v1403_v61 = vsel %vm1147_vm4, %v816_v53, %v1275_v56  ;;  %vm1150_vm6 = vcmp.gt.f32.partialorder %v1867_v59, 0.0  ;;  %v1278_v62 = vmul.f32 0.2, %v1867_v59  ;;  %vm1214_vm7 = vcmp.gt.f32.partialorder %v1931_v60, 0.0 }
 0x158   : > { %1532 = vst.msk [vmem:[%s2202_s30 + $0x1e0] sm:$0xff] %vm1471_vm1, %v1403_v61  ;;  %v1467_v63 = vsel %vm1211_vm5, %v1072_v54, %v1339_v58  ;;  %v1342_v0 = vmul.f32 0.2, %v1931_v60  ;;  %v819_v1 = vpop.f32.mrf.mxu0  ;;  %v1075_v2 = vpop.f32.mrf.mxu1 }
 0x159   : > { %1596 = vst.msk [vmem:[%s2202_s30 + $0x3e0] sm:$0xff] %vm1471_vm1, %v1467_v63  ;;  %v1406_v3 = vsel %vm1150_vm6, %v1867_v59, %v1278_v62  ;;  %vm1148_vm8 = vcmp.gt.f32.partialorder %v819_v1, 0.0  ;;  %v1276_v4 = vmul.f32 0.2, %v819_v1  ;;  %vm1212_vm9 = vcmp.gt.f32.partialorder %v1075_v2, 0.0 }
 0x15a   : > { %1535 = vst.msk [vmem:[%s2202_s30 + $0x1f8] sm:$0xff] %vm1471_vm1, %v1406_v3  ;;  %v1470_v5 = vsel %vm1214_vm7, %v1931_v60, %v1342_v0  ;;  %v1340_v6 = vmul.f32 0.2, %v1075_v2 }
 0x15b   : > { %1599 = vst.msk [vmem:[%s2202_s30 + $0x3f8] sm:$0xff] %vm1471_vm1, %v1470_v5  ;;  %v1404_v7 = vsel %vm1148_vm8, %v819_v1, %v1276_v4 }
 0x15c   : > { %1533 = vst.msk [vmem:[%s2202_s30 + $0x1e8] sm:$0xff] %vm1471_vm1, %v1404_v7  ;;  %v1468_v8 = vsel %vm1212_vm9, %v1075_v2, %v1340_v6 }
 0x15d   : > { %1597 = vst.msk [vmem:[%s2202_s30 + $0x3e8] sm:$0xff] %vm1471_vm1, %v1468_v8 }
 0x15e PF: > { %s12_s9 = sadd.s32 1, %s1952_s9  }
 0x15f   : > { %p9_p4 = scmp.ge.s32.totalorder %s12_s9, 4  }
 0x161   :  { %11 = sbr.rel (!%p9_p4) target bundleno = 1 (0x1), region = 58 }

// kernel: discriminator_forward.5
= control target key start
LH: loop header
LB: loop body
LE: loop exit
PB: predicated region body
PF: predicated region fallthrough
CT: control target
= control target key end

     0   :  { %v1386_v0 = vmov 0   ;;  %vm547_vm0 = vcmask 261120   ;;  %s3890_s1 = inlined_call_operand.vmem [shape: f32[256,32], index: 1, kind: input, shape index: {}]   ;;  %s3891_s0 = inlined_call_operand.vmem [shape: f32[512,256], index: 0, kind: input, shape index: {}]   ;;  %s3892_s2 = inlined_call_operand.vmem [shape: f32[1,32], index: 2, kind: input, shape index: {}]   ;;  %s3893_s3 = inlined_call_operand.vmem [shape: f32[1,32], index: 3, kind: input, shape index: {}]   ;;  %s3894_s4 = inlined_call_operand.vmem [shape: f32[512,32], index: 4, kind: output, shape index: {}]  }
   0x1   :  { %258 = vmatprep.subr.bf16.mxu0 %v1386_v0  ;;  %v160_v1 = vld [vmem:[%s3890_s1 + $0x70] sm:$0xff]  ;;  %v161_v2 = vld [vmem:[%s3890_s1 + $0x78] sm:$0xff]  ;;  %v158_v3 = vld [vmem:[%s3890_s1 + $0x60] sm:$0xff]  ;;  %1351 = vmatprep.subr.bf16.mxu1 %v1386_v0 }
   0x2   :  { %v249_v4 = vpack.c.bf16 %v161_v2, %v160_v1  ;;  %v159_v5 = vld [vmem:[%s3890_s1 + $0x68] sm:$0xff]  ;;  %v156_v7 = vld [vmem:[%s3890_s1 + $0x50] sm:$0xff]  ;;  %v157_v8 = vld [vmem:[%s3890_s1 + $0x58] sm:$0xff] }
   0x3   :  { %v248_v6 = vpack.c.bf16 %v159_v5, %v158_v3  ;;  %v247_v9 = vpack.c.bf16 %v157_v8, %v156_v7  ;;  %v154_v10 = vld [vmem:[%s3890_s1 + $0x40] sm:$0xff]  ;;  %v155_v11 = vld [vmem:[%s3890_s1 + $0x48] sm:$0xff]  ;;  %v21_v14 = vld [vmem:[%s3891_s0 + $0x18] sm:$0xff] }
   0x4   :  { %259 = vmatpush1.bf16.msra.mxu0 %v249_v4  ;;  %1367 = vmatpush1.bf16.msra.mxu1 %v249_v4  ;;  %v19_v12 = vld [vmem:[%s3891_s0 + $0x8] sm:$0xff]  ;;  %v246_v13 = vpack.c.bf16 %v155_v11, %v154_v10  ;;  %v152_v15 = vld [vmem:[%s3890_s1 + $0x30] sm:$0xff]  ;;  %v153_v16 = vld [vmem:[%s3890_s1 + $0x38] sm:$0xff] }
   0x5   :  { %260 = vmatprep.subr.bf16.mxu0 %v1386_v0  ;;  %1352 = vmatprep.subr.bf16.mxu1 %v1386_v0  ;;  %v179_v17 = vpack.c.bf16 %v21_v14, %v19_v12  ;;  %v245_v18 = vpack.c.bf16 %v153_v16, %v152_v15  ;;  %v150_v19 = vld [vmem:[%s3890_s1 + $0x20] sm:$0xff]  ;;  %v151_v20 = vld [vmem:[%s3890_s1 + $0x28] sm:$0xff]  ;;  %v148_v22 = vld [vmem:[%s3890_s1 + $0x10] sm:$0xff] }
   0x6   :  { %v244_v21 = vpack.c.bf16 %v151_v20, %v150_v19  ;;  %v149_v23 = vld [vmem:[%s3890_s1 + $0x18] sm:$0xff]  ;;  %v83_v24 = vld [vmem:[%s3891_s0 + $0x208] sm:$0xff]  ;;  %v146_v28 = vld [vmem:[%s3890_s1] sm:$0xff] }
   0x7   :  { %290 = vmatprep.mubr.bf16.mxu0 %v179_v17  ;;  %v85_v25 = vld [vmem:[%s3891_s0 + $0x218] sm:$0xff]  ;;  %v243_v27 = vpack.c.bf16 %v149_v23, %v148_v22  ;;  %v147_v29 = vld [vmem:[%s3890_s1 + $0x8] sm:$0xff]  ;;  %v176_v31 = vld [vmem:[%s3890_s1 + $0xf0] sm:$0xff] }
   0x8   :  { %261 = vmatpush1.bf16.msra.mxu0 %v248_v6  ;;  %1368 = vmatpush1.bf16.msra.mxu1 %v248_v6  ;;  %v211_v26 = vpack.c.bf16 %v85_v25, %v83_v24  ;;  %v242_v30 = vpack.c.bf16 %v147_v29, %v146_v28  ;;  %v177_v32 = vld [vmem:[%s3890_s1 + $0xf8] sm:$0xff]  ;;  %v174_v34 = vld [vmem:[%s3890_s1 + $0xe0] sm:$0xff]  ;;  %v175_v35 = vld [vmem:[%s3890_s1 + $0xe8] sm:$0xff] }
   0x9   :  { %262 = vmatprep.subr.bf16.mxu0 %v1386_v0  ;;  %1353 = vmatprep.subr.bf16.mxu1 %v1386_v0  ;;  %v257_v33 = vpack.c.bf16 %v177_v32, %v176_v31  ;;  %v256_v36 = vpack.c.bf16 %v175_v35, %v174_v34  ;;  %v172_v37 = vld [vmem:[%s3890_s1 + $0xd0] sm:$0xff]  ;;  %v173_v38 = vld [vmem:[%s3890_s1 + $0xd8] sm:$0xff]  ;;  %v170_v40 = vld [vmem:[%s3890_s1 + $0xc0] sm:$0xff] }
   0xa   :  { %418 = vmatprep.mubr.bf16.mxu1 %v211_v26  ;;  %v255_v39 = vpack.c.bf16 %v173_v38, %v172_v37  ;;  %v171_v41 = vld [vmem:[%s3890_s1 + $0xc8] sm:$0xff]  ;;  %v168_v43 = vld [vmem:[%s3890_s1 + $0xb0] sm:$0xff]  ;;  %v169_v44 = vld [vmem:[%s3890_s1 + $0xb8] sm:$0xff] }
   0xb   :  { %v254_v42 = vpack.c.bf16 %v171_v41, %v170_v40  ;;  %v253_v45 = vpack.c.bf16 %v169_v44, %v168_v43  ;;  %v166_v46 = vld [vmem:[%s3890_s1 + $0xa0] sm:$0xff]  ;;  %v167_v47 = vld [vmem:[%s3890_s1 + $0xa8] sm:$0xff]  ;;  %v164_v49 = vld [vmem:[%s3890_s1 + $0x90] sm:$0xff] }
   0xc   :  { %263 = vmatpush1.bf16.msra.mxu0 %v247_v9  ;;  %1369 = vmatpush1.bf16.msra.mxu1 %v247_v9  ;;  %v252_v48 = vpack.c.bf16 %v167_v47, %v166_v46  ;;  %v165_v50 = vld [vmem:[%s3890_s1 + $0x98] sm:$0xff]  ;;  %v162_v52 = vld [vmem:[%s3890_s1 + $0x80] sm:$0xff]  ;;  %v163_v53 = vld [vmem:[%s3890_s1 + $0x88] sm:$0xff] }
   0xd   :  { %264 = vmatprep.subr.bf16.mxu0 %v1386_v0  ;;  %1354 = vmatprep.subr.bf16.mxu1 %v1386_v0  ;;  %v251_v51 = vpack.c.bf16 %v165_v50, %v164_v49  ;;  %v18_v54 = vld [vmem:[%s3891_s0] sm:$0xff]  ;;  %v20_v55 = vld [vmem:[%s3891_s0 + $0x10] sm:$0xff]  ;;  %v250_v56 = vpack.c.bf16 %v163_v53, %v162_v52  ;;  %v23_v57 = vld [vmem:[%s3891_s0 + $0x28] sm:$0xff] }
   0xe   :  { %v82_v58 = vld [vmem:[%s3891_s0 + $0x200] sm:$0xff]  ;;  %v84_v59 = vld [vmem:[%s3891_s0 + $0x210] sm:$0xff]  ;;  %v25_v60 = vld [vmem:[%s3891_s0 + $0x38] sm:$0xff]  ;;  %v178_v63 = vpack.c.bf16 %v20_v55, %v18_v54 }
   0xf   :  { %v87_v61 = vld [vmem:[%s3891_s0 + $0x228] sm:$0xff]  ;;  %v89_v62 = vld [vmem:[%s3891_s0 + $0x238] sm:$0xff]  ;;  %v210_v1 = vpack.c.bf16 %v84_v59, %v82_v58  ;;  %v181_v2 = vpack.c.bf16 %v25_v60, %v23_v57  ;;  %v22_v4 = vld [vmem:[%s3891_s0 + $0x20] sm:$0xff] }
  0x10   :  { %265 = vmatpush1.bf16.msra.mxu0 %v246_v13  ;;  %1370 = vmatpush1.bf16.msra.mxu1 %v246_v13  ;;  %v213_v3 = vpack.c.bf16 %v89_v62, %v87_v61  ;;  %v27_v5 = vld [vmem:[%s3891_s0 + $0x48] sm:$0xff]  ;;  %v86_v6 = vld [vmem:[%s3891_s0 + $0x220] sm:$0xff]  ;;  %v88_v7 = vld [vmem:[%s3891_s0 + $0x230] sm:$0xff] }
  0x11   :  { %266 = vmatprep.subr.bf16.mxu0 %v1386_v0  ;;  %1355 = vmatprep.subr.bf16.mxu1 %v1386_v0  ;;  %v29_v8 = vld [vmem:[%s3891_s0 + $0x58] sm:$0xff]  ;;  %v91_v9 = vld [vmem:[%s3891_s0 + $0x248] sm:$0xff]  ;;  %v212_v12 = vpack.c.bf16 %v88_v7, %v86_v6  ;;  %v26_v15 = vld [vmem:[%s3891_s0 + $0x40] sm:$0xff] }
  0x12   :  { %v93_v10 = vld [vmem:[%s3891_s0 + $0x258] sm:$0xff]  ;;  %v183_v13 = vpack.c.bf16 %v29_v8, %v27_v5  ;;  %v28_v16 = vld [vmem:[%s3891_s0 + $0x50] sm:$0xff]  ;;  %v31_v17 = vld [vmem:[%s3891_s0 + $0x68] sm:$0xff] }
  0x13   :  { %v215_v14 = vpack.c.bf16 %v93_v10, %v91_v9  ;;  %v92_v19 = vld [vmem:[%s3891_s0 + $0x250] sm:$0xff]  ;;  %v33_v20 = vld [vmem:[%s3891_s0 + $0x78] sm:$0xff]  ;;  %v182_v23 = vpack.c.bf16 %v28_v16, %v26_v15  ;;  %v35_v29 = vld [vmem:[%s3891_s0 + $0x88] sm:$0xff] }
  0x14   :  { %267 = vmatpush1.bf16.msra.mxu0 %v245_v18  ;;  %1371 = vmatpush1.bf16.msra.mxu1 %v245_v18  ;;  %v90_v18 = vld [vmem:[%s3891_s0 + $0x240] sm:$0xff]  ;;  %v97_v22 = vld [vmem:[%s3891_s0 + $0x278] sm:$0xff]  ;;  %v185_v25 = vpack.c.bf16 %v33_v20, %v31_v17  ;;  %v32_v28 = vld [vmem:[%s3891_s0 + $0x70] sm:$0xff] }
  0x15   :  { %268 = vmatprep.subr.bf16.mxu0 %v1386_v0  ;;  %1356 = vmatprep.subr.bf16.mxu1 %v1386_v0  ;;  %v214_v24 = vpack.c.bf16 %v92_v19, %v90_v18  ;;  %v96_v31 = vld [vmem:[%s3891_s0 + $0x270] sm:$0xff]  ;;  %v37_v32 = vld [vmem:[%s3891_s0 + $0x98] sm:$0xff]  ;;  %v39_v41 = vld [vmem:[%s3891_s0 + $0xa8] sm:$0xff] }
  0x16   :  { %v101_v34 = vld [vmem:[%s3891_s0 + $0x298] sm:$0xff]  ;;  %v187_v37 = vpack.c.bf16 %v37_v32, %v35_v29  ;;  %v36_v40 = vld [vmem:[%s3891_s0 + $0x90] sm:$0xff]  ;;  %v43_v53 = vld [vmem:[%s3891_s0 + $0xc8] sm:$0xff] }
  0x17   :  { %v100_v43 = vld [vmem:[%s3891_s0 + $0x290] sm:$0xff]  ;;  %v41_v44 = vld [vmem:[%s3891_s0 + $0xb8] sm:$0xff]  ;;  %v102_v54 = vld [vmem:[%s3891_s0 + $0x2a0] sm:$0xff] }
  0x18   :  { %269 = vmatpush1.bf16.msra.mxu0 %v244_v21  ;;  %1372 = vmatpush1.bf16.msra.mxu1 %v244_v21  ;;  %v95_v21 = vld [vmem:[%s3891_s0 + $0x268] sm:$0xff]  ;;  %v105_v46 = vld [vmem:[%s3891_s0 + $0x2b8] sm:$0xff]  ;;  %v189_v49 = vpack.c.bf16 %v41_v44, %v39_v41  ;;  %v40_v52 = vld [vmem:[%s3891_s0 + $0xb0] sm:$0xff] }
  0x19   :  { %270 = vmatprep.subr.bf16.mxu0 %v1386_v0  ;;  %1357 = vmatprep.subr.bf16.mxu1 %v1386_v0  ;;  %v217_v26 = vpack.c.bf16 %v97_v22, %v95_v21  ;;  %v104_v55 = vld [vmem:[%s3891_s0 + $0x2b0] sm:$0xff]  ;;  %v107_v57 = vld [vmem:[%s3891_s0 + $0x2c8] sm:$0xff]  ;;  %v109_v58 = vld [vmem:[%s3891_s0 + $0x2d8] sm:$0xff] }
  0x1a   :  { %v220_v60 = vpack.c.bf16 %v104_v55, %v102_v54  ;;  %v223_v62 = vpack.c.bf16 %v109_v58, %v107_v57  ;;  %v111_v5 = vld [vmem:[%s3891_s0 + $0x2e8] sm:$0xff]  ;;  %v113_v6 = vld [vmem:[%s3891_s0 + $0x2f8] sm:$0xff]  ;;  %v112_v15 = vld [vmem:[%s3891_s0 + $0x2f0] sm:$0xff] }
  0x1b   :  { %v225_v10 = vpack.c.bf16 %v113_v6, %v111_v5  ;;  %v53_v16 = vld [vmem:[%s3891_s0 + $0x118] sm:$0xff]  ;;  %v115_v17 = vld [vmem:[%s3891_s0 + $0x308] sm:$0xff] }
  0x1c   :  { %271 = vmatpush1.bf16.msra.mxu0 %v243_v27  ;;  %1373 = vmatpush1.bf16.msra.mxu1 %v243_v27  ;;  %v30_v27 = vld [vmem:[%s3891_s0 + $0x60] sm:$0xff]  ;;  %v117_v18 = vld [vmem:[%s3891_s0 + $0x318] sm:$0xff]  ;;  %v119_v29 = vld [vmem:[%s3891_s0 + $0x328] sm:$0xff] }
  0x1d   :  { %272 = vmatprep.subr.bf16.mxu0 %v1386_v0  ;;  %1358 = vmatprep.subr.bf16.mxu1 %v1386_v0  ;;  %v184_v35 = vpack.c.bf16 %v32_v28, %v30_v27  ;;  %v227_v22 = vpack.c.bf16 %v117_v18, %v115_v17  ;;  %v116_v27 = vld [vmem:[%s3891_s0 + $0x310] sm:$0xff]  ;;  %v57_v28 = vld [vmem:[%s3891_s0 + $0x138] sm:$0xff]  ;;  %v123_v41 = vld [vmem:[%s3891_s0 + $0x348] sm:$0xff] }
  0x1e   :  { %v129_v54 = vld [vmem:[%s3891_s0 + $0x378] sm:$0xff] }
  0x20   :  { %273 = vmatpush1.bf16.msra.mxu0 %v242_v30  ;;  %1374 = vmatpush1.bf16.msra.mxu1 %v242_v30  ;;  %v94_v30 = vld [vmem:[%s3891_s0 + $0x260] sm:$0xff] }
  0x21   :  { %274 = vmatprep.subr.bf16.mxu0 %v1386_v0  ;;  %1359 = vmatprep.subr.bf16.mxu1 %v1386_v0 }
  0x24   :  { %275 = vmatpush2.bf16.msra.mxu0 %v257_v33  ;;  %1375 = vmatpush2.bf16.msra.mxu1 %v257_v33  ;;  %v99_v33 = vld [vmem:[%s3891_s0 + $0x288] sm:$0xff] }
  0x25   :  { %276 = vmatprep.subr.bf16.mxu0 %v1386_v0  ;;  %1360 = vmatprep.subr.bf16.mxu1 %v1386_v0  ;;  %v219_v38 = vpack.c.bf16 %v101_v34, %v99_v33 }
  0x28   :  { %277 = vmatpush2.bf16.msra.mxu0 %v256_v36  ;;  %1376 = vmatpush2.bf16.msra.mxu1 %v256_v36  ;;  %v216_v36 = vpack.c.bf16 %v96_v31, %v94_v30  ;;  %v121_v30 = vld [vmem:[%s3891_s0 + $0x338] sm:$0xff] }
  0x29   :  { %278 = vmatprep.subr.bf16.mxu0 %v1386_v0  ;;  %1361 = vmatprep.subr.bf16.mxu1 %v1386_v0  ;;  %v229_v34 = vpack.c.bf16 %v121_v30, %v119_v29 }
  0x2c   :  { %279 = vmatpush2.bf16.msra.mxu0 %v255_v39  ;;  %1377 = vmatpush2.bf16.msra.mxu1 %v255_v39  ;;  %v34_v39 = vld [vmem:[%s3891_s0 + $0x80] sm:$0xff] }
  0x2d   :  { %280 = vmatprep.subr.bf16.mxu0 %v1386_v0  ;;  %1362 = vmatprep.subr.bf16.mxu1 %v1386_v0  ;;  %v186_v47 = vpack.c.bf16 %v36_v40, %v34_v39  ;;  %v120_v39 = vld [vmem:[%s3891_s0 + $0x330] sm:$0xff]  ;;  %v61_v40 = vld [vmem:[%s3891_s0 + $0x158] sm:$0xff] }
  0x30   :  { %281 = vmatpush2.bf16.msra.mxu0 %v254_v42  ;;  %1378 = vmatpush2.bf16.msra.mxu1 %v254_v42  ;;  %v98_v42 = vld [vmem:[%s3891_s0 + $0x280] sm:$0xff] }
  0x31   :  { %282 = vmatprep.subr.bf16.mxu0 %v1386_v0  ;;  %1363 = vmatprep.subr.bf16.mxu1 %v1386_v0 }
  0x34   :  { %283 = vmatpush2.bf16.msra.mxu0 %v253_v45  ;;  %1379 = vmatpush2.bf16.msra.mxu1 %v253_v45  ;;  %v103_v45 = vld [vmem:[%s3891_s0 + $0x2a8] sm:$0xff] }
  0x35   :  { %284 = vmatprep.subr.bf16.mxu0 %v1386_v0  ;;  %1364 = vmatprep.subr.bf16.mxu1 %v1386_v0  ;;  %v221_v50 = vpack.c.bf16 %v105_v46, %v103_v45 }
  0x38   :  { %285 = vmatpush2.bf16.msra.mxu0 %v252_v48  ;;  %1380 = vmatpush2.bf16.msra.mxu1 %v252_v48  ;;  %v218_v48 = vpack.c.bf16 %v100_v43, %v98_v42  ;;  %v125_v42 = vld [vmem:[%s3891_s0 + $0x358] sm:$0xff] }
  0x39   :  { %286 = vmatprep.subr.bf16.mxu0 %v1386_v0  ;;  %1365 = vmatprep.subr.bf16.mxu1 %v1386_v0  ;;  %v231_v46 = vpack.c.bf16 %v125_v42, %v123_v41 }
  0x3c   :  { %287 = vmatpush2.bf16.msra.mxu0 %v251_v51  ;;  %1381 = vmatpush2.bf16.msra.mxu1 %v251_v51  ;;  %v38_v51 = vld [vmem:[%s3891_s0 + $0xa0] sm:$0xff] }
  0x3d   :  { %288 = vmatprep.subr.bf16.mxu0 %v1386_v0  ;;  %1366 = vmatprep.subr.bf16.mxu1 %v1386_v0  ;;  %v24_v0 = vld [vmem:[%s3891_s0 + $0x30] sm:$0xff]  ;;  %v188_v59 = vpack.c.bf16 %v40_v52, %v38_v51  ;;  %v65_v52 = vld [vmem:[%s3891_s0 + $0x178] sm:$0xff] }
  0x3e   :  { %v180_v11 = vpack.c.bf16 %v24_v0, %v22_v4  ;;  %v108_v4 = vld [vmem:[%s3891_s0 + $0x2d0] sm:$0xff]  ;;  %v49_v0 = vld [vmem:[%s3891_s0 + $0xf8] sm:$0xff] }
  0x3f   :  { %v124_v51 = vld [vmem:[%s3891_s0 + $0x350] sm:$0xff] }
  0x40   :  { %289 = vmatpush2.bf16.msra.mxu0 %v250_v56  ;;  %1382 = vmatpush2.bf16.msra.mxu1 %v250_v56  ;;  %v45_v56 = vld [vmem:[%s3891_s0 + $0xd8] sm:$0xff] }
  0x41   :  { %v191_v61 = vpack.c.bf16 %v45_v56, %v43_v53  ;;  %v127_v53 = vld [vmem:[%s3891_s0 + $0x368] sm:$0xff] }
  0x42   :  { %v233_v58 = vpack.c.bf16 %v129_v54, %v127_v53 }
  0x43   :  { %291 = vmatmul.mubr.bf16.vlgmr.msra.gmra.mxu0 %v178_v63  ;;  %419 = vmatmul.mubr.bf16.vlgmr.msra.gmra.mxu1 %v210_v1  ;;  %v42_v63 = vld [vmem:[%s3891_s0 + $0xc0] sm:$0xff]  ;;  %v44_v1 = vld [vmem:[%s3891_s0 + $0xd0] sm:$0xff] }
  0x44   :  { %298 = vmatprep.mubr.bf16.mxu0 %v181_v2  ;;  %426 = vmatprep.mubr.bf16.mxu1 %v213_v3  ;;  %v47_v2 = vld [vmem:[%s3891_s0 + $0xe8] sm:$0xff]  ;;  %v106_v3 = vld [vmem:[%s3891_s0 + $0x2c0] sm:$0xff]  ;;  %v190_v7 = vpack.c.bf16 %v44_v1, %v42_v63  ;;  %v128_v63 = vld [vmem:[%s3891_s0 + $0x370] sm:$0xff] }
  0x45   :  { %v222_v8 = vpack.c.bf16 %v108_v4, %v106_v3  ;;  %v193_v9 = vpack.c.bf16 %v49_v0, %v47_v2  ;;  %v69_v1 = vld [vmem:[%s3891_s0 + $0x198] sm:$0xff]  ;;  %v131_v2 = vld [vmem:[%s3891_s0 + $0x388] sm:$0xff] }
  0x46   :  { %v133_v3 = vld [vmem:[%s3891_s0 + $0x398] sm:$0xff] }
  0x47   :  { %v235_v6 = vpack.c.bf16 %v133_v3, %v131_v2 }
  0x4b   :  { %299 = vmatmul.mubr.bf16.gmra.mxu0 %v180_v11  ;;  %427 = vmatmul.mubr.bf16.gmra.mxu1 %v212_v12  ;;  %v46_v11 = vld [vmem:[%s3891_s0 + $0xe0] sm:$0xff]  ;;  %v48_v12 = vld [vmem:[%s3891_s0 + $0xf0] sm:$0xff] }
  0x4c   :  { %306 = vmatprep.mubr.bf16.mxu0 %v183_v13  ;;  %434 = vmatprep.mubr.bf16.mxu1 %v215_v14  ;;  %v51_v13 = vld [vmem:[%s3891_s0 + $0x108] sm:$0xff]  ;;  %v110_v14 = vld [vmem:[%s3891_s0 + $0x2e0] sm:$0xff]  ;;  %v192_v19 = vpack.c.bf16 %v48_v12, %v46_v11  ;;  %v132_v11 = vld [vmem:[%s3891_s0 + $0x390] sm:$0xff] }
  0x4d   :  { %v224_v20 = vpack.c.bf16 %v112_v15, %v110_v14  ;;  %v195_v21 = vpack.c.bf16 %v53_v16, %v51_v13  ;;  %v73_v12 = vld [vmem:[%s3891_s0 + $0x1b8] sm:$0xff]  ;;  %v135_v13 = vld [vmem:[%s3891_s0 + $0x3a8] sm:$0xff] }
  0x4e   :  { %v137_v14 = vld [vmem:[%s3891_s0 + $0x3b8] sm:$0xff] }
  0x4f   :  { %v237_v18 = vpack.c.bf16 %v137_v14, %v135_v13 }
  0x53   :  { %307 = vmatmul.mubr.bf16.gmra.mxu0 %v182_v23  ;;  %435 = vmatmul.mubr.bf16.gmra.mxu1 %v214_v24  ;;  %v50_v23 = vld [vmem:[%s3891_s0 + $0x100] sm:$0xff]  ;;  %v52_v24 = vld [vmem:[%s3891_s0 + $0x110] sm:$0xff] }
  0x54   :  { %314 = vmatprep.mubr.bf16.mxu0 %v185_v25  ;;  %442 = vmatprep.mubr.bf16.mxu1 %v217_v26  ;;  %v55_v25 = vld [vmem:[%s3891_s0 + $0x128] sm:$0xff]  ;;  %v114_v26 = vld [vmem:[%s3891_s0 + $0x300] sm:$0xff]  ;;  %v194_v31 = vpack.c.bf16 %v52_v24, %v50_v23  ;;  %v136_v23 = vld [vmem:[%s3891_s0 + $0x3b0] sm:$0xff] }
  0x55   :  { %v226_v32 = vpack.c.bf16 %v116_v27, %v114_v26  ;;  %v197_v33 = vpack.c.bf16 %v57_v28, %v55_v25  ;;  %v77_v24 = vld [vmem:[%s3891_s0 + $0x1d8] sm:$0xff]  ;;  %v139_v25 = vld [vmem:[%s3891_s0 + $0x3c8] sm:$0xff] }
  0x56   :  { %v141_v26 = vld [vmem:[%s3891_s0 + $0x3d8] sm:$0xff] }
  0x57   :  { %v239_v30 = vpack.c.bf16 %v141_v26, %v139_v25 }
  0x5b   :  { %315 = vmatmul.mubr.bf16.gmra.mxu0 %v184_v35  ;;  %443 = vmatmul.mubr.bf16.gmra.mxu1 %v216_v36  ;;  %v54_v35 = vld [vmem:[%s3891_s0 + $0x120] sm:$0xff]  ;;  %v56_v36 = vld [vmem:[%s3891_s0 + $0x130] sm:$0xff] }
  0x5c   :  { %322 = vmatprep.mubr.bf16.mxu0 %v187_v37  ;;  %450 = vmatprep.mubr.bf16.mxu1 %v219_v38  ;;  %v59_v37 = vld [vmem:[%s3891_s0 + $0x148] sm:$0xff]  ;;  %v118_v38 = vld [vmem:[%s3891_s0 + $0x320] sm:$0xff]  ;;  %v196_v43 = vpack.c.bf16 %v56_v36, %v54_v35  ;;  %v140_v35 = vld [vmem:[%s3891_s0 + $0x3d0] sm:$0xff] }
  0x5d   :  { %v228_v44 = vpack.c.bf16 %v120_v39, %v118_v38  ;;  %v199_v45 = vpack.c.bf16 %v61_v40, %v59_v37  ;;  %v81_v36 = vld [vmem:[%s3891_s0 + $0x1f8] sm:$0xff]  ;;  %v143_v37 = vld [vmem:[%s3891_s0 + $0x3e8] sm:$0xff] }
  0x5e   :  { %v145_v38 = vld [vmem:[%s3891_s0 + $0x3f8] sm:$0xff] }
  0x5f   :  { %v241_v42 = vpack.c.bf16 %v145_v38, %v143_v37 }
  0x63   :  { %323 = vmatmul.mubr.bf16.gmra.mxu0 %v186_v47  ;;  %451 = vmatmul.mubr.bf16.gmra.mxu1 %v218_v48  ;;  %v58_v47 = vld [vmem:[%s3891_s0 + $0x140] sm:$0xff]  ;;  %v60_v48 = vld [vmem:[%s3891_s0 + $0x150] sm:$0xff] }
  0x64   :  { %330 = vmatprep.mubr.bf16.mxu0 %v189_v49  ;;  %458 = vmatprep.mubr.bf16.mxu1 %v221_v50  ;;  %v63_v49 = vld [vmem:[%s3891_s0 + $0x168] sm:$0xff]  ;;  %v122_v50 = vld [vmem:[%s3891_s0 + $0x340] sm:$0xff]  ;;  %v198_v55 = vpack.c.bf16 %v60_v48, %v58_v47 }
  0x65   :  { %v230_v56 = vpack.c.bf16 %v124_v51, %v122_v50  ;;  %v201_v57 = vpack.c.bf16 %v65_v52, %v63_v49 }
  0x6b   :  { %331 = vmatmul.mubr.bf16.gmra.mxu0 %v188_v59  ;;  %459 = vmatmul.mubr.bf16.gmra.mxu1 %v220_v60  ;;  %v62_v59 = vld [vmem:[%s3891_s0 + $0x160] sm:$0xff]  ;;  %v64_v60 = vld [vmem:[%s3891_s0 + $0x170] sm:$0xff] }
  0x6c   :  { %338 = vmatprep.mubr.bf16.mxu0 %v191_v61  ;;  %466 = vmatprep.mubr.bf16.mxu1 %v223_v62  ;;  %v67_v61 = vld [vmem:[%s3891_s0 + $0x188] sm:$0xff]  ;;  %v126_v62 = vld [vmem:[%s3891_s0 + $0x360] sm:$0xff]  ;;  %v200_v4 = vpack.c.bf16 %v64_v60, %v62_v59 }
  0x6d   :  { %v232_v0 = vpack.c.bf16 %v128_v63, %v126_v62  ;;  %v203_v5 = vpack.c.bf16 %v69_v1, %v67_v61 }
  0x73   :  { %339 = vmatmul.mubr.bf16.gmra.mxu0 %v190_v7  ;;  %467 = vmatmul.mubr.bf16.gmra.mxu1 %v222_v8  ;;  %v66_v7 = vld [vmem:[%s3891_s0 + $0x180] sm:$0xff]  ;;  %v68_v8 = vld [vmem:[%s3891_s0 + $0x190] sm:$0xff] }
  0x74   :  { %346 = vmatprep.mubr.bf16.mxu0 %v193_v9  ;;  %474 = vmatprep.mubr.bf16.mxu1 %v225_v10  ;;  %v71_v9 = vld [vmem:[%s3891_s0 + $0x1a8] sm:$0xff]  ;;  %v130_v10 = vld [vmem:[%s3891_s0 + $0x380] sm:$0xff]  ;;  %v202_v15 = vpack.c.bf16 %v68_v8, %v66_v7 }
  0x75   :  { %v234_v16 = vpack.c.bf16 %v132_v11, %v130_v10  ;;  %v205_v17 = vpack.c.bf16 %v73_v12, %v71_v9 }
  0x7b   :  { %347 = vmatmul.mubr.bf16.gmra.mxu0 %v192_v19  ;;  %475 = vmatmul.mubr.bf16.gmra.mxu1 %v224_v20  ;;  %v70_v19 = vld [vmem:[%s3891_s0 + $0x1a0] sm:$0xff]  ;;  %v72_v20 = vld [vmem:[%s3891_s0 + $0x1b0] sm:$0xff] }
  0x7c   :  { %354 = vmatprep.mubr.bf16.mxu0 %v195_v21  ;;  %482 = vmatprep.mubr.bf16.mxu1 %v227_v22  ;;  %v75_v21 = vld [vmem:[%s3891_s0 + $0x1c8] sm:$0xff]  ;;  %v134_v22 = vld [vmem:[%s3891_s0 + $0x3a0] sm:$0xff]  ;;  %v204_v27 = vpack.c.bf16 %v72_v20, %v70_v19 }
  0x7d   :  { %v236_v28 = vpack.c.bf16 %v136_v23, %v134_v22  ;;  %v207_v29 = vpack.c.bf16 %v77_v24, %v75_v21 }
  0x83   :  { %355 = vmatmul.mubr.bf16.gmra.mxu0 %v194_v31  ;;  %483 = vmatmul.mubr.bf16.gmra.mxu1 %v226_v32  ;;  %v74_v31 = vld [vmem:[%s3891_s0 + $0x1c0] sm:$0xff]  ;;  %v76_v32 = vld [vmem:[%s3891_s0 + $0x1d0] sm:$0xff] }
  0x84   :  { %362 = vmatprep.mubr.bf16.mxu0 %v197_v33  ;;  %490 = vmatprep.mubr.bf16.mxu1 %v229_v34  ;;  %v79_v33 = vld [vmem:[%s3891_s0 + $0x1e8] sm:$0xff]  ;;  %v138_v34 = vld [vmem:[%s3891_s0 + $0x3c0] sm:$0xff]  ;;  %v206_v39 = vpack.c.bf16 %v76_v32, %v74_v31 }
  0x85   :  { %v238_v40 = vpack.c.bf16 %v140_v35, %v138_v34  ;;  %v209_v41 = vpack.c.bf16 %v81_v36, %v79_v33 }
  0x8b   :  { %363 = vmatmul.mubr.bf16.gmra.mxu0 %v196_v43  ;;  %491 = vmatmul.mubr.bf16.gmra.mxu1 %v228_v44  ;;  %v78_v43 = vld [vmem:[%s3891_s0 + $0x1e0] sm:$0xff]  ;;  %v80_v44 = vld [vmem:[%s3891_s0 + $0x1f0] sm:$0xff] }
  0x8c   :  { %370 = vmatprep.mubr.bf16.mxu0 %v199_v45  ;;  %498 = vmatprep.mubr.bf16.mxu1 %v231_v46  ;;  %v142_v45 = vld [vmem:[%s3891_s0 + $0x3e0] sm:$0xff]  ;;  %v144_v46 = vld [vmem:[%s3891_s0 + $0x3f0] sm:$0xff]  ;;  %v208_v47 = vpack.c.bf16 %v80_v44, %v78_v43 }
  0x8d   :  { %v240_v48 = vpack.c.bf16 %v144_v46, %v142_v45 }
  0x93   :  { %371 = vmatmul.mubr.bf16.gmra.mxu0 %v198_v55  ;;  %499 = vmatmul.mubr.bf16.gmra.mxu1 %v230_v56 }
  0x94   :  { %378 = vmatprep.mubr.bf16.mxu0 %v201_v57  ;;  %506 = vmatprep.mubr.bf16.mxu1 %v233_v58 }
  0x9b   :  { %379 = vmatmul.mubr.bf16.gmra.mxu0 %v200_v4  ;;  %507 = vmatmul.mubr.bf16.gmra.mxu1 %v232_v0 }
  0x9c   :  { %386 = vmatprep.mubr.bf16.mxu0 %v203_v5  ;;  %514 = vmatprep.mubr.bf16.mxu1 %v235_v6 }
  0xa3   :  { %387 = vmatmul.mubr.bf16.gmra.mxu0 %v202_v15  ;;  %515 = vmatmul.mubr.bf16.gmra.mxu1 %v234_v16 }
  0xa4   :  { %394 = vmatprep.mubr.bf16.mxu0 %v205_v17  ;;  %522 = vmatprep.mubr.bf16.mxu1 %v237_v18 }
  0xab   :  { %395 = vmatmul.mubr.bf16.gmra.mxu0 %v204_v27  ;;  %523 = vmatmul.mubr.bf16.gmra.mxu1 %v236_v28 }
  0xac   :  { %402 = vmatprep.mubr.bf16.mxu0 %v207_v29  ;;  %530 = vmatprep.mubr.bf16.mxu1 %v239_v30 }
  0xb3   :  { %403 = vmatmul.mubr.bf16.gmra.mxu0 %v206_v39  ;;  %531 = vmatmul.mubr.bf16.gmra.mxu1 %v238_v40 }
  0xb4   :  { %410 = vmatprep.mubr.bf16.mxu0 %v209_v41  ;;  %538 = vmatprep.mubr.bf16.mxu1 %v241_v42 }
  0xbb   :  { %411 = vmatmul.mubr.bf16.gmra.mxu0 %v208_v47  ;;  %539 = vmatmul.mubr.bf16.gmra.mxu1 %v240_v48 }
 0x103   :  { %v1924_v49 = vpop.f32.mrf.mxu0  ;;  %v1926_v50 = vpop.f32.mrf.mxu1 }
 0x105   :  { %v294_v51 = vpop.f32.mrf.mxu0  ;;  %v422_v52 = vpop.f32.mrf.mxu1 }
 0x107   :  { %v1928_v53 = vpop.f32.mrf.mxu0  ;;  %v1930_v54 = vpop.f32.mrf.mxu1 }
 0x108   :  { %v549_v51 = vsel %vm547_vm0, %v1928_v53, 0.0 }
 0x109   :  { %v297_v55 = vpop.f32.mrf.mxu0  ;;  %v425_v56 = vpop.f32.mrf.mxu1 }
 0x10a   :  { %v548_v56 = vsel %vm547_vm0, %v1924_v49, 0.0 }
 0x10b   :  { %v1932_v57 = vpop.f32.mrf.mxu0  ;;  %v1934_v58 = vpop.f32.mrf.mxu1 }
 0x10d   :  { %v302_v59 = vpop.f32.mrf.mxu0  ;;  %v430_v60 = vpop.f32.mrf.mxu1 }
 0x10e   :  { %v551_v59 = vsel %vm547_vm0, %v1932_v57, 0.0  ;;  %v550_v60 = vadd.f32 %v549_v51, %v548_v56 }
 0x10f   :  { %v1936_v61 = vpop.f32.mrf.mxu0  ;;  %v1938_v62 = vpop.f32.mrf.mxu1 }
 0x111   :  { %v305_v63 = vpop.f32.mrf.mxu0  ;;  %v433_v1 = vpop.f32.mrf.mxu1 }
 0x113   :  { %v1940_v2 = vpop.f32.mrf.mxu0  ;;  %v1942_v3 = vpop.f32.mrf.mxu1 }
 0x115   :  { %v310_v4 = vpop.f32.mrf.mxu0  ;;  %v438_v0 = vpop.f32.mrf.mxu1 }
 0x116   :  { %v553_v4 = vsel %vm547_vm0, %v1936_v61, 0.0  ;;  %v552_v0 = vadd.f32 %v551_v59, %v550_v60 }
 0x117   :  { %v1944_v5 = vpop.f32.mrf.mxu0  ;;  %v1946_v6 = vpop.f32.mrf.mxu1 }
 0x119   :  { %v313_v7 = vpop.f32.mrf.mxu0  ;;  %v441_v8 = vpop.f32.mrf.mxu1 }
 0x11b   :  { %v1948_v9 = vpop.f32.mrf.mxu0  ;;  %v1950_v10 = vpop.f32.mrf.mxu1 }
 0x11d   :  { %v318_v11 = vpop.f32.mrf.mxu0  ;;  %v446_v12 = vpop.f32.mrf.mxu1 }
 0x11e   :  { %v555_v11 = vsel %vm547_vm0, %v1940_v2, 0.0  ;;  %v554_v12 = vadd.f32 %v553_v4, %v552_v0 }
 0x11f   :  { %v1952_v13 = vpop.f32.mrf.mxu0  ;;  %v1954_v14 = vpop.f32.mrf.mxu1 }
 0x121   :  { %v321_v15 = vpop.f32.mrf.mxu0  ;;  %v449_v16 = vpop.f32.mrf.mxu1 }
 0x123   :  { %v1956_v17 = vpop.f32.mrf.mxu0  ;;  %v1958_v18 = vpop.f32.mrf.mxu1 }
 0x125   :  { %v326_v19 = vpop.f32.mrf.mxu0  ;;  %v454_v20 = vpop.f32.mrf.mxu1 }
 0x126   :  { %v557_v19 = vsel %vm547_vm0, %v1944_v5, 0.0  ;;  %v556_v20 = vadd.f32 %v555_v11, %v554_v12 }
 0x127   :  { %v1960_v21 = vpop.f32.mrf.mxu0  ;;  %v1962_v22 = vpop.f32.mrf.mxu1 }
 0x128   :  { %v565_v51 = vsel %vm547_vm0, %v1960_v21, 0.0 }
 0x129   :  { %v329_v23 = vpop.f32.mrf.mxu0  ;;  %v457_v24 = vpop.f32.mrf.mxu1 }
 0x12b   :  { %v1964_v25 = vpop.f32.mrf.mxu0  ;;  %v1966_v26 = vpop.f32.mrf.mxu1 }
 0x12d   :  { %v334_v27 = vpop.f32.mrf.mxu0  ;;  %v462_v28 = vpop.f32.mrf.mxu1 }
 0x12e   :  { %v559_v27 = vsel %vm547_vm0, %v1948_v9, 0.0  ;;  %v558_v28 = vadd.f32 %v557_v19, %v556_v20 }
 0x12f   :  { %v1968_v29 = vpop.f32.mrf.mxu0  ;;  %v1970_v30 = vpop.f32.mrf.mxu1 }
 0x130   :  { %v569_v11 = vsel %vm547_vm0, %v1968_v29, 0.0 }
 0x131   :  { %v337_v31 = vpop.f32.mrf.mxu0  ;;  %v465_v32 = vpop.f32.mrf.mxu1 }
 0x133   :  { %v1972_v33 = vpop.f32.mrf.mxu0  ;;  %v1974_v34 = vpop.f32.mrf.mxu1 }
 0x134   :  { %v571_v19 = vsel %vm547_vm0, %v1972_v33, 0.0 }
 0x135   :  { %v342_v35 = vpop.f32.mrf.mxu0  ;;  %v470_v36 = vpop.f32.mrf.mxu1 }
 0x136   :  { %v561_v35 = vsel %vm547_vm0, %v1952_v13, 0.0  ;;  %v560_v36 = vadd.f32 %v559_v27, %v558_v28 }
 0x137   :  { %v1976_v37 = vpop.f32.mrf.mxu0  ;;  %v1978_v38 = vpop.f32.mrf.mxu1 }
 0x139   :  { %v345_v39 = vpop.f32.mrf.mxu0  ;;  %v473_v40 = vpop.f32.mrf.mxu1 }
 0x13b   :  { %v1980_v41 = vpop.f32.mrf.mxu0  ;;  %v1982_v42 = vpop.f32.mrf.mxu1 }
 0x13d   :  { %v350_v43 = vpop.f32.mrf.mxu0  ;;  %v478_v44 = vpop.f32.mrf.mxu1 }
 0x13e   :  { %v563_v43 = vsel %vm547_vm0, %v1956_v17, 0.0  ;;  %v562_v44 = vadd.f32 %v561_v35, %v560_v36 }
 0x13f   :  { %v1984_v45 = vpop.f32.mrf.mxu0  ;;  %v1986_v46 = vpop.f32.mrf.mxu1 }
 0x140   :  { %v564_v56 = vadd.f32 %v563_v43, %v562_v44  ;;  %v575_v43 = vsel %vm547_vm0, %v1980_v41, 0.0 }
 0x141   :  { %v353_v47 = vpop.f32.mrf.mxu0  ;;  %v481_v48 = vpop.f32.mrf.mxu1 }
 0x143   :  { %v1990_v52 = vpop.f32.mrf.mxu0  ;;  %v1992_v55 = vpop.f32.mrf.mxu1 }
 0x144   :  { %3954 = vst [vmem:[#allocation2_spill] sm:$0xff] %v1990_v52 }
 0x145   :  { %v358_v63 = vpop.f32.mrf.mxu0  ;;  %v486_v1 = vpop.f32.mrf.mxu1 }
 0x146   :  { %v567_v63 = vsel %vm547_vm0, %v1964_v25, 0.0  ;;  %v566_v1 = vadd.f32 %v565_v51, %v564_v56  ;;  %v577_v51 = vsel %vm547_vm0, %v1984_v45, 0.0 }
 0x147   :  { %v2000_v7 = vpop.f32.mrf.mxu0  ;;  %v2002_v8 = vpop.f32.mrf.mxu1 }
 0x148   :  { %3955 = vst [vmem:[#allocation3_spill] sm:$0xff] %v2000_v7  ;;  %v568_v12 = vadd.f32 %v567_v63, %v566_v1 }
 0x149   :  { %v361_v15 = vpop.f32.mrf.mxu0  ;;  %v489_v16 = vpop.f32.mrf.mxu1 }
 0x14a   :  { %v570_v20 = vadd.f32 %v569_v11, %v568_v12 }
 0x14b   :  { %v2008_v23 = vpop.f32.mrf.mxu0  ;;  %v2010_v24 = vpop.f32.mrf.mxu1 }
 0x14c   :  { %3956 = vst [vmem:[#allocation4_spill] sm:$0xff] %v2008_v23 }
 0x14d   :  { %v366_v31 = vpop.f32.mrf.mxu0  ;;  %v494_v32 = vpop.f32.mrf.mxu1 }
 0x14e   :  { %v573_v31 = vsel %vm547_vm0, %v1976_v37, 0.0  ;;  %v572_v32 = vadd.f32 %v571_v19, %v570_v20  ;;  %v581_v19 = vsel %vm547_vm0, %v2000_v7, 0.0 }
 0x14f   :  { %v2016_v39 = vpop.f32.mrf.mxu0  ;;  %v2018_v40 = vpop.f32.mrf.mxu1 }
 0x150   :  { %3957 = vst [vmem:[#allocation5_spill] sm:$0xff] %v2016_v39  ;;  %v574_v44 = vadd.f32 %v573_v31, %v572_v32  ;;  %v583_v31 = vsel %vm547_vm0, %v2008_v23, 0.0 }
 0x151   :  { %v369_v47 = vpop.f32.mrf.mxu0  ;;  %v497_v48 = vpop.f32.mrf.mxu1 }
 0x152   :  { %v576_v56 = vadd.f32 %v575_v43, %v574_v44 }
 0x153   :  { %v2024_v59 = vpop.f32.mrf.mxu0  ;;  %v2026_v60 = vpop.f32.mrf.mxu1 }
 0x154   :  { %3958 = vst [vmem:[#allocation6_spill] sm:$0xff] %v2024_v59 }
 0x155   :  { %v374_v4 = vpop.f32.mrf.mxu0  ;;  %v502_v0 = vpop.f32.mrf.mxu1 }
 0x156   :  { %v579_v4 = vsel %vm547_vm0, %v1990_v52, 0.0  ;;  %v578_v0 = vadd.f32 %v577_v51, %v576_v56 }
 0x157   :  { %v2032_v15 = vpop.f32.mrf.mxu0  ;;  %v2034_v16 = vpop.f32.mrf.mxu1 }
 0x158   :  { %3959 = vst [vmem:[#allocation7_spill] sm:$0xff] %v2032_v15  ;;  %v580_v20 = vadd.f32 %v579_v4, %v578_v0  ;;  %v587_v4 = vsel %vm547_vm0, %v2024_v59, 0.0  ;;  %v589_v23 = vsel %vm547_vm0, %v2032_v15, 0.0 }
 0x159   :  { %v377_v27 = vpop.f32.mrf.mxu0  ;;  %v505_v28 = vpop.f32.mrf.mxu1 }
 0x15a   :  { %v582_v32 = vadd.f32 %v581_v19, %v580_v20 }
 0x15b   :  { %v2040_v35 = vpop.f32.mrf.mxu0  ;;  %v2042_v36 = vpop.f32.mrf.mxu1 }
 0x15c   :  { %3960 = vst [vmem:[#allocation8_spill] sm:$0xff] %v2040_v35 }
 0x15d   :  { %v382_v47 = vpop.f32.mrf.mxu0  ;;  %v510_v48 = vpop.f32.mrf.mxu1 }
 0x15e   :  { %v585_v47 = vsel %vm547_vm0, %v2016_v39, 0.0  ;;  %v584_v48 = vadd.f32 %v583_v31, %v582_v32  ;;  %v591_v31 = vsel %vm547_vm0, %v2040_v35, 0.0 }
 0x15f   :  { %v2048_v63 = vpop.f32.mrf.mxu0  ;;  %v2050_v1 = vpop.f32.mrf.mxu1 }
 0x160   :  { %3961 = vst [vmem:[#allocation9_spill] sm:$0xff] %v2048_v63  ;;  %v586_v0 = vadd.f32 %v585_v47, %v584_v48  ;;  %v593_v59 = vsel %vm547_vm0, %v2048_v63, 0.0 }
 0x161   :  { %v385_v11 = vpop.f32.mrf.mxu0  ;;  %v513_v12 = vpop.f32.mrf.mxu1 }
 0x162   :  { %v588_v19 = vadd.f32 %v587_v4, %v586_v0 }
 0x163   :  { %v2056_v27 = vpop.f32.mrf.mxu0  ;;  %v2058_v28 = vpop.f32.mrf.mxu1 }
 0x164   :  { %3962 = vst [vmem:[#allocation10_spill] sm:$0xff] %v2056_v27  ;;  %v590_v32 = vadd.f32 %v589_v23, %v588_v19  ;;  %v595_v4 = vsel %vm547_vm0, %v2056_v27, 0.0 }
 0x165   :  { %v390_v43 = vpop.f32.mrf.mxu0  ;;  %v518_v44 = vpop.f32.mrf.mxu1 }
 0x166   :  { %v592_v47 = vadd.f32 %v591_v31, %v590_v32 }
 0x167   :  { %v2064_v51 = vpop.f32.mrf.mxu0  ;;  %v2066_v56 = vpop.f32.mrf.mxu1 }
 0x168   :  { %3963 = vst [vmem:[#allocation11_spill] sm:$0xff] %v2064_v51  ;;  %v594_v0 = vadd.f32 %v593_v59, %v592_v47  ;;  %v597_v35 = vsel %vm547_vm0, %v2064_v51, 0.0 }
 0x169   :  { %v393_v11 = vpop.f32.mrf.mxu0  ;;  %v521_v12 = vpop.f32.mrf.mxu1 }
 0x16a   :  { %v596_v23 = vadd.f32 %v595_v4, %v594_v0 }
 0x16b   :  { %v2072_v20 = vpop.f32.mrf.mxu0  ;;  %v2074_v43 = vpop.f32.mrf.mxu1 }
 0x16c   :  { %3964 = vst [vmem:[#allocation12_spill] sm:$0xff] %v2072_v20  ;;  %3965 = vst [vmem:[#allocation13_spill] sm:$0xff] %v2074_v43  ;;  %v599_v31 = vsel %vm547_vm0, %v2072_v20, 0.0  ;;  %v598_v32 = vadd.f32 %v597_v35, %v596_v23 }
 0x16d   :  { %v398_v44 = vpop.f32.mrf.mxu0  ;;  %v526_v39 = vpop.f32.mrf.mxu1 }
 0x16e   :  { %v600_v59 = vadd.f32 %v599_v31, %v598_v32 }
 0x16f   :  { %v2080_v48 = vpop.f32.mrf.mxu0  ;;  %v2082_v11 = vpop.f32.mrf.mxu1 }
 0x170   :  { %3966 = vst [vmem:[#allocation14_spill] sm:$0xff] %v2080_v48  ;;  %3967 = vst [vmem:[#allocation15_spill] sm:$0xff] %v2082_v11  ;;  %v601_v27 = vsel %vm547_vm0, %v2080_v48, 0.0 }
 0x171   :  { %v401_v12 = vpop.f32.mrf.mxu0  ;;  %v529_v15 = vpop.f32.mrf.mxu1  ;;  %v602_v0 = vadd.f32 %v601_v27, %v600_v59 }
 0x173   :  { %v2088_v19 = vpop.f32.mrf.mxu0  ;;  %v2090_v39 = vpop.f32.mrf.mxu1 }
 0x174   :  { %3968 = vst [vmem:[#allocation16_spill] sm:$0xff] %v2090_v39  ;;  %v603_v4 = vsel %vm547_vm0, %v2088_v19, 0.0 }
 0x175   :  { %v406_v44 = vpop.f32.mrf.mxu0  ;;  %v534_v63 = vpop.f32.mrf.mxu1  ;;  %v604_v35 = vadd.f32 %v603_v4, %v602_v0 }
 0x177   :  { %v2096_v47 = vpop.f32.mrf.mxu0  ;;  %v2098_v15 = vpop.f32.mrf.mxu1 }
 0x178   :  { %3969 = vst [vmem:[#allocation17_spill] sm:$0xff] %v2096_v47  ;;  %v605_v20 = vsel %vm547_vm0, %v2096_v47, 0.0 }
 0x179   :  { %v409_v12 = vpop.f32.mrf.mxu0  ;;  %v537_v51 = vpop.f32.mrf.mxu1  ;;  %v606_v32 = vadd.f32 %v605_v20, %v604_v35  ;;  %v613_v20 = vsel %vm547_vm0, %v1930_v54, 0.0 }
 0x17a   :  { %v611_v12 = vsel %vm547_vm0, %v1926_v50, 0.0 }
 0x17b   :  { %v2104_v23 = vpop.f32.mrf.mxu0  ;;  %v2106_v63 = vpop.f32.mrf.mxu1 }
 0x17c   :  { %v607_v31 = vsel %vm547_vm0, %v2104_v23, 0.0 }
 0x17d   :  { %v414_v44 = vpop.f32.mrf.mxu0  ;;  %v542_v48 = vpop.f32.mrf.mxu1  ;;  %v608_v7 = vadd.f32 %v607_v31, %v606_v32  ;;  %v617_v32 = vsel %vm547_vm0, %v1938_v62, 0.0 }
 0x17e   :  { %v615_v48 = vsel %vm547_vm0, %v1934_v58, 0.0 }
 0x17f   :  { %v2110_v52 = vpop.f32.mrf.mxu0  ;;  %v2112_v27 = vpop.f32.mrf.mxu1 }
 0x180   :  { %v609_v51 = vsel %vm547_vm0, %v2110_v52, 0.0 }
 0x181   :  { %v610_v59 = vadd.f32 %v609_v51, %v608_v7  ;;  %v417_v4 = vpop.f32.mrf.mxu0  ;;  %v545_v0 = vpop.f32.mrf.mxu1  ;;  %v619_v7 = vsel %vm547_vm0, %v1942_v3, 0.0 }
 0x182   :  { %v621_v4 = vsel %vm547_vm0, %v1946_v6, 0.0  ;;  %v623_v0 = vsel %vm547_vm0, %v1950_v10, 0.0 }
 0x183   :  { %v612_v47 = vadd.f32 %v611_v12, %v610_v59  ;;  %v625_v12 = vsel %vm547_vm0, %v1954_v14, 0.0 }
 0x185   :  { %v614_v35 = vadd.f32 %v613_v20, %v612_v47 }
 0x187   :  { %v616_v31 = vadd.f32 %v615_v48, %v614_v35  ;;  %v627_v35 = vsel %vm547_vm0, %v1958_v18, 0.0 }
 0x189   :  { %v618_v44 = vadd.f32 %v617_v32, %v616_v31  ;;  %v629_v31 = vsel %vm547_vm0, %v1962_v22, 0.0 }
 0x18b   :  { %v620_v51 = vadd.f32 %v619_v7, %v618_v44  ;;  %v631_v44 = vsel %vm547_vm0, %v1966_v26, 0.0 }
 0x18d   :  { %v622_v59 = vadd.f32 %v621_v4, %v620_v51  ;;  %v633_v51 = vsel %vm547_vm0, %v1970_v30, 0.0 }
 0x18f   :  { %v624_v47 = vadd.f32 %v623_v0, %v622_v59  ;;  %v635_v59 = vsel %vm547_vm0, %v1974_v34, 0.0 }
 0x191   :  { %v626_v20 = vadd.f32 %v625_v12, %v624_v47  ;;  %v637_v47 = vsel %vm547_vm0, %v1978_v38, 0.0 }
 0x193   :  { %v628_v48 = vadd.f32 %v627_v35, %v626_v20  ;;  %v639_v20 = vsel %vm547_vm0, %v1982_v42, 0.0 }
 0x195   :  { %v630_v32 = vadd.f32 %v629_v31, %v628_v48  ;;  %v641_v48 = vsel %vm547_vm0, %v1986_v46, 0.0 }
 0x197   :  { %v632_v7 = vadd.f32 %v631_v44, %v630_v32  ;;  %v643_v32 = vsel %vm547_vm0, %v1992_v55, 0.0 }
 0x199   :  { %v634_v4 = vadd.f32 %v633_v51, %v632_v7  ;;  %v645_v7 = vsel %vm547_vm0, %v2002_v8, 0.0 }
 0x19b   :  { %v636_v0 = vadd.f32 %v635_v59, %v634_v4  ;;  %v647_v4 = vsel %vm547_vm0, %v2010_v24, 0.0 }
 0x19d   :  { %v638_v12 = vadd.f32 %v637_v47, %v636_v0  ;;  %v649_v0 = vsel %vm547_vm0, %v2018_v40, 0.0 }
 0x19f   :  { %v640_v35 = vadd.f32 %v639_v20, %v638_v12  ;;  %v651_v12 = vsel %vm547_vm0, %v2026_v60, 0.0 }
 0x1a1   :  { %v642_v31 = vadd.f32 %v641_v48, %v640_v35  ;;  %v653_v35 = vsel %vm547_vm0, %v2034_v16, 0.0 }
 0x1a3   :  { %v644_v44 = vadd.f32 %v643_v32, %v642_v31  ;;  %v655_v31 = vsel %vm547_vm0, %v2042_v36, 0.0 }
 0x1a5   :  { %v646_v51 = vadd.f32 %v645_v7, %v644_v44  ;;  %v657_v44 = vsel %vm547_vm0, %v2050_v1, 0.0 }
 0x1a7   :  { %v648_v59 = vadd.f32 %v647_v4, %v646_v51  ;;  %v659_v51 = vsel %vm547_vm0, %v2058_v28, 0.0 }
 0x1a9   :  { %v650_v47 = vadd.f32 %v649_v0, %v648_v59  ;;  %v661_v59 = vsel %vm547_vm0, %v2066_v56, 0.0 }
 0x1ab   :  { %v652_v20 = vadd.f32 %v651_v12, %v650_v47  ;;  %v663_v47 = vsel %vm547_vm0, %v2074_v43, 0.0 }
 0x1ad   :  { %v654_v48 = vadd.f32 %v653_v35, %v652_v20  ;;  %v665_v20 = vsel %vm547_vm0, %v2082_v11, 0.0 }
 0x1af   :  { %v656_v32 = vadd.f32 %v655_v31, %v654_v48  ;;  %v667_v48 = vsel %vm547_vm0, %v2090_v39, 0.0 }
 0x1b1   :  { %v658_v7 = vadd.f32 %v657_v44, %v656_v32  ;;  %v669_v32 = vsel %vm547_vm0, %v2098_v15, 0.0 }
 0x1b3   :  { %v660_v4 = vadd.f32 %v659_v51, %v658_v7  ;;  %v671_v7 = vsel %vm547_vm0, %v2106_v63, 0.0 }
 0x1b5   :  { %v662_v0 = vadd.f32 %v661_v59, %v660_v4  ;;  %v673_v4 = vsel %vm547_vm0, %v2112_v27, 0.0 }
 0x1b7   :  { %v664_v12 = vadd.f32 %v663_v47, %v662_v0 }
 0x1b9   :  { %v666_v35 = vadd.f32 %v665_v20, %v664_v12 }
 0x1bb   :  { %v668_v31 = vadd.f32 %v667_v48, %v666_v35 }
 0x1bd   :  { %v670_v44 = vadd.f32 %v669_v32, %v668_v31 }
 0x1bf   :  { %v672_v51 = vadd.f32 %v671_v7, %v670_v44 }
 0x1c1   :  { %v674_v59 = vadd.f32 %v673_v4, %v672_v51 }
 0x1c3   :  { %v675_v0 = vrot.slane %v674_v59, 4 }
 0x1c5   :  { %v676_v47 = vadd.f32 %v675_v0, %v674_v59 }
 0x1c7   :  { %v677_v11 = vrot.slane %v676_v47, 2 }
 0x1c9   :  { %v678_v12 = vadd.f32 %v677_v11, %v676_v47 }
 0x1cb   :  { %v679_v20 = vrot.slane %v678_v12, 1 }
 0x1cd   :  { %v680_v43 = vadd.f32 %v679_v20, %v678_v12 }
 0x1cf   :  { %v2180_v39 = vmul.f32 0.001953125, %v680_v43 }
 0x1d1   :  { %v2184_v35 = vsub.f32 %v1924_v49, %v2180_v39  ;;  %v2188_v48 = vsub.f32 %v1928_v53, %v2180_v39  ;;  %v2192_v31 = vsub.f32 %v1932_v57, %v2180_v39  ;;  %v2196_v32 = vsub.f32 %v1936_v61, %v2180_v39 }
 0x1d2   :  { %v2204_v49 = vsub.f32 %v1940_v2, %v2180_v39  ;;  %v2210_v57 = vsub.f32 %v1944_v5, %v2180_v39  ;;  %v2218_v4 = vsub.f32 %v1948_v9, %v2180_v39  ;;  %v2225_v5 = vsub.f32 %v1952_v13, %v2180_v39 }
 0x1d3   :  { %v747_v43 = vmul.f32 %v2184_v35, %v2184_v35  ;;  %v748_v11 = vmul.f32 %v2188_v48, %v2188_v48  ;;  %v749_v53 = vmul.f32 %v2192_v31, %v2192_v31  ;;  %v750_v61 = vmul.f32 %v2196_v32, %v2196_v32 }
 0x1d4   :  { %v751_v2 = vmul.f32 %v2204_v49, %v2204_v49  ;;  %v752_v47 = vmul.f32 %v2210_v57, %v2210_v57  ;;  %v2232_v9 = vsub.f32 %v1956_v17, %v2180_v39  ;;  %v2239_v13 = vsub.f32 %v1960_v21, %v2180_v39 }
 0x1d5   :  { %v811_v44 = vsel %vm547_vm0, %v747_v43, 0.0  ;;  %v812_v7 = vsel %vm547_vm0, %v748_v11, 0.0  ;;  %v814_v59 = vsel %vm547_vm0, %v749_v53, 0.0  ;;  %v816_v12 = vsel %vm547_vm0, %v750_v61, 0.0 }
 0x1d6   :  { %v813_v51 = vadd.f32 %v812_v7, %v811_v44  ;;  %v753_v43 = vmul.f32 %v2218_v4, %v2218_v4  ;;  %v818_v11 = vsel %vm547_vm0, %v751_v2, 0.0  ;;  %v754_v44 = vmul.f32 %v2225_v5, %v2225_v5 }
 0x1d7   :  { %v820_v61 = vsel %vm547_vm0, %v752_v47, 0.0  ;;  %v2246_v17 = vsub.f32 %v1964_v25, %v2180_v39  ;;  %v2253_v21 = vsub.f32 %v1968_v29, %v2180_v39  ;;  %v2260_v25 = vsub.f32 %v1972_v33, %v2180_v39 }
 0x1d8   :  { %v815_v0 = vadd.f32 %v814_v59, %v813_v51  ;;  %v755_v51 = vmul.f32 %v2232_v9, %v2232_v9  ;;  %v822_v2 = vsel %vm547_vm0, %v753_v43, 0.0  ;;  %v824_v47 = vsel %vm547_vm0, %v754_v44, 0.0 }
 0x1d9   :  { %v2267_v29 = vsub.f32 %v1976_v37, %v2180_v39  ;;  %v2274_v33 = vsub.f32 %v1980_v41, %v2180_v39  ;;  %v2281_v37 = vsub.f32 %v1984_v45, %v2180_v39 }
 0x1da   :  { %v817_v20 = vadd.f32 %v816_v12, %v815_v0  ;;  %v756_v0 = vmul.f32 %v2239_v13, %v2239_v13  ;;  %v826_v43 = vsel %vm547_vm0, %v755_v51, 0.0 }
 0x1db   :  { %3970 = vst [vmem:[#allocation18_spill] sm:$0xff] %v2281_v37 }
 0x1dc   :  { %v819_v53 = vadd.f32 %v818_v11, %v817_v20  ;;  %v757_v20 = vmul.f32 %v2246_v17, %v2246_v17  ;;  %v828_v44 = vsel %vm547_vm0, %v756_v0, 0.0 }
 0x1de   :  { %v821_v7 = vadd.f32 %v820_v61, %v819_v53  ;;  %v758_v53 = vmul.f32 %v2253_v21, %v2253_v21  ;;  %v830_v51 = vsel %vm547_vm0, %v757_v20, 0.0 }
 0x1e0   :  { %v823_v59 = vadd.f32 %v822_v2, %v821_v7  ;;  %v759_v7 = vmul.f32 %v2260_v25, %v2260_v25  ;;  %v832_v0 = vsel %vm547_vm0, %v758_v53, 0.0 }
 0x1e2   :  { %v825_v12 = vadd.f32 %v824_v47, %v823_v59  ;;  %v760_v59 = vmul.f32 %v2267_v29, %v2267_v29  ;;  %v834_v20 = vsel %vm547_vm0, %v759_v7, 0.0 }
 0x1e4   :  { %v827_v11 = vadd.f32 %v826_v43, %v825_v12  ;;  %v3971_v12 = vld [vmem:[#allocation2_spill] sm:$0xff]  ;;  %v761_v43 = vmul.f32 %v2274_v33, %v2274_v33  ;;  %v836_v53 = vsel %vm547_vm0, %v760_v59, 0.0 }
 0x1e5   :  { %v2288_v41 = vsub.f32 %v3971_v12, %v2180_v39 }
 0x1e6   :  { %v829_v61 = vadd.f32 %v828_v44, %v827_v11  ;;  %v3973_v44 = vld [vmem:[#allocation3_spill] sm:$0xff]  ;;  %v838_v7 = vsel %vm547_vm0, %v761_v43, 0.0 }
 0x1e7   :  { %3972 = vst [vmem:[#allocation2_spill] sm:$0xff] %v2288_v41  ;;  %v2295_v45 = vsub.f32 %v3973_v44, %v2180_v39  ;;  %v763_v12 = vmul.f32 %v2288_v41, %v2288_v41 }
 0x1e8   :  { %v831_v2 = vadd.f32 %v830_v51, %v829_v61  ;;  %v762_v61 = vmul.f32 %v2281_v37, %v2281_v37 }
 0x1e9   :  { %3974 = vst [vmem:[#allocation3_spill] sm:$0xff] %v2295_v45  ;;  %v764_v37 = vmul.f32 %v2295_v45, %v2295_v45  ;;  %v842_v43 = vsel %vm547_vm0, %v763_v12, 0.0 }
 0x1ea   :  { %v833_v47 = vadd.f32 %v832_v0, %v831_v2  ;;  %v3975_v2 = vld [vmem:[#allocation4_spill] sm:$0xff]  ;;  %v840_v59 = vsel %vm547_vm0, %v762_v61, 0.0 }
 0x1eb   :  { %v2302_v0 = vsub.f32 %v3975_v2, %v2180_v39  ;;  %v844_v61 = vsel %vm547_vm0, %v764_v37, 0.0 }
 0x1ec   :  { %v835_v11 = vadd.f32 %v834_v20, %v833_v47  ;;  %v3977_v20 = vld [vmem:[#allocation5_spill] sm:$0xff] }
 0x1ed   :  { %3976 = vst [vmem:[#allocation4_spill] sm:$0xff] %v2302_v0  ;;  %v2309_v44 = vsub.f32 %v3977_v20, %v2180_v39  ;;  %v765_v41 = vmul.f32 %v2302_v0, %v2302_v0 }
 0x1ee   :  { %v837_v51 = vadd.f32 %v836_v53, %v835_v11  ;;  %v3979_v53 = vld [vmem:[#allocation6_spill] sm:$0xff] }
 0x1ef   :  { %3978 = vst [vmem:[#allocation5_spill] sm:$0xff] %v2309_v44  ;;  %v2316_v2 = vsub.f32 %v3979_v53, %v2180_v39  ;;  %v766_v45 = vmul.f32 %v2309_v44, %v2309_v44  ;;  %v846_v12 = vsel %vm547_vm0, %v765_v41, 0.0 }
 0x1f0   :  { %v839_v47 = vadd.f32 %v838_v7, %v837_v51  ;;  %v3981_v7 = vld [vmem:[#allocation7_spill] sm:$0xff] }
 0x1f1   :  { %3980 = vst [vmem:[#allocation6_spill] sm:$0xff] %v2316_v2  ;;  %v2323_v20 = vsub.f32 %v3981_v7, %v2180_v39  ;;  %v767_v0 = vmul.f32 %v2316_v2, %v2316_v2  ;;  %v848_v37 = vsel %vm547_vm0, %v766_v45, 0.0 }
 0x1f2   :  { %v841_v11 = vadd.f32 %v840_v59, %v839_v47  ;;  %v3983_v59 = vld [vmem:[#allocation8_spill] sm:$0xff] }
 0x1f3   :  { %3982 = vst [vmem:[#allocation7_spill] sm:$0xff] %v2323_v20  ;;  %v2330_v53 = vsub.f32 %v3983_v59, %v2180_v39  ;;  %v768_v44 = vmul.f32 %v2323_v20, %v2323_v20  ;;  %v850_v41 = vsel %vm547_vm0, %v767_v0, 0.0 }
 0x1f4   :  { %v843_v51 = vadd.f32 %v842_v43, %v841_v11  ;;  %v3985_v43 = vld [vmem:[#allocation9_spill] sm:$0xff] }
 0x1f5   :  { %3984 = vst [vmem:[#allocation8_spill] sm:$0xff] %v2330_v53  ;;  %v2337_v7 = vsub.f32 %v3985_v43, %v2180_v39  ;;  %v769_v2 = vmul.f32 %v2330_v53, %v2330_v53  ;;  %v852_v45 = vsel %vm547_vm0, %v768_v44, 0.0 }
 0x1f6   :  { %v845_v47 = vadd.f32 %v844_v61, %v843_v51  ;;  %v3987_v61 = vld [vmem:[#allocation10_spill] sm:$0xff] }
 0x1f7   :  { %3986 = vst [vmem:[#allocation9_spill] sm:$0xff] %v2337_v7  ;;  %v2344_v59 = vsub.f32 %v3987_v61, %v2180_v39  ;;  %v770_v20 = vmul.f32 %v2337_v7, %v2337_v7  ;;  %v854_v0 = vsel %vm547_vm0, %v769_v2, 0.0 }
 0x1f8   :  { %v847_v11 = vadd.f32 %v846_v12, %v845_v47  ;;  %v3988_v12 = vld [vmem:[#allocation11_spill] sm:$0xff] }
 0x1f9   :  { %v2351_v43 = vsub.f32 %v3988_v12, %v2180_v39  ;;  %v771_v53 = vmul.f32 %v2344_v59, %v2344_v59  ;;  %v856_v44 = vsel %vm547_vm0, %v770_v20, 0.0 }
 0x1fa   :  { %v849_v51 = vadd.f32 %v848_v37, %v847_v11  ;;  %v3990_v37 = vld [vmem:[#allocation12_spill] sm:$0xff] }
 0x1fb   :  { %3989 = vst [vmem:[#allocation10_spill] sm:$0xff] %v2351_v43  ;;  %v2358_v61 = vsub.f32 %v3990_v37, %v2180_v39  ;;  %v772_v7 = vmul.f32 %v2351_v43, %v2351_v43  ;;  %v858_v2 = vsel %vm547_vm0, %v771_v53, 0.0 }
 0x1fc   :  { %v851_v47 = vadd.f32 %v850_v41, %v849_v51  ;;  %v3991_v41 = vld [vmem:[#allocation14_spill] sm:$0xff] }
 0x1fd   :  { %v2365_v12 = vsub.f32 %v3991_v41, %v2180_v39  ;;  %v773_v37 = vmul.f32 %v2358_v61, %v2358_v61  ;;  %v860_v20 = vsel %vm547_vm0, %v772_v7, 0.0 }
 0x1fe   :  { %v853_v11 = vadd.f32 %v852_v45, %v851_v47  ;;  %v2372_v45 = vsub.f32 %v2088_v19, %v2180_v39  ;;  %v2386_v19 = vsub.f32 %v2104_v23, %v2180_v39  ;;  %v2400_v23 = vsub.f32 %v1926_v50, %v2180_v39 }
 0x1ff   :  { %v774_v43 = vmul.f32 %v2365_v12, %v2365_v12  ;;  %v862_v53 = vsel %vm547_vm0, %v773_v37, 0.0  ;;  %v2414_v50 = vsub.f32 %v1934_v58, %v2180_v39  ;;  %v2428_v58 = vsub.f32 %v1942_v3, %v2180_v39 }
 0x200   :  { %v855_v51 = vadd.f32 %v854_v0, %v853_v11  ;;  %v3992_v0 = vld [vmem:[#allocation17_spill] sm:$0xff]  ;;  %v2442_v3 = vsub.f32 %v1950_v10, %v2180_v39  ;;  %v2456_v10 = vsub.f32 %v1958_v18, %v2180_v39  ;;  %v2470_v18 = vsub.f32 %v1966_v26, %v2180_v39 }
 0x201   :  { %v2379_v41 = vsub.f32 %v3992_v0, %v2180_v39  ;;  %v864_v7 = vsel %vm547_vm0, %v774_v43, 0.0  ;;  %v2484_v26 = vsub.f32 %v1974_v34, %v2180_v39  ;;  %v2498_v34 = vsub.f32 %v1982_v42, %v2180_v39 }
 0x202   :  { %v857_v47 = vadd.f32 %v856_v44, %v855_v51  ;;  %v775_v44 = vmul.f32 %v2372_v45, %v2372_v45  ;;  %v2512_v42 = vsub.f32 %v1992_v55, %v2180_v39  ;;  %v2526_v55 = vsub.f32 %v2010_v24, %v2180_v39 }
 0x203   :  { %v776_v0 = vmul.f32 %v2379_v41, %v2379_v41  ;;  %v2540_v24 = vsub.f32 %v2026_v60, %v2180_v39  ;;  %v2554_v60 = vsub.f32 %v2042_v36, %v2180_v39  ;;  %v2568_v36 = vsub.f32 %v2058_v28, %v2180_v39 }
 0x204   :  { %v859_v11 = vadd.f32 %v858_v2, %v857_v47  ;;  %v2393_v2 = vsub.f32 %v2110_v52, %v2180_v39  ;;  %v866_v37 = vsel %vm547_vm0, %v775_v44, 0.0  ;;  %v2407_v52 = vsub.f32 %v1930_v54, %v2180_v39 }
 0x205   :  { %v868_v43 = vsel %vm547_vm0, %v776_v0, 0.0  ;;  %v2421_v54 = vsub.f32 %v1938_v62, %v2180_v39  ;;  %v2435_v62 = vsub.f32 %v1946_v6, %v2180_v39  ;;  %v2449_v6 = vsub.f32 %v1954_v14, %v2180_v39  ;;  %3994 = vst [vmem:[#allocation12_spill] sm:$0xff] %v2554_v60  ;;  %3996 = vst [vmem:[#allocation17_spill] sm:$0xff] %v2568_v36 }
 0x206   :  { %v861_v51 = vadd.f32 %v860_v20, %v859_v11  ;;  %v777_v20 = vmul.f32 %v2386_v19, %v2386_v19  ;;  %v2463_v14 = vsub.f32 %v1962_v22, %v2180_v39  ;;  %v2477_v22 = vsub.f32 %v1970_v30, %v2180_v39 }
 0x207   :  { %v2491_v30 = vsub.f32 %v1978_v38, %v2180_v39  ;;  %v2505_v38 = vsub.f32 %v1986_v46, %v2180_v39  ;;  %v2519_v46 = vsub.f32 %v2002_v8, %v2180_v39  ;;  %v2533_v8 = vsub.f32 %v2018_v40, %v2180_v39 }
 0x208   :  { %v863_v47 = vadd.f32 %v862_v53, %v861_v51  ;;  %v778_v53 = vmul.f32 %v2393_v2, %v2393_v2  ;;  %v870_v44 = vsel %vm547_vm0, %v777_v20, 0.0  ;;  %v2547_v40 = vsub.f32 %v2034_v16, %v2180_v39 }
 0x209   :  { %v2561_v16 = vsub.f32 %v2050_v1, %v2180_v39  ;;  %v2575_v1 = vsub.f32 %v2066_v56, %v2180_v39 }
 0x20a   :  { %v865_v11 = vadd.f32 %v864_v7, %v863_v47  ;;  %v779_v7 = vmul.f32 %v2400_v23, %v2400_v23  ;;  %v872_v0 = vsel %vm547_vm0, %v778_v53, 0.0  ;;  %3993 = vst [vmem:[#allocation11_spill] sm:$0xff] %v2547_v40 }
 0x20b   :  { %3995 = vst [vmem:[#allocation14_spill] sm:$0xff] %v2561_v16  ;;  %3997 = vst [vmem:[#allocation19_spill] sm:$0xff] %v2575_v1 }
 0x20c   :  { %v867_v51 = vadd.f32 %v866_v37, %v865_v11  ;;  %v780_v37 = vmul.f32 %v2407_v52, %v2407_v52  ;;  %v874_v20 = vsel %vm547_vm0, %v779_v7, 0.0 }
 0x20e   :  { %v869_v47 = vadd.f32 %v868_v43, %v867_v51  ;;  %v781_v43 = vmul.f32 %v2414_v50, %v2414_v50  ;;  %v876_v53 = vsel %vm547_vm0, %v780_v37, 0.0 }
 0x210   :  { %v871_v11 = vadd.f32 %v870_v44, %v869_v47  ;;  %v782_v44 = vmul.f32 %v2421_v54, %v2421_v54  ;;  %v878_v7 = vsel %vm547_vm0, %v781_v43, 0.0 }
 0x212   :  { %v873_v51 = vadd.f32 %v872_v0, %v871_v11  ;;  %v783_v0 = vmul.f32 %v2428_v58, %v2428_v58  ;;  %v880_v37 = vsel %vm547_vm0, %v782_v44, 0.0 }
 0x214   :  { %v875_v47 = vadd.f32 %v874_v20, %v873_v51  ;;  %v784_v20 = vmul.f32 %v2435_v62, %v2435_v62  ;;  %v882_v43 = vsel %vm547_vm0, %v783_v0, 0.0 }
 0x216   :  { %v877_v11 = vadd.f32 %v876_v53, %v875_v47  ;;  %v785_v53 = vmul.f32 %v2442_v3, %v2442_v3  ;;  %v884_v44 = vsel %vm547_vm0, %v784_v20, 0.0 }
 0x218   :  { %v879_v51 = vadd.f32 %v878_v7, %v877_v11  ;;  %v786_v7 = vmul.f32 %v2449_v6, %v2449_v6  ;;  %v886_v0 = vsel %vm547_vm0, %v785_v53, 0.0 }
 0x21a   :  { %v881_v47 = vadd.f32 %v880_v37, %v879_v51  ;;  %v787_v37 = vmul.f32 %v2456_v10, %v2456_v10  ;;  %v888_v20 = vsel %vm547_vm0, %v786_v7, 0.0 }
 0x21c   :  { %v883_v11 = vadd.f32 %v882_v43, %v881_v47  ;;  %v788_v43 = vmul.f32 %v2463_v14, %v2463_v14  ;;  %v890_v53 = vsel %vm547_vm0, %v787_v37, 0.0 }
 0x21e   :  { %v885_v51 = vadd.f32 %v884_v44, %v883_v11  ;;  %v789_v44 = vmul.f32 %v2470_v18, %v2470_v18  ;;  %v892_v7 = vsel %vm547_vm0, %v788_v43, 0.0 }
 0x220   :  { %v887_v47 = vadd.f32 %v886_v0, %v885_v51  ;;  %v790_v0 = vmul.f32 %v2477_v22, %v2477_v22  ;;  %v894_v37 = vsel %vm547_vm0, %v789_v44, 0.0 }
 0x222   :  { %v889_v11 = vadd.f32 %v888_v20, %v887_v47  ;;  %v791_v20 = vmul.f32 %v2484_v26, %v2484_v26  ;;  %v896_v43 = vsel %vm547_vm0, %v790_v0, 0.0 }
 0x224   :  { %v891_v51 = vadd.f32 %v890_v53, %v889_v11  ;;  %v792_v53 = vmul.f32 %v2491_v30, %v2491_v30  ;;  %v898_v44 = vsel %vm547_vm0, %v791_v20, 0.0 }
 0x226   :  { %v893_v47 = vadd.f32 %v892_v7, %v891_v51  ;;  %v793_v7 = vmul.f32 %v2498_v34, %v2498_v34  ;;  %v900_v0 = vsel %vm547_vm0, %v792_v53, 0.0 }
 0x228   :  { %v895_v11 = vadd.f32 %v894_v37, %v893_v47  ;;  %v794_v37 = vmul.f32 %v2505_v38, %v2505_v38  ;;  %v902_v20 = vsel %vm547_vm0, %v793_v7, 0.0 }
 0x22a   :  { %v897_v51 = vadd.f32 %v896_v43, %v895_v11  ;;  %v795_v43 = vmul.f32 %v2512_v42, %v2512_v42  ;;  %v904_v53 = vsel %vm547_vm0, %v794_v37, 0.0 }
 0x22c   :  { %v899_v47 = vadd.f32 %v898_v44, %v897_v51  ;;  %v796_v44 = vmul.f32 %v2519_v46, %v2519_v46  ;;  %v906_v7 = vsel %vm547_vm0, %v795_v43, 0.0 }
 0x22e   :  { %v901_v11 = vadd.f32 %v900_v0, %v899_v47  ;;  %v797_v0 = vmul.f32 %v2526_v55, %v2526_v55  ;;  %v908_v37 = vsel %vm547_vm0, %v796_v44, 0.0 }
 0x230   :  { %v903_v51 = vadd.f32 %v902_v20, %v901_v11  ;;  %v798_v20 = vmul.f32 %v2533_v8, %v2533_v8  ;;  %v910_v43 = vsel %vm547_vm0, %v797_v0, 0.0 }
 0x232   :  { %v905_v47 = vadd.f32 %v904_v53, %v903_v51  ;;  %v799_v53 = vmul.f32 %v2540_v24, %v2540_v24  ;;  %v912_v44 = vsel %vm547_vm0, %v798_v20, 0.0 }
 0x234   :  { %v907_v11 = vadd.f32 %v906_v7, %v905_v47  ;;  %v800_v7 = vmul.f32 %v2547_v40, %v2547_v40  ;;  %v914_v0 = vsel %vm547_vm0, %v799_v53, 0.0 }
 0x236   :  { %v909_v51 = vadd.f32 %v908_v37, %v907_v11  ;;  %v801_v37 = vmul.f32 %v2554_v60, %v2554_v60  ;;  %v916_v20 = vsel %vm547_vm0, %v800_v7, 0.0  ;;  %v803_v60 = vmul.f32 %v2568_v36, %v2568_v36 }
 0x238   :  { %v911_v47 = vadd.f32 %v910_v43, %v909_v51  ;;  %v802_v43 = vmul.f32 %v2561_v16, %v2561_v16  ;;  %v918_v53 = vsel %vm547_vm0, %v801_v37, 0.0  ;;  %v804_v16 = vmul.f32 %v2575_v1, %v2575_v1 }
 0x239   :  { %v922_v37 = vsel %vm547_vm0, %v803_v60, 0.0 }
 0x23a   :  { %v913_v11 = vadd.f32 %v912_v44, %v911_v47  ;;  %v3998_v44 = vld [vmem:[#allocation13_spill] sm:$0xff]  ;;  %v920_v7 = vsel %vm547_vm0, %v802_v43, 0.0  ;;  %v924_v43 = vsel %vm547_vm0, %v804_v16, 0.0 }
 0x23b   :  { %v2582_v28 = vsub.f32 %v3998_v44, %v2180_v39 }
 0x23c   :  { %v915_v51 = vadd.f32 %v914_v0, %v913_v11  ;;  %v4000_v0 = vld [vmem:[#allocation15_spill] sm:$0xff] }
 0x23d   :  { %3999 = vst [vmem:[#allocation13_spill] sm:$0xff] %v2582_v28  ;;  %v2589_v56 = vsub.f32 %v4000_v0, %v2180_v39  ;;  %v805_v36 = vmul.f32 %v2582_v28, %v2582_v28 }
 0x23e   :  { %v917_v47 = vadd.f32 %v916_v20, %v915_v51  ;;  %v4002_v20 = vld [vmem:[#allocation16_spill] sm:$0xff] }
 0x23f   :  { %4001 = vst [vmem:[#allocation15_spill] sm:$0xff] %v2589_v56  ;;  %v2596_v44 = vsub.f32 %v4002_v20, %v2180_v39  ;;  %v806_v0 = vmul.f32 %v2589_v56, %v2589_v56  ;;  %v926_v60 = vsel %vm547_vm0, %v805_v36, 0.0 }
 0x240   :  { %v919_v11 = vadd.f32 %v918_v53, %v917_v47  ;;  %v2603_v53 = vsub.f32 %v2098_v15, %v2180_v39  ;;  %v2617_v15 = vsub.f32 %v2112_v27, %v2180_v39 }
 0x241   :  { %4003 = vst [vmem:[#allocation16_spill] sm:$0xff] %v2596_v44  ;;  %v807_v20 = vmul.f32 %v2596_v44, %v2596_v44  ;;  %v928_v16 = vsel %vm547_vm0, %v806_v0, 0.0 }
 0x242   :  { %v921_v51 = vadd.f32 %v920_v7, %v919_v11  ;;  %4004 = vst [vmem:[#allocation20_spill] sm:$0xff] %v2603_v53  ;;  %v2610_v7 = vsub.f32 %v2106_v63, %v2180_v39  ;;  %4006 = vst [vmem:[#allocation22_spill] sm:$0xff] %v2617_v15  ;;  %v810_v36 = vmul.f32 %v2617_v15, %v2617_v15 }
 0x244   :  { %v923_v47 = vadd.f32 %v922_v37, %v921_v51  ;;  %4005 = vst [vmem:[#allocation21_spill] sm:$0xff] %v2610_v7  ;;  %v808_v37 = vmul.f32 %v2603_v53, %v2603_v53  ;;  %v809_v63 = vmul.f32 %v2610_v7, %v2610_v7  ;;  %v936_v53 = vsel %vm547_vm0, %v810_v36, 0.0 }
 0x246   :  { %v925_v11 = vadd.f32 %v924_v43, %v923_v47  ;;  %v930_v43 = vsel %vm547_vm0, %v807_v20, 0.0  ;;  %v934_v39 = vsel %vm547_vm0, %v809_v63, 0.0 }
 0x248   :  { %v927_v51 = vadd.f32 %v926_v60, %v925_v11  ;;  %v932_v11 = vsel %vm547_vm0, %v808_v37, 0.0 }
 0x24a   :  { %v929_v47 = vadd.f32 %v928_v16, %v927_v51 }
 0x24c   :  { %v931_v56 = vadd.f32 %v930_v43, %v929_v47  ;;  %v950_v43 = vlaneseq }
 0x24e   :  { %v933_v60 = vadd.f32 %v932_v11, %v931_v56  ;;  %v951_v15 = vshrl.u32 %v950_v43, 7  ;;  %v945_v56 = vld [vmem:[%s3892_s2] sm:$0x1]  ;;  %v4009_v11 = vld [vmem:[#allocation3_spill] sm:$0xff]  ;;  %v4015_v43 = vld [vmem:[#allocation9_spill] sm:$0xff] }
 0x250   :  { %v935_v27 = vadd.f32 %v934_v39, %v933_v60  ;;  %v952_v63 = vsub.s32 0, %v951_v15  ;;  %v4008_v15 = vld [vmem:[#allocation2_spill] sm:$0xff]  ;;  %v4010_v60 = vld [vmem:[#allocation4_spill] sm:$0xff]  ;;  %v4011_v39 = vld [vmem:[#allocation5_spill] sm:$0xff] }
 0x252   :  { %v937_v44 = vadd.f32 %v936_v53, %v935_v27  ;;  %v4012_v27 = vld [vmem:[#allocation6_spill] sm:$0xff] }
 0x254   :  { %v938_v0 = vrot.slane %v937_v44, 4 }
 0x256   :  { %v939_v51 = vadd.f32 %v938_v0, %v937_v44 }
 0x258   :  { %v940_v16 = vrot.slane %v939_v51, 2 }
 0x25a   :  { %v941_v28 = vadd.f32 %v940_v16, %v939_v51  ;;  %v4013_v51 = vld [vmem:[#allocation7_spill] sm:$0xff] }
 0x25c   :  { %v942_v7 = vrot.slane %v941_v28, 1 }
 0x25e   :  { %v943_v1 = vadd.f32 %v942_v7, %v941_v28  ;;  %v4007_v7 = vld [vmem:[#allocation18_spill] sm:$0xff] }
 0x260   :  { %v944_v20 = vmul.f32 0.001953125, %v943_v1 }
 0x262   :  { %v946_v47 = vadd.f32 1e-05, %v944_v20  ;;  %v4014_v20 = vld [vmem:[#allocation8_spill] sm:$0xff] }
 0x264   :  { %1384 = vrsqrt.f32 %v946_v47 }
 0x271   :  { %v1385_v40 = vpop.eup %1384 }
 0x272   :  { %v948_v37 = vmul.f32 %v1385_v40, %v945_v56 }
 0x274   :  { %v2633_v36 = vrot.slane %v948_v37, %v952_v63  ;;  %v4016_v63 = vld [vmem:[#allocation10_spill] sm:$0xff] }
 0x276   :  { %v2637_v44 = vmul.f32 %v2633_v36, %v2184_v35  ;;  %v2641_v1 = vmul.f32 %v2633_v36, %v2188_v48  ;;  %v2645_v28 = vmul.f32 %v2633_v36, %v2192_v31  ;;  %v2649_v53 = vmul.f32 %v2633_v36, %v2196_v32 }
 0x277   :  { %v2653_v40 = vmul.f32 %v2633_v36, %v2204_v49  ;;  %v2657_v35 = vmul.f32 %v2633_v36, %v2210_v57  ;;  %v2661_v48 = vmul.f32 %v2633_v36, %v2218_v4  ;;  %v2665_v31 = vmul.f32 %v2633_v36, %v2225_v5 }
 0x278   :  { %v2669_v32 = vmul.f32 %v2633_v36, %v2232_v9  ;;  %v2673_v49 = vmul.f32 %v2633_v36, %v2239_v13  ;;  %v2677_v57 = vmul.f32 %v2633_v36, %v2246_v17  ;;  %v2681_v4 = vmul.f32 %v2633_v36, %v2253_v21 }
 0x279   :  { %v2685_v5 = vmul.f32 %v2633_v36, %v2260_v25  ;;  %v2689_v9 = vmul.f32 %v2633_v36, %v2267_v29  ;;  %v2693_v13 = vmul.f32 %v2633_v36, %v2274_v33  ;;  %v2697_v17 = vmul.f32 %v2633_v36, %v4007_v7 }
 0x27a   :  { %v2701_v21 = vmul.f32 %v2633_v36, %v4008_v15  ;;  %v2705_v25 = vmul.f32 %v2633_v36, %v4009_v11  ;;  %v2709_v29 = vmul.f32 %v2633_v36, %v4010_v60  ;;  %v2713_v33 = vmul.f32 %v2633_v36, %v4011_v39 }
 0x27b   :  { %v2717_v0 = vmul.f32 %v2633_v36, %v4012_v27  ;;  %v2721_v16 = vmul.f32 %v2633_v36, %v4013_v51  ;;  %v2725_v47 = vmul.f32 %v2633_v36, %v4014_v20  ;;  %v2729_v56 = vmul.f32 %v2633_v36, %v4015_v43  ;;  %v4019_v27 = vld [vmem:[#allocation11_spill] sm:$0xff]  ;;  %v4021_v51 = vld [vmem:[#allocation12_spill] sm:$0xff]  ;;  %v4023_v20 = vld [vmem:[#allocation14_spill] sm:$0xff] }
 0x27c   :  { %v2733_v37 = vmul.f32 %v2633_v36, %v2344_v59  ;;  %v2737_v7 = vmul.f32 %v2633_v36, %v4016_v63  ;;  %v2741_v15 = vmul.f32 %v2633_v36, %v2358_v61  ;;  %v2745_v11 = vmul.f32 %v2633_v36, %v2365_v12  ;;  %v4025_v43 = vld [vmem:[#allocation17_spill] sm:$0xff]  ;;  %v4027_v63 = vld [vmem:[#allocation19_spill] sm:$0xff] }
 0x27d   :  { %v2749_v60 = vmul.f32 %v2633_v36, %v2372_v45  ;;  %v2753_v59 = vmul.f32 %v2633_v36, %v2379_v41  ;;  %v2757_v39 = vmul.f32 %v2633_v36, %v2386_v19  ;;  %v2761_v61 = vmul.f32 %v2633_v36, %v2393_v2 }
 0x27e   :  { %v2765_v12 = vmul.f32 %v2633_v36, %v2400_v23  ;;  %v2769_v45 = vmul.f32 %v2633_v36, %v2407_v52  ;;  %v2773_v41 = vmul.f32 %v2633_v36, %v2414_v50  ;;  %v2777_v19 = vmul.f32 %v2633_v36, %v2421_v54 }
 0x27f   :  { %v2781_v2 = vmul.f32 %v2633_v36, %v2428_v58  ;;  %v2785_v23 = vmul.f32 %v2633_v36, %v2435_v62  ;;  %v2789_v52 = vmul.f32 %v2633_v36, %v2442_v3  ;;  %v2793_v50 = vmul.f32 %v2633_v36, %v2449_v6 }
 0x280   :  { %v2797_v54 = vmul.f32 %v2633_v36, %v2456_v10  ;;  %v2801_v58 = vmul.f32 %v2633_v36, %v2463_v14  ;;  %v2805_v62 = vmul.f32 %v2633_v36, %v2470_v18  ;;  %v2809_v3 = vmul.f32 %v2633_v36, %v2477_v22 }
 0x281   :  { %v2813_v6 = vmul.f32 %v2633_v36, %v2484_v26  ;;  %v2817_v10 = vmul.f32 %v2633_v36, %v2491_v30  ;;  %v2821_v14 = vmul.f32 %v2633_v36, %v2498_v34  ;;  %v2825_v18 = vmul.f32 %v2633_v36, %v2505_v38 }
 0x282   :  { %v2829_v22 = vmul.f32 %v2633_v36, %v2512_v42  ;;  %v2833_v26 = vmul.f32 %v2633_v36, %v2519_v46  ;;  %v2837_v30 = vmul.f32 %v2633_v36, %v2526_v55  ;;  %v2841_v34 = vmul.f32 %v2633_v36, %v2533_v8  ;;  %v2858_v55 = vld [vmem:[%s3893_s3] ss:$0 sm:$0xff] }
 0x283   :  { %v2845_v38 = vmul.f32 %v2633_v36, %v2540_v24  ;;  %v2849_v42 = vmul.f32 %v2633_v36, %v4019_v27  ;;  %v2853_v46 = vmul.f32 %v2633_v36, %v4021_v51  ;;  %v2862_v8 = vmul.f32 %v2633_v36, %v4023_v20 }
 0x284   :  { %4017 = vst [vmem:[#allocation18_spill] sm:$0xff] %v2841_v34  ;;  %v2866_v24 = vmul.f32 %v2633_v36, %v4025_v43  ;;  %v2870_v27 = vmul.f32 %v2633_v36, %v4027_v63  ;;  %v4031_v34 = vld [vmem:[#allocation16_spill] sm:$0xff] }
 0x285   :  { %4018 = vst [vmem:[#allocation2_spill] sm:$0xff] %v2845_v38  ;;  %4020 = vst [vmem:[#allocation3_spill] sm:$0xff] %v2849_v42  ;;  %v4029_v42 = vld [vmem:[#allocation13_spill] sm:$0xff]  ;;  %v2882_v20 = vmul.f32 %v2633_v36, %v4031_v34  ;;  %v2902_v34 = vadd.f32 %v2858_v55, %v2641_v1  ;;  %v2922_v1 = vadd.f32 %v2858_v55, %v2661_v48 }
 0x286   :  { %4022 = vst [vmem:[#allocation4_spill] sm:$0xff] %v2853_v46  ;;  %4024 = vst [vmem:[#allocation5_spill] sm:$0xff] %v2862_v8  ;;  %v2874_v51 = vmul.f32 %v2633_v36, %v4029_v42  ;;  %v4030_v46 = vld [vmem:[#allocation15_spill] sm:$0xff]  ;;  %v4032_v8 = vld [vmem:[#allocation20_spill] sm:$0xff]  ;;  %v2942_v48 = vadd.f32 %v2858_v55, %v2681_v4  ;;  %v2962_v4 = vadd.f32 %v2858_v55, %v2701_v21 }
 0x287   :  { %4026 = vst [vmem:[#allocation6_spill] sm:$0xff] %v2866_v24  ;;  %4028 = vst [vmem:[#allocation7_spill] sm:$0xff] %v2870_v27  ;;  %v2878_v38 = vmul.f32 %v2633_v36, %v4030_v46  ;;  %v2886_v43 = vmul.f32 %v2633_v36, %v4032_v8  ;;  %v4033_v24 = vld [vmem:[#allocation21_spill] sm:$0xff]  ;;  %v4034_v27 = vld [vmem:[#allocation22_spill] sm:$0xff]  ;;  %v2898_v46 = vadd.f32 %v2858_v55, %v2637_v44  ;;  %vm1091_vm2 = vcmp.gt.f32.partialorder %v2902_v34, 0.0 }
 0x288   :  { %v2890_v63 = vmul.f32 %v2633_v36, %v4033_v24  ;;  %v2894_v42 = vmul.f32 %v2633_v36, %v4034_v27  ;;  %v2906_v8 = vadd.f32 %v2858_v55, %v2645_v28  ;;  %v2910_v24 = vadd.f32 %v2858_v55, %v2649_v53 }
 0x289   :  { %v2914_v36 = vadd.f32 %v2858_v55, %v2653_v40  ;;  %v2918_v44 = vadd.f32 %v2858_v55, %v2657_v35  ;;  %v2926_v28 = vadd.f32 %v2858_v55, %v2665_v31  ;;  %v2930_v53 = vadd.f32 %v2858_v55, %v2669_v32 }
 0x28a   :  { %v2934_v40 = vadd.f32 %v2858_v55, %v2673_v49  ;;  %v2938_v35 = vadd.f32 %v2858_v55, %v2677_v57  ;;  %v2946_v31 = vadd.f32 %v2858_v55, %v2685_v5  ;;  %v2950_v32 = vadd.f32 %v2858_v55, %v2689_v9 }
 0x28b   :  { %v2954_v49 = vadd.f32 %v2858_v55, %v2693_v13  ;;  %v2958_v57 = vadd.f32 %v2858_v55, %v2697_v17  ;;  %v2966_v5 = vadd.f32 %v2858_v55, %v2705_v25  ;;  %v2970_v9 = vadd.f32 %v2858_v55, %v2709_v29  ;;  %v4040_v27 = vld [vmem:[#allocation18_spill] sm:$0xff] }
 0x28c   :  { %v2974_v13 = vadd.f32 %v2858_v55, %v2713_v33  ;;  %v2978_v17 = vadd.f32 %v2858_v55, %v2717_v0  ;;  %v2982_v21 = vadd.f32 %v2858_v55, %v2721_v16  ;;  %v2986_v25 = vadd.f32 %v2858_v55, %v2725_v47 }
 0x28d   :  { %v2990_v29 = vadd.f32 %v2858_v55, %v2729_v56  ;;  %v2994_v33 = vadd.f32 %v2858_v55, %v2733_v37  ;;  %v2998_v0 = vadd.f32 %v2858_v55, %v2737_v7  ;;  %v3002_v16 = vadd.f32 %v2858_v55, %v2741_v15 }
 0x28e   :  { %v3006_v47 = vadd.f32 %v2858_v55, %v2745_v11  ;;  %v3010_v56 = vadd.f32 %v2858_v55, %v2749_v60  ;;  %v3014_v37 = vadd.f32 %v2858_v55, %v2753_v59  ;;  %v3018_v7 = vadd.f32 %v2858_v55, %v2757_v39 }
 0x28f   :  { %v3022_v15 = vadd.f32 %v2858_v55, %v2761_v61  ;;  %v3026_v11 = vadd.f32 %v2858_v55, %v2765_v12  ;;  %v3030_v60 = vadd.f32 %v2858_v55, %v2769_v45  ;;  %v3034_v59 = vadd.f32 %v2858_v55, %v2773_v41 }
 0x290   :  { %v3038_v39 = vadd.f32 %v2858_v55, %v2777_v19  ;;  %v3042_v61 = vadd.f32 %v2858_v55, %v2781_v2  ;;  %v3046_v12 = vadd.f32 %v2858_v55, %v2785_v23  ;;  %v3050_v45 = vadd.f32 %v2858_v55, %v2789_v52 }
 0x291   :  { %v3054_v41 = vadd.f32 %v2858_v55, %v2793_v50  ;;  %v3058_v19 = vadd.f32 %v2858_v55, %v2797_v54  ;;  %v3062_v2 = vadd.f32 %v2858_v55, %v2801_v58  ;;  %v3066_v23 = vadd.f32 %v2858_v55, %v2805_v62 }
 0x292   :  { %v3070_v52 = vadd.f32 %v2858_v55, %v2809_v3  ;;  %v3074_v50 = vadd.f32 %v2858_v55, %v2813_v6  ;;  %v3078_v54 = vadd.f32 %v2858_v55, %v2817_v10  ;;  %v3082_v58 = vadd.f32 %v2858_v55, %v2821_v14 }
 0x293   :  { %v3086_v62 = vadd.f32 %v2858_v55, %v2825_v18  ;;  %v3090_v3 = vadd.f32 %v2858_v55, %v2829_v22  ;;  %v3094_v6 = vadd.f32 %v2858_v55, %v2833_v26  ;;  %v3098_v10 = vadd.f32 %v2858_v55, %v2837_v30 }
 0x294   :  { %4035 = vst [vmem:[#allocation8_spill] sm:$0xff] %v3082_v58  ;;  %v3102_v14 = vadd.f32 %v2858_v55, %v4040_v27  ;;  %v4042_v58 = vld [vmem:[#allocation2_spill] sm:$0xff]  ;;  %vm1090_vm1 = vcmp.gt.f32.partialorder %v2898_v46, 0.0  ;;  %vm1092_vm3 = vcmp.gt.f32.partialorder %v2906_v8, 0.0  ;;  %vm1093_vm4 = vcmp.gt.f32.partialorder %v2910_v24, 0.0 }
 0x295   :  { %4036 = vst [vmem:[#allocation9_spill] sm:$0xff] %v3086_v62  ;;  %4037 = vst [vmem:[#allocation10_spill] sm:$0xff] %v3090_v3  ;;  %v3106_v18 = vadd.f32 %v2858_v55, %v4042_v58  ;;  %v4043_v62 = vld [vmem:[#allocation3_spill] sm:$0xff]  ;;  %v4045_v3 = vld [vmem:[#allocation4_spill] sm:$0xff]  ;;  %vm1094_vm5 = vcmp.gt.f32.partialorder %v2914_v36, 0.0  ;;  %vm1095_vm6 = vcmp.gt.f32.partialorder %v2918_v44, 0.0 }
 0x296   :  { %4038 = vst [vmem:[#allocation11_spill] sm:$0xff] %v3094_v6  ;;  %4039 = vst [vmem:[#allocation12_spill] sm:$0xff] %v3098_v10  ;;  %v3110_v22 = vadd.f32 %v2858_v55, %v4043_v62  ;;  %v3114_v26 = vadd.f32 %v2858_v55, %v4045_v3  ;;  %v4047_v6 = vld [vmem:[#allocation5_spill] sm:$0xff]  ;;  %v4049_v10 = vld [vmem:[#allocation6_spill] sm:$0xff]  ;;  %v3130_v62 = vadd.f32 %v2858_v55, %v2874_v51  ;;  %vm1096_vm7 = vcmp.gt.f32.partialorder %v2922_v1, 0.0 }
 0x297   :  { %4041 = vst [vmem:[#allocation14_spill] sm:$0xff] %v3102_v14  ;;  %v3118_v30 = vadd.f32 %v2858_v55, %v4047_v6  ;;  %v3122_v27 = vadd.f32 %v2858_v55, %v4049_v10  ;;  %v4051_v14 = vld [vmem:[#allocation7_spill] sm:$0xff]  ;;  %v3134_v3 = vadd.f32 %v2858_v55, %v2878_v38  ;;  %v3138_v6 = vadd.f32 %v2858_v55, %v2882_v20 }
 0x298   :  { %4044 = vst [vmem:[#allocation17_spill] sm:$0xff] %v3110_v22  ;;  %4046 = vst [vmem:[#allocation19_spill] sm:$0xff] %v3114_v26  ;;  %v3126_v58 = vadd.f32 %v2858_v55, %v4051_v14  ;;  %v3142_v10 = vadd.f32 %v2858_v55, %v2886_v43  ;;  %vm1097_vm8 = vcmp.gt.f32.partialorder %v2926_v28, 0.0  ;;  %vm1098_vm9 = vcmp.gt.f32.partialorder %v2930_v53, 0.0 }
 0x299   :  { %4048 = vst [vmem:[#allocation13_spill] sm:$0xff] %v3118_v30  ;;  %4050 = vst [vmem:[#allocation15_spill] sm:$0xff] %v3122_v27  ;;  %v3155_v38 = vadd.f32 %v2858_v55, %v2890_v63  ;;  %vm1099_vm10 = vcmp.gt.f32.partialorder %v2934_v40, 0.0  ;;  %v1154_v51 = vmul.f32 0.2, %v2898_v46  ;;  %v3163_v14 = vadd.f32 %v2858_v55, %v2894_v42 }
 0x29a   :  { %4052 = vst [vmem:[#allocation16_spill] sm:$0xff] %v3126_v58  ;;  %4053 = vst [vmem:[#allocation20_spill] sm:$0xff] %v3130_v62  ;;  %v1155_v20 = vmul.f32 0.2, %v2902_v34  ;;  %v1156_v43 = vmul.f32 0.2, %v2906_v8 }
 0x29b   :  { %4054 = vst [vmem:[#allocation21_spill] sm:$0xff] %v3134_v3  ;;  %4055 = vst [vmem:[#allocation22_spill] sm:$0xff] %v3138_v6  ;;  %vm1100_vm11 = vcmp.gt.f32.partialorder %v2938_v35, 0.0  ;;  %v1158_v6 = vmul.f32 0.2, %v2914_v36  ;;  %vm1101_vm12 = vcmp.gt.f32.partialorder %v2942_v48, 0.0  ;;  %v1218_v55 = vsel %vm1090_vm1, %v2898_v46, %v1154_v51 }
 0x29c   :  { %4056 = vst [vmem:[#allocation18_spill] sm:$0xff] %v3142_v10  ;;  %4057 = vst [vmem:[#allocation2_spill] sm:$0xff] %v3155_v38  ;;  %v1157_v10 = vmul.f32 0.2, %v2910_v24  ;;  %v1159_v63 = vmul.f32 0.2, %v2918_v44  ;;  %v1219_v27 = vsel %vm1091_vm2, %v2902_v34, %v1155_v20  ;;  %v1220_v34 = vsel %vm1092_vm3, %v2906_v8, %v1156_v43 }
 0x29d   :  { %4058 = vst [vmem:[#allocation3_spill] sm:$0xff] %v3163_v14  ;;  %v1160_v38 = vmul.f32 0.2, %v2922_v1  ;;  %v1161_v3 = vmul.f32 0.2, %v2926_v28  ;;  %vm1102_vm13 = vcmp.gt.f32.partialorder %v2946_v31, 0.0 }
 0x29e   :  { %v1162_v62 = vmul.f32 0.2, %v2930_v53  ;;  %v1163_v42 = vmul.f32 0.2, %v2934_v40  ;;  %v3179_v14 = vmul.f32 0.2, %v2938_v35  ;;  %v1221_v8 = vsel %vm1093_vm4, %v2910_v24, %v1157_v10 }
 0x29f   :  { %v3182_v58 = vmul.f32 0.2, %v2942_v48  ;;  %1282 = vst.msk [vmem:[%s3894_s4] sm:$0xff] %vm547_vm0, %v1218_v55  ;;  %vm1103_vm14 = vcmp.gt.f32.partialorder %v2950_v32, 0.0  ;;  %v3193_v46 = vmul.f32 0.2, %v2946_v31  ;;  %v1222_v24 = vsel %vm1094_vm5, %v2914_v36, %v1158_v6 }
 0x2a0   :  { %v3196_v51 = vmul.f32 0.2, %v2950_v32  ;;  %v3199_v30 = vmul.f32 0.2, %v2954_v49  ;;  %1283 = vst.msk [vmem:[%s3894_s4 + $0x8] sm:$0xff] %vm547_vm0, %v1219_v27  ;;  %vm1104_vm15 = vcmp.gt.f32.partialorder %v2954_v49, 0.0  ;;  %v1223_v36 = vsel %vm1095_vm6, %v2918_v44, %v1159_v63 }
 0x2a1   :  { %v3210_v20 = vmul.f32 0.2, %v2958_v57  ;;  %v3213_v55 = vmul.f32 0.2, %v2962_v4  ;;  %v3216_v26 = vmul.f32 0.2, %v2966_v5  ;;  %v1224_v44 = vsel %vm1096_vm7, %v2922_v1, %v1160_v38 }
 0x2a2   :  { %1284 = vst.msk [vmem:[%s3894_s4 + $0x10] sm:$0xff] %vm547_vm0, %v1220_v34  ;;  %vm1105_vm1 = vcmp.gt.f32.partialorder %v2958_v57, 0.0  ;;  %v3227_v27 = vmul.f32 0.2, %v2970_v9  ;;  %v3230_v43 = vmul.f32 0.2, %v2974_v13  ;;  %v1225_v1 = vsel %vm1097_vm8, %v2926_v28, %v1161_v3 }
 0x2a3   :  { %4059 = vst [vmem:[#allocation4_spill] sm:$0xff] %v3213_v55  ;;  %v3233_v55 = vmul.f32 0.2, %v2978_v17  ;;  %1285 = vst.msk [vmem:[%s3894_s4 + $0x18] sm:$0xff] %vm547_vm0, %v1221_v8  ;;  %vm1106_vm2 = vcmp.gt.f32.partialorder %v2962_v4, 0.0  ;;  %vm1107_vm3 = vcmp.gt.f32.partialorder %v2966_v5, 0.0  ;;  %v1226_v28 = vsel %vm1098_vm9, %v2930_v53, %v1162_v62 }
 0x2a4   :  { %4060 = vst [vmem:[#allocation5_spill] sm:$0xff] %v3230_v43  ;;  %v3244_v10 = vmul.f32 0.2, %v2982_v21  ;;  %v3247_v34 = vmul.f32 0.2, %v2986_v25  ;;  %1286 = vst.msk [vmem:[%s3894_s4 + $0x20] sm:$0xff] %vm547_vm0, %v1222_v24  ;;  %v1227_v62 = vsel %vm1099_vm10, %v2934_v40, %v1163_v42  ;;  %v1228_v42 = vsel %vm1100_vm11, %v2938_v35, %v3179_v14 }
 0x2a5   :  { %v3250_v43 = vmul.f32 0.2, %v2990_v29  ;;  %v3261_v6 = vmul.f32 0.2, %v2994_v33  ;;  %v3264_v8 = vmul.f32 0.2, %v2998_v0  ;;  %v1229_v14 = vsel %vm1101_vm12, %v2942_v48, %v3182_v58 }
 0x2a6   :  { %4061 = vst [vmem:[#allocation6_spill] sm:$0xff] %v3247_v34  ;;  %v3267_v34 = vmul.f32 0.2, %v3002_v16  ;;  %1287 = vst.msk [vmem:[%s3894_s4 + $0x28] sm:$0xff] %vm547_vm0, %v1223_v36  ;;  %vm1108_vm4 = vcmp.gt.f32.partialorder %v2970_v9, 0.0  ;;  %vm1112_vm8 = vcmp.gt.f32.partialorder %v2986_v25, 0.0  ;;  %v1230_v58 = vsel %vm1102_vm13, %v2946_v31, %v3193_v46 }
 0x2a7   :  { %4062 = vst [vmem:[#allocation7_spill] sm:$0xff] %v3264_v8  ;;  %v3278_v63 = vmul.f32 0.2, %v3006_v47  ;;  %v3281_v24 = vmul.f32 0.2, %v3010_v56  ;;  %1288 = vst.msk [vmem:[%s3894_s4 + $0x30] sm:$0xff] %vm547_vm0, %v1224_v44 }
 0x2a8   :  { %v3284_v8 = vmul.f32 0.2, %v3014_v37  ;;  %v3297_v38 = vmul.f32 0.2, %v3018_v7  ;;  %v3300_v36 = vmul.f32 0.2, %v3022_v15 }
 0x2a9   :  { %1289 = vst.msk [vmem:[%s3894_s4 + $0x38] sm:$0xff] %vm547_vm0, %v1225_v1  ;;  %v3317_v3 = vmul.f32 0.2, %v3030_v60  ;;  %v3320_v44 = vmul.f32 0.2, %v3034_v59  ;;  %1290 = vst.msk [vmem:[%s3894_s4 + $0x40] sm:$0xff] %vm547_vm0, %v1226_v28 }
 0x2aa   :  { %4063 = vst [vmem:[#allocation23_spill] sm:$0xff] %v3284_v8  ;;  %v3303_v8 = vmul.f32 0.2, %v3026_v11  ;;  %v3323_v53 = vmul.f32 0.2, %v3038_v39  ;;  %vm1116_vm9 = vcmp.gt.f32.partialorder %v3002_v16, 0.0 }
 0x2ab   :  { %v3337_v1 = vmul.f32 0.2, %v3042_v61  ;;  %v3343_v40 = vmul.f32 0.2, %v3050_v45  ;;  %1291 = vst.msk [vmem:[%s3894_s4 + $0x48] sm:$0xff] %vm547_vm0, %v1227_v62  ;;  %vm1120_vm10 = vcmp.gt.f32.partialorder %v3018_v7, 0.0 }
 0x2ac   :  { %4064 = vst [vmem:[#allocation24_spill] sm:$0xff] %v3323_v53  ;;  %v3340_v53 = vmul.f32 0.2, %v3046_v12  ;;  %v3358_v28 = vmul.f32 0.2, %v3054_v41  ;;  %1292 = vst.msk [vmem:[%s3894_s4 + $0x50] sm:$0xff] %vm547_vm0, %v1228_v42 }
 0x2ad   :  { %4065 = vst [vmem:[#allocation25_spill] sm:$0xff] %v3343_v40  ;;  %v3361_v40 = vmul.f32 0.2, %v3058_v19  ;;  %v3364_v35 = vmul.f32 0.2, %v3062_v2  ;;  %vm1124_vm11 = vcmp.gt.f32.partialorder %v3034_v59, 0.0 }
 0x2ae   :  { %v3379_v62 = vmul.f32 0.2, %v3066_v23  ;;  %v3385_v48 = vmul.f32 0.2, %v3074_v50  ;;  %1293 = vst.msk [vmem:[%s3894_s4 + $0x58] sm:$0xff] %vm547_vm0, %v1229_v14  ;;  %vm1128_vm12 = vcmp.gt.f32.partialorder %v3050_v45, 0.0  ;;  %v1231_v14 = vsel %vm1103_vm14, %v2950_v32, %v3196_v51 }
 0x2af   :  { %4066 = vst [vmem:[#allocation26_spill] sm:$0xff] %v3364_v35  ;;  %v3382_v35 = vmul.f32 0.2, %v3070_v52  ;;  %v3400_v42 = vmul.f32 0.2, %v3078_v54  ;;  %v4073_v31 = vld [vmem:[#allocation9_spill] sm:$0xff] }
 0x2b0   :  { %4067 = vst [vmem:[#allocation27_spill] sm:$0xff] %v3379_v62  ;;  %4069 = vst [vmem:[#allocation29_spill] sm:$0xff] %v3385_v48  ;;  %v4071_v48 = vld [vmem:[#allocation8_spill] sm:$0xff]  ;;  %v3406_v46 = vmul.f32 0.2, %v4073_v31  ;;  %vm1132_vm13 = vcmp.gt.f32.partialorder %v3066_v23, 0.0 }
 0x2b1   :  { %4068 = vst [vmem:[#allocation28_spill] sm:$0xff] %v3382_v35  ;;  %4070 = vst [vmem:[#allocation30_spill] sm:$0xff] %v3400_v42  ;;  %v3403_v35 = vmul.f32 0.2, %v4071_v48  ;;  %v4077_v42 = vld [vmem:[#allocation11_spill] sm:$0xff]  ;;  %v4079_v32 = vld [vmem:[#allocation12_spill] sm:$0xff] }
 0x2b2   :  { %4074 = vst [vmem:[#allocation9_spill] sm:$0xff] %v3406_v46  ;;  %1294 = vst.msk [vmem:[%s3894_s4 + $0x60] sm:$0xff] %vm547_vm0, %v1230_v58  ;;  %v3424_v62 = vmul.f32 0.2, %v4077_v42  ;;  %v3427_v51 = vmul.f32 0.2, %v4079_v32  ;;  %v1232_v58 = vsel %vm1104_vm15, %v2954_v49, %v3199_v30  ;;  %v1233_v30 = vsel %vm1105_vm1, %v2958_v57, %v3210_v20 }
 0x2b3   :  { %4072 = vst [vmem:[#allocation8_spill] sm:$0xff] %v3403_v35  ;;  %v4075_v35 = vld [vmem:[#allocation10_spill] sm:$0xff]  ;;  %1295 = vst.msk [vmem:[%s3894_s4 + $0x68] sm:$0xff] %vm547_vm0, %v1231_v14  ;;  %vm1136_vm14 = vcmp.gt.f32.partialorder %v4071_v48, 0.0  ;;  %v3448_v49 = vmul.f32 0.2, %v3110_v22 }
 0x2b4   :  { %v3421_v46 = vmul.f32 0.2, %v4075_v35  ;;  %4078 = vst [vmem:[#allocation31_spill] sm:$0xff] %v3424_v62  ;;  %4080 = vst [vmem:[#allocation12_spill] sm:$0xff] %v3427_v51  ;;  %v4081_v62 = vld [vmem:[#allocation14_spill] sm:$0xff]  ;;  %vm1140_vm15 = vcmp.gt.f32.partialorder %v4079_v32, 0.0 }
 0x2b5   :  { %v3442_v51 = vmul.f32 0.2, %v4081_v62  ;;  %4084 = vst [vmem:[#allocation33_spill] sm:$0xff] %v3448_v49  ;;  %1296 = vst.msk [vmem:[%s3894_s4 + $0x70] sm:$0xff] %vm547_vm0, %v1232_v58  ;;  %v4085_v14 = vld [vmem:[#allocation19_spill] sm:$0xff]  ;;  %v4091_v42 = vld [vmem:[#allocation4_spill] sm:$0xff] }
 0x2b6   :  { %4076 = vst [vmem:[#allocation10_spill] sm:$0xff] %v3421_v46  ;;  %v3445_v46 = vmul.f32 0.2, %v3106_v18  ;;  %v3463_v49 = vmul.f32 0.2, %v4085_v14  ;;  %v4089_v57 = vld [vmem:[#allocation15_spill] sm:$0xff]  ;;  %v1234_v58 = vsel %vm1106_vm2, %v2962_v4, %v4091_v42 }
 0x2b7   :  { %4082 = vst [vmem:[#allocation14_spill] sm:$0xff] %v3442_v51  ;;  %v3469_v20 = vmul.f32 0.2, %v4089_v57  ;;  %1297 = vst.msk [vmem:[%s3894_s4 + $0x78] sm:$0xff] %vm547_vm0, %v1233_v30  ;;  %vm1144_vm1 = vcmp.gt.f32.partialorder %v4085_v14, 0.0  ;;  %v4096_v4 = vld [vmem:[#allocation21_spill] sm:$0xff]  ;;  %v1235_v30 = vsel %vm1107_vm3, %v2966_v5, %v3216_v26 }
 0x2b8   :  { %4083 = vst [vmem:[#allocation32_spill] sm:$0xff] %v3445_v46  ;;  %4086 = vst [vmem:[#allocation19_spill] sm:$0xff] %v3463_v49  ;;  %v4087_v46 = vld [vmem:[#allocation13_spill] sm:$0xff]  ;;  %v4094_v49 = vld [vmem:[#allocation20_spill] sm:$0xff]  ;;  %v3490_v42 = vmul.f32 0.2, %v4096_v4 }
 0x2b9   :  { %v3466_v51 = vmul.f32 0.2, %v4087_v46  ;;  %4090 = vst [vmem:[#allocation15_spill] sm:$0xff] %v3469_v20  ;;  %v3487_v22 = vmul.f32 0.2, %v4094_v49  ;;  %1298 = vst.msk [vmem:[%s3894_s4 + $0x80] sm:$0xff] %vm547_vm0, %v1234_v58  ;;  %v1236_v58 = vsel %vm1108_vm4, %v2970_v9, %v3227_v27 }
 0x2ba   :  { %4097 = vst [vmem:[#allocation21_spill] sm:$0xff] %v3490_v42  ;;  %vm1148_vm2 = vcmp.gt.f32.partialorder %v4094_v49, 0.0  ;;  %v4101_v5 = vld [vmem:[#allocation2_spill] sm:$0xff]  ;;  %1299 = vst.msk [vmem:[%s3894_s4 + $0x88] sm:$0xff] %vm547_vm0, %v1235_v30  ;;  %vm4105_vm6 = vcmp.gt.f32.partialorder %v2974_v13, 0.0  ;;  %vm4106_vm4 = vcmp.gt.f32.partialorder %v2978_v17, 0.0 }
 0x2bb   :  { %4088 = vst [vmem:[#allocation13_spill] sm:$0xff] %v3466_v51  ;;  %v4092_v51 = vld [vmem:[#allocation16_spill] sm:$0xff]  ;;  %4095 = vst [vmem:[#allocation20_spill] sm:$0xff] %v3487_v22  ;;  %v4099_v22 = vld [vmem:[#allocation18_spill] sm:$0xff]  ;;  %v3511_v26 = vmul.f32 0.2, %v4101_v5  ;;  %v1238_v9 = vsel %vm4106_vm4, %v2978_v17, %v3233_v55 }
 0x2bc   :  { %v3484_v20 = vmul.f32 0.2, %v4092_v51  ;;  %v4098_v51 = vld [vmem:[#allocation22_spill] sm:$0xff]  ;;  %vm1152_vm3 = vcmp.gt.f32.partialorder %v4101_v5, 0.0  ;;  %vm4107_vm5 = vcmp.gt.f32.partialorder %v2982_v21, 0.0  ;;  %1300 = vst.msk [vmem:[%s3894_s4 + $0x90] sm:$0xff] %vm547_vm0, %v1236_v58 }
 0x2bd   :  { %v3505_v42 = vmul.f32 0.2, %v4098_v51  ;;  %4102 = vst [vmem:[#allocation2_spill] sm:$0xff] %v3511_v26  ;;  %v4103_v51 = vld [vmem:[#allocation3_spill] sm:$0xff]  ;;  %v1239_v27 = vsel %vm4107_vm5, %v2982_v21, %v3244_v10  ;;  %v4108_v30 = vld [vmem:[#allocation6_spill] sm:$0xff]  ;;  %vm4110_vm4 = vcmp.gt.f32.partialorder %v2994_v33, 0.0 }
 0x2be   :  { %4093 = vst [vmem:[#allocation4_spill] sm:$0xff] %v3484_v20  ;;  %v3508_v20 = vmul.f32 0.2, %v4099_v22  ;;  %vm1153_vm7 = vcmp.gt.f32.partialorder %v4103_v51, 0.0  ;;  %v3524_v22 = vmul.f32 0.2, %v4103_v51  ;;  %v1242_v21 = vsel %vm4110_vm4, %v2994_v33, %v3261_v6 }
 0x2bf   :  { %v4111_v55 = vld [vmem:[#allocation7_spill] sm:$0xff]  ;;  %vm4112_vm5 = vcmp.gt.f32.partialorder %v2998_v0, 0.0  ;;  %1302 = vst.msk [vmem:[%s3894_s4 + $0xa0] sm:$0xff] %vm547_vm0, %v1238_v9  ;;  %1303 = vst.msk [vmem:[%s3894_s4 + $0xa8] sm:$0xff] %vm547_vm0, %v1239_v27  ;;  %vm4116_vm4 = vcmp.gt.f32.partialorder %v3014_v37, 0.0  ;;  %v4127_v6 = vld [vmem:[#allocation26_spill] sm:$0xff] }
 0x2c0   :  { %4100 = vst [vmem:[#allocation34_spill] sm:$0xff] %v3508_v20  ;;  %v4104_v20 = vld [vmem:[#allocation5_spill] sm:$0xff]  ;;  %v1243_v10 = vsel %vm4112_vm5, %v2998_v0, %v4111_v55  ;;  %v4115_v0 = vld [vmem:[#allocation23_spill] sm:$0xff]  ;;  %1306 = vst.msk [vmem:[%s3894_s4 + $0xc0] sm:$0xff] %vm547_vm0, %v1242_v21  ;;  %vm4118_vm5 = vcmp.gt.f32.partialorder %v3026_v11, 0.0 }
 0x2c1   :  { %v1237_v26 = vsel %vm4105_vm6, %v2974_v13, %v4104_v20  ;;  %v1240_v13 = vsel %vm1112_vm8, %v2986_v25, %v4108_v30  ;;  %vm4109_vm6 = vcmp.gt.f32.partialorder %v2990_v29, 0.0  ;;  %v1244_v25 = vsel %vm1116_vm9, %v3002_v16, %v3267_v34  ;;  %1307 = vst.msk [vmem:[%s3894_s4 + $0xc8] sm:$0xff] %vm547_vm0, %v1243_v10  ;;  %v4147_v20 = vld [vmem:[#allocation32_spill] sm:$0xff]  ;;  %v4149_v58 = vld [vmem:[#allocation33_spill] sm:$0xff] }
 0x2c2   :  { %v1241_v17 = vsel %vm4109_vm6, %v2990_v29, %v3250_v43  ;;  %1301 = vst.msk [vmem:[%s3894_s4 + $0x98] sm:$0xff] %vm547_vm0, %v1237_v26  ;;  %vm4113_vm8 = vcmp.gt.f32.partialorder %v3006_v47, 0.0  ;;  %vm4114_vm6 = vcmp.gt.f32.partialorder %v3010_v56, 0.0  ;;  %v1247_v43 = vsel %vm4116_vm4, %v3014_v37, %v4115_v0  ;;  %1304 = vst.msk [vmem:[%s3894_s4 + $0xb0] sm:$0xff] %vm547_vm0, %v1240_v13  ;;  %v4150_v9 = vld [vmem:[#allocation17_spill] sm:$0xff]  ;;  %v4155_v13 = vld [vmem:[#allocation15_spill] sm:$0xff] }
 0x2c3   :  { %v1245_v29 = vsel %vm4113_vm8, %v3006_v47, %v3278_v63  ;;  %v1246_v33 = vsel %vm4114_vm6, %v3010_v56, %v3281_v24  ;;  %1305 = vst.msk [vmem:[%s3894_s4 + $0xb8] sm:$0xff] %vm547_vm0, %v1241_v17  ;;  %v1248_v16 = vsel %vm1120_vm10, %v3018_v7, %v3297_v38  ;;  %vm4117_vm9 = vcmp.gt.f32.partialorder %v3022_v15, 0.0  ;;  %1308 = vst.msk [vmem:[%s3894_s4 + $0xd0] sm:$0xff] %vm547_vm0, %v1244_v25  ;;  %v4132_v63 = vld [vmem:[#allocation29_spill] sm:$0xff]  ;;  %v4134_v38 = vld [vmem:[#allocation30_spill] sm:$0xff] }
 0x2c4   :  { %v1249_v47 = vsel %vm4117_vm9, %v3022_v15, %v3300_v36  ;;  %v1250_v56 = vsel %vm4118_vm5, %v3026_v11, %v3303_v8  ;;  %vm4119_vm8 = vcmp.gt.f32.partialorder %v3030_v60, 0.0  ;;  %1309 = vst.msk [vmem:[%s3894_s4 + $0xd8] sm:$0xff] %vm547_vm0, %v1245_v29  ;;  %1310 = vst.msk [vmem:[%s3894_s4 + $0xe0] sm:$0xff] %vm547_vm0, %v1246_v33  ;;  %v1252_v7 = vsel %vm1124_vm11, %v3034_v59, %v3320_v44  ;;  %v4120_v15 = vld [vmem:[#allocation24_spill] sm:$0xff]  ;;  %v4124_v59 = vld [vmem:[#allocation25_spill] sm:$0xff] }
 0x2c5   :  { %v1251_v37 = vsel %vm4119_vm8, %v3030_v60, %v3317_v3  ;;  %1311 = vst.msk [vmem:[%s3894_s4 + $0xe8] sm:$0xff] %vm547_vm0, %v1247_v43  ;;  %vm4121_vm10 = vcmp.gt.f32.partialorder %v3038_v39, 0.0  ;;  %vm4122_vm6 = vcmp.gt.f32.partialorder %v3042_v61, 0.0  ;;  %vm4123_vm4 = vcmp.gt.f32.partialorder %v3046_v12, 0.0  ;;  %1312 = vst.msk [vmem:[%s3894_s4 + $0xf0] sm:$0xff] %vm547_vm0, %v1248_v16  ;;  %v4139_v3 = vld [vmem:[#allocation10_spill] sm:$0xff] }
 0x2c6   :  { %v1253_v11 = vsel %vm4121_vm10, %v3038_v39, %v4120_v15  ;;  %v1254_v60 = vsel %vm4122_vm6, %v3042_v61, %v3337_v1  ;;  %v1255_v34 = vsel %vm4123_vm4, %v3046_v12, %v3340_v53  ;;  %1313 = vst.msk [vmem:[%s3894_s4 + $0xf8] sm:$0xff] %vm547_vm0, %v1249_v47  ;;  %1314 = vst.msk [vmem:[%s3894_s4 + $0x100] sm:$0xff] %vm547_vm0, %v1250_v56  ;;  %vm4125_vm11 = vcmp.gt.f32.partialorder %v3054_v41, 0.0  ;;  %v4141_v53 = vld [vmem:[#allocation31_spill] sm:$0xff]  ;;  %v4157_v21 = vld [vmem:[#allocation4_spill] sm:$0xff] }
 0x2c7   :  { %1315 = vst.msk [vmem:[%s3894_s4 + $0x108] sm:$0xff] %vm547_vm0, %v1251_v37  ;;  %v1256_v39 = vsel %vm1128_vm12, %v3050_v45, %v4124_v59  ;;  %v1257_v61 = vsel %vm4125_vm11, %v3054_v41, %v3358_v28  ;;  %vm4126_vm9 = vcmp.gt.f32.partialorder %v3058_v19, 0.0  ;;  %vm4128_vm5 = vcmp.gt.f32.partialorder %v3062_v2, 0.0  ;;  %1316 = vst.msk [vmem:[%s3894_s4 + $0x110] sm:$0xff] %vm547_vm0, %v1252_v7  ;;  %v4129_v45 = vld [vmem:[#allocation27_spill] sm:$0xff]  ;;  %v4144_v28 = vld [vmem:[#allocation12_spill] sm:$0xff] }
 0x2c8   :  { %v1258_v12 = vsel %vm4126_vm9, %v3058_v19, %v3361_v40  ;;  %v1259_v8 = vsel %vm4128_vm5, %v3062_v2, %v4127_v6  ;;  %1317 = vst.msk [vmem:[%s3894_s4 + $0x118] sm:$0xff] %vm547_vm0, %v1253_v11  ;;  %1318 = vst.msk [vmem:[%s3894_s4 + $0x120] sm:$0xff] %vm547_vm0, %v1254_v60  ;;  %v1260_v41 = vsel %vm1132_vm13, %v3066_v23, %v4129_v45  ;;  %v4130_v19 = vld [vmem:[#allocation28_spill] sm:$0xff]  ;;  %vm4131_vm12 = vcmp.gt.f32.partialorder %v3070_v52, 0.0  ;;  %v4142_v1 = vld [vmem:[#allocation11_spill] sm:$0xff] }
 0x2c9   :  { %1319 = vst.msk [vmem:[%s3894_s4 + $0x128] sm:$0xff] %vm547_vm0, %v1255_v34  ;;  %v1261_v2 = vsel %vm4131_vm12, %v3070_v52, %v4130_v19  ;;  %vm4133_vm8 = vcmp.gt.f32.partialorder %v3074_v50, 0.0  ;;  %vm4135_vm10 = vcmp.gt.f32.partialorder %v3078_v54, 0.0  ;;  %1320 = vst.msk [vmem:[%s3894_s4 + $0x130] sm:$0xff] %vm547_vm0, %v1256_v39  ;;  %v4136_v23 = vld [vmem:[#allocation8_spill] sm:$0xff]  ;;  %vm4138_vm13 = vcmp.gt.f32.partialorder %v4073_v31, 0.0 }
 0x2ca   :  { %v1262_v24 = vsel %vm4133_vm8, %v3074_v50, %v4132_v63  ;;  %v1263_v36 = vsel %vm4135_vm10, %v3078_v54, %v4134_v38  ;;  %1321 = vst.msk [vmem:[%s3894_s4 + $0x138] sm:$0xff] %vm547_vm0, %v1257_v61  ;;  %1322 = vst.msk [vmem:[%s3894_s4 + $0x140] sm:$0xff] %vm547_vm0, %v1258_v12  ;;  %v1264_v52 = vsel %vm1136_vm14, %v4071_v48, %v4136_v23  ;;  %v4137_v50 = vld [vmem:[#allocation9_spill] sm:$0xff]  ;;  %vm4140_vm6 = vcmp.gt.f32.partialorder %v4075_v35, 0.0  ;;  %v4145_v48 = vld [vmem:[#allocation14_spill] sm:$0xff] }
 0x2cb   :  { %1323 = vst.msk [vmem:[%s3894_s4 + $0x148] sm:$0xff] %vm547_vm0, %v1259_v8  ;;  %v1265_v54 = vsel %vm4138_vm13, %v4073_v31, %v4137_v50  ;;  %v1266_v44 = vsel %vm4140_vm6, %v4075_v35, %v4139_v3  ;;  %vm4143_vm4 = vcmp.gt.f32.partialorder %v4142_v1, 0.0  ;;  %1324 = vst.msk [vmem:[%s3894_s4 + $0x150] sm:$0xff] %vm547_vm0, %v1260_v41  ;;  %v1268_v35 = vsel %vm1140_vm15, %v4079_v32, %v4144_v28  ;;  %v4153_v32 = vld [vmem:[#allocation13_spill] sm:$0xff]  ;;  %v4158_v55 = vld [vmem:[#allocation16_spill] sm:$0xff] }
 0x2cc   :  { %v1267_v40 = vsel %vm4143_vm4, %v4142_v1, %v4141_v53  ;;  %1325 = vst.msk [vmem:[%s3894_s4 + $0x158] sm:$0xff] %vm547_vm0, %v1261_v2  ;;  %1326 = vst.msk [vmem:[%s3894_s4 + $0x160] sm:$0xff] %vm547_vm0, %v1262_v24  ;;  %vm4146_vm14 = vcmp.gt.f32.partialorder %v4081_v62, 0.0  ;;  %vm4148_vm11 = vcmp.gt.f32.partialorder %v3106_v18, 0.0  ;;  %vm4151_vm9 = vcmp.gt.f32.partialorder %v4150_v9, 0.0  ;;  %v4163_v29 = vld [vmem:[#allocation22_spill] sm:$0xff] }
 0x2cd   :  { %1327 = vst.msk [vmem:[%s3894_s4 + $0x168] sm:$0xff] %vm547_vm0, %v1263_v36  ;;  %v1269_v31 = vsel %vm4146_vm14, %v4081_v62, %v4145_v48  ;;  %v1270_v26 = vsel %vm4148_vm11, %v3106_v18, %v4147_v20  ;;  %v1271_v27 = vsel %vm4151_vm9, %v4150_v9, %v4149_v58  ;;  %1328 = vst.msk [vmem:[%s3894_s4 + $0x170] sm:$0xff] %vm547_vm0, %v1264_v52  ;;  %v4152_v18 = vld [vmem:[#allocation19_spill] sm:$0xff]  ;;  %vm4154_vm15 = vcmp.gt.f32.partialorder %v4087_v46, 0.0  ;;  %v4165_v0 = vld [vmem:[#allocation34_spill] sm:$0xff] }
 0x2ce   :  { %1329 = vst.msk [vmem:[%s3894_s4 + $0x178] sm:$0xff] %vm547_vm0, %v1265_v54  ;;  %1330 = vst.msk [vmem:[%s3894_s4 + $0x180] sm:$0xff] %vm547_vm0, %v1266_v44  ;;  %v1272_v62 = vsel %vm1144_vm1, %v4085_v14, %v4152_v18  ;;  %v1273_v30 = vsel %vm4154_vm15, %v4087_v46, %v4153_v32  ;;  %vm4156_vm5 = vcmp.gt.f32.partialorder %v4089_v57, 0.0  ;;  %vm4159_vm12 = vcmp.gt.f32.partialorder %v4158_v55, 0.0  ;;  %v4160_v46 = vld [vmem:[#allocation20_spill] sm:$0xff]  ;;  %v4166_v43 = vld [vmem:[#allocation18_spill] sm:$0xff] }
 0x2cf   :  { %1331 = vst.msk [vmem:[%s3894_s4 + $0x188] sm:$0xff] %vm547_vm0, %v1267_v40  ;;  %v1274_v17 = vsel %vm4156_vm5, %v4089_v57, %v4155_v13  ;;  %v1275_v10 = vsel %vm4159_vm12, %v4158_v55, %v4157_v21  ;;  %1332 = vst.msk [vmem:[%s3894_s4 + $0x190] sm:$0xff] %vm547_vm0, %v1268_v35  ;;  %v1276_v14 = vsel %vm1148_vm2, %v4094_v49, %v4160_v46  ;;  %v4161_v57 = vld [vmem:[#allocation21_spill] sm:$0xff]  ;;  %vm4162_vm1 = vcmp.gt.f32.partialorder %v4096_v4, 0.0  ;;  %v4168_v49 = vld [vmem:[#allocation2_spill] sm:$0xff] }
 0x2d0   :  { %1333 = vst.msk [vmem:[%s3894_s4 + $0x198] sm:$0xff] %vm547_vm0, %v1269_v31  ;;  %1334 = vst.msk [vmem:[%s3894_s4 + $0x1a0] sm:$0xff] %vm547_vm0, %v1270_v26  ;;  %v1277_v25 = vsel %vm4162_vm1, %v4096_v4, %v4161_v57  ;;  %vm4164_vm8 = vcmp.gt.f32.partialorder %v4163_v29, 0.0  ;;  %vm4167_vm10 = vcmp.gt.f32.partialorder %v4166_v43, 0.0  ;;  %v1280_v4 = vsel %vm1152_vm3, %v4101_v5, %v4168_v49 }
 0x2d1   :  { %1335 = vst.msk [vmem:[%s3894_s4 + $0x1a8] sm:$0xff] %vm547_vm0, %v1271_v27  ;;  %v1278_v33 = vsel %vm4164_vm8, %v4163_v29, %v3505_v42  ;;  %v1279_v16 = vsel %vm4167_vm10, %v4166_v43, %v4165_v0  ;;  %1336 = vst.msk [vmem:[%s3894_s4 + $0x1b0] sm:$0xff] %vm547_vm0, %v1272_v62  ;;  %v1281_v42 = vsel %vm1153_vm7, %v4103_v51, %v3524_v22 }
 0x2d2   :  { %1337 = vst.msk [vmem:[%s3894_s4 + $0x1b8] sm:$0xff] %vm547_vm0, %v1273_v30  ;;  %1338 = vst.msk [vmem:[%s3894_s4 + $0x1c0] sm:$0xff] %vm547_vm0, %v1274_v17 }
 0x2d3   :  { %1339 = vst.msk [vmem:[%s3894_s4 + $0x1c8] sm:$0xff] %vm547_vm0, %v1275_v10  ;;  %1340 = vst.msk [vmem:[%s3894_s4 + $0x1d0] sm:$0xff] %vm547_vm0, %v1276_v14 }
 0x2d4   :  { %1341 = vst.msk [vmem:[%s3894_s4 + $0x1d8] sm:$0xff] %vm547_vm0, %v1277_v25  ;;  %1342 = vst.msk [vmem:[%s3894_s4 + $0x1e0] sm:$0xff] %vm547_vm0, %v1278_v33 }
 0x2d5   :  { %1343 = vst.msk [vmem:[%s3894_s4 + $0x1e8] sm:$0xff] %vm547_vm0, %v1279_v16  ;;  %1344 = vst.msk [vmem:[%s3894_s4 + $0x1f0] sm:$0xff] %vm547_vm0, %v1280_v4 }
 0x2d6   :  { %1345 = vst.msk [vmem:[%s3894_s4 + $0x1f8] sm:$0xff] %vm547_vm0, %v1281_v42 }

// kernel: discriminator_forward.6
= control target key start
LH: loop header
LB: loop body
LE: loop exit
PB: predicated region body
PF: predicated region fallthrough
CT: control target
= control target key end

     0   :  { %vm1409_vm0 = vcmask 523264   ;;  %vm1410_vm13 = vcmask 523264   ;;  %s1404_s1 = inlined_call_operand.vmem [shape: f32[512,64], index: 1, kind: input, shape index: {}]   ;;  %s1405_s0 = inlined_call_operand.vmem [shape: f32[128,512], index: 0, kind: input, shape index: {}]   ;;  %s1406_s2 = inlined_call_operand.vmem [shape: f32[1,64], index: 2, kind: input, shape index: {}]   ;;  %s1407_s3 = inlined_call_operand.vmem [shape: f32[1,64], index: 3, kind: input, shape index: {}]   ;;  %s1408_s4 = inlined_call_operand.vmem [shape: f32[128,64], index: 4, kind: output, shape index: {}]  }
   0x1   :  { %v112_v0 = vld [vmem:[%s1404_s1 + $0xf0] sm:$0xff]  ;;  %v113_v1 = vld [vmem:[%s1404_s1 + $0xf8] sm:$0xff]  ;;  %v110_v11 = vld [vmem:[%s1404_s1 + $0xe0] sm:$0xff] }
   0x2   :  { %v144_v2 = vld [vmem:[%s1404_s1 + $0x1f0] sm:$0xff]  ;;  %v193_v3 = vpack.c.bf16 %v113_v1, %v112_v0  ;;  %v145_v4 = vld [vmem:[%s1404_s1 + $0x1f8] sm:$0xff]  ;;  %v111_v13 = vld [vmem:[%s1404_s1 + $0xe8] sm:$0xff] }
   0x3   :  { %v96_v5 = vld [vmem:[%s1404_s1 + $0x70] sm:$0xff]  ;;  %v97_v6 = vld [vmem:[%s1404_s1 + $0x78] sm:$0xff]  ;;  %v209_v7 = vpack.c.bf16 %v145_v4, %v144_v2  ;;  %v142_v14 = vld [vmem:[%s1404_s1 + $0x1e0] sm:$0xff]  ;;  %v192_v16 = vpack.c.bf16 %v111_v13, %v110_v11 }
   0x4   :  { %v185_v8 = vpack.c.bf16 %v97_v6, %v96_v5  ;;  %v128_v9 = vld [vmem:[%s1404_s1 + $0x170] sm:$0xff]  ;;  %v129_v10 = vld [vmem:[%s1404_s1 + $0x178] sm:$0xff]  ;;  %632 = vmatprep.subr.bf16.mxu0 %v193_v3  ;;  %v143_v15 = vld [vmem:[%s1404_s1 + $0x1e8] sm:$0xff] }
   0x5   :  { %v201_v12 = vpack.c.bf16 %v129_v10, %v128_v9  ;;  %696 = vmatprep.subr.bf16.mxu1 %v209_v7  ;;  %v208_v17 = vpack.c.bf16 %v143_v15, %v142_v14  ;;  %v94_v18 = vld [vmem:[%s1404_s1 + $0x60] sm:$0xff]  ;;  %v95_v19 = vld [vmem:[%s1404_s1 + $0x68] sm:$0xff]  ;;  %v108_v23 = vld [vmem:[%s1404_s1 + $0xd0] sm:$0xff] }
   0x6   :  { %633 = vmatpush3.bf16.msra.mxu0 %v185_v8  ;;  %v126_v20 = vld [vmem:[%s1404_s1 + $0x160] sm:$0xff]  ;;  %v184_v21 = vpack.c.bf16 %v95_v19, %v94_v18  ;;  %v127_v22 = vld [vmem:[%s1404_s1 + $0x168] sm:$0xff]  ;;  %v109_v24 = vld [vmem:[%s1404_s1 + $0xd8] sm:$0xff] }
   0x7   :  { %697 = vmatpush3.bf16.msra.mxu1 %v201_v12  ;;  %634 = vmatprep.subr.bf16.mxu0 %v192_v16  ;;  %v200_v25 = vpack.c.bf16 %v127_v22, %v126_v20  ;;  %v191_v26 = vpack.c.bf16 %v109_v24, %v108_v23  ;;  %v140_v27 = vld [vmem:[%s1404_s1 + $0x1d0] sm:$0xff]  ;;  %v141_v28 = vld [vmem:[%s1404_s1 + $0x1d8] sm:$0xff]  ;;  %v106_v35 = vld [vmem:[%s1404_s1 + $0xc0] sm:$0xff] }
   0x8   :  { %698 = vmatprep.subr.bf16.mxu1 %v208_v17  ;;  %v92_v29 = vld [vmem:[%s1404_s1 + $0x50] sm:$0xff]  ;;  %v207_v30 = vpack.c.bf16 %v141_v28, %v140_v27  ;;  %v93_v31 = vld [vmem:[%s1404_s1 + $0x58] sm:$0xff]  ;;  %v107_v36 = vld [vmem:[%s1404_s1 + $0xc8] sm:$0xff] }
   0x9   :  { %v124_v32 = vld [vmem:[%s1404_s1 + $0x150] sm:$0xff]  ;;  %v125_v33 = vld [vmem:[%s1404_s1 + $0x158] sm:$0xff]  ;;  %v183_v34 = vpack.c.bf16 %v93_v31, %v92_v29  ;;  %v138_v37 = vld [vmem:[%s1404_s1 + $0x1c0] sm:$0xff]  ;;  %v190_v39 = vpack.c.bf16 %v107_v36, %v106_v35 }
   0xa   :  { %635 = vmatpush3.bf16.msra.mxu0 %v184_v21  ;;  %v199_v38 = vpack.c.bf16 %v125_v33, %v124_v32  ;;  %v139_v40 = vld [vmem:[%s1404_s1 + $0x1c8] sm:$0xff]  ;;  %v90_v41 = vld [vmem:[%s1404_s1 + $0x40] sm:$0xff]  ;;  %v104_v46 = vld [vmem:[%s1404_s1 + $0xb0] sm:$0xff] }
   0xb   :  { %699 = vmatpush3.bf16.msra.mxu1 %v200_v25  ;;  %636 = vmatprep.subr.bf16.mxu0 %v191_v26  ;;  %v91_v42 = vld [vmem:[%s1404_s1 + $0x48] sm:$0xff]  ;;  %v206_v43 = vpack.c.bf16 %v139_v40, %v138_v37  ;;  %v122_v44 = vld [vmem:[%s1404_s1 + $0x140] sm:$0xff]  ;;  %v105_v47 = vld [vmem:[%s1404_s1 + $0xb8] sm:$0xff] }
   0xc   :  { %700 = vmatprep.subr.bf16.mxu1 %v207_v30  ;;  %v123_v45 = vld [vmem:[%s1404_s1 + $0x148] sm:$0xff]  ;;  %v136_v48 = vld [vmem:[%s1404_s1 + $0x1b0] sm:$0xff]  ;;  %v137_v49 = vld [vmem:[%s1404_s1 + $0x1b8] sm:$0xff]  ;;  %v182_v50 = vpack.c.bf16 %v91_v42, %v90_v41  ;;  %v189_v52 = vpack.c.bf16 %v105_v47, %v104_v46 }
   0xd   :  { %v198_v51 = vpack.c.bf16 %v123_v45, %v122_v44  ;;  %v88_v53 = vld [vmem:[%s1404_s1 + $0x30] sm:$0xff]  ;;  %v89_v54 = vld [vmem:[%s1404_s1 + $0x38] sm:$0xff]  ;;  %v205_v56 = vpack.c.bf16 %v137_v49, %v136_v48  ;;  %v102_v58 = vld [vmem:[%s1404_s1 + $0xa0] sm:$0xff] }
   0xe   :  { %637 = vmatpush3.bf16.msra.mxu0 %v183_v34  ;;  %v120_v55 = vld [vmem:[%s1404_s1 + $0x130] sm:$0xff]  ;;  %v121_v57 = vld [vmem:[%s1404_s1 + $0x138] sm:$0xff]  ;;  %v103_v59 = vld [vmem:[%s1404_s1 + $0xa8] sm:$0xff]  ;;  %v181_v62 = vpack.c.bf16 %v89_v54, %v88_v53 }
   0xf   :  { %701 = vmatpush3.bf16.msra.mxu1 %v199_v38  ;;  %638 = vmatprep.subr.bf16.mxu0 %v190_v39  ;;  %v134_v60 = vld [vmem:[%s1404_s1 + $0x1a0] sm:$0xff]  ;;  %v135_v61 = vld [vmem:[%s1404_s1 + $0x1a8] sm:$0xff]  ;;  %v197_v63 = vpack.c.bf16 %v121_v57, %v120_v55  ;;  %v188_v0 = vpack.c.bf16 %v103_v59, %v102_v58  ;;  %v100_v6 = vld [vmem:[%s1404_s1 + $0x90] sm:$0xff] }
  0x10   :  { %702 = vmatprep.subr.bf16.mxu1 %v206_v43  ;;  %v86_v1 = vld [vmem:[%s1404_s1 + $0x20] sm:$0xff]  ;;  %v87_v2 = vld [vmem:[%s1404_s1 + $0x28] sm:$0xff]  ;;  %v204_v4 = vpack.c.bf16 %v135_v61, %v134_v60  ;;  %v101_v7 = vld [vmem:[%s1404_s1 + $0x98] sm:$0xff] }
  0x11   :  { %v118_v3 = vld [vmem:[%s1404_s1 + $0x120] sm:$0xff]  ;;  %v119_v5 = vld [vmem:[%s1404_s1 + $0x128] sm:$0xff]  ;;  %v132_v8 = vld [vmem:[%s1404_s1 + $0x190] sm:$0xff]  ;;  %v180_v11 = vpack.c.bf16 %v87_v2, %v86_v1  ;;  %v187_v16 = vpack.c.bf16 %v101_v7, %v100_v6 }
  0x12   :  { %639 = vmatpush3.bf16.msra.mxu0 %v182_v50  ;;  %v133_v9 = vld [vmem:[%s1404_s1 + $0x198] sm:$0xff]  ;;  %v84_v10 = vld [vmem:[%s1404_s1 + $0x10] sm:$0xff]  ;;  %v196_v15 = vpack.c.bf16 %v119_v5, %v118_v3  ;;  %v98_v17 = vld [vmem:[%s1404_s1 + $0x80] sm:$0xff] }
  0x13   :  { %703 = vmatpush3.bf16.msra.mxu1 %v198_v51  ;;  %640 = vmatprep.subr.bf16.mxu0 %v189_v52  ;;  %v85_v12 = vld [vmem:[%s1404_s1 + $0x18] sm:$0xff]  ;;  %v116_v13 = vld [vmem:[%s1404_s1 + $0x110] sm:$0xff]  ;;  %v19_v18 = vld [vmem:[%s1405_s0 + $0x8] sm:$0xff]  ;;  %v203_v20 = vpack.c.bf16 %v133_v9, %v132_v8 }
  0x14   :  { %704 = vmatprep.subr.bf16.mxu1 %v205_v56  ;;  %v117_v14 = vld [vmem:[%s1404_s1 + $0x118] sm:$0xff]  ;;  %v23_v19 = vld [vmem:[%s1405_s0 + $0x28] sm:$0xff]  ;;  %v130_v25 = vld [vmem:[%s1404_s1 + $0x180] sm:$0xff]  ;;  %v179_v28 = vpack.c.bf16 %v85_v12, %v84_v10 }
  0x15   :  { %v99_v21 = vld [vmem:[%s1404_s1 + $0x88] sm:$0xff]  ;;  %v147_v22 = vpack.c.bf16 %v23_v19, %v19_v18  ;;  %v21_v23 = vld [vmem:[%s1405_s0 + $0x18] sm:$0xff]  ;;  %v195_v29 = vpack.c.bf16 %v117_v14, %v116_v13  ;;  %v82_v31 = vld [vmem:[%s1404_s1] sm:$0xff] }
  0x16   :  { %641 = vmatpush3.bf16.msra.mxu0 %v181_v62  ;;  %v25_v24 = vld [vmem:[%s1405_s0 + $0x38] sm:$0xff]  ;;  %v131_v26 = vld [vmem:[%s1404_s1 + $0x188] sm:$0xff]  ;;  %v186_v30 = vpack.c.bf16 %v99_v21, %v98_v17  ;;  %v114_v34 = vld [vmem:[%s1404_s1 + $0x100] sm:$0xff] }
  0x17   :  { %705 = vmatpush3.bf16.msra.mxu1 %v197_v63  ;;  %642 = vmatprep.subr.bf16.mxu0 %v188_v0  ;;  %v149_v27 = vpack.c.bf16 %v25_v24, %v21_v23  ;;  %v83_v32 = vld [vmem:[%s1404_s1 + $0x8] sm:$0xff]  ;;  %v202_v33 = vpack.c.bf16 %v131_v26, %v130_v25  ;;  %v18_v37 = vld [vmem:[%s1405_s0] sm:$0xff]  ;;  %v20_v39 = vld [vmem:[%s1405_s0 + $0x10] sm:$0xff] }
  0x18   :  { %706 = vmatprep.subr.bf16.mxu1 %v204_v4  ;;  %242 = vmatprep.mubr.bf16.mxu0 %v147_v22  ;;  %v115_v35 = vld [vmem:[%s1404_s1 + $0x108] sm:$0xff]  ;;  %v178_v36 = vpack.c.bf16 %v83_v32, %v82_v31  ;;  %v22_v38 = vld [vmem:[%s1405_s0 + $0x20] sm:$0xff]  ;;  %v24_v41 = vld [vmem:[%s1405_s0 + $0x30] sm:$0xff] }
  0x19   :  { %339 = vmatprep.mubr.bf16.mxu1 %v149_v27  ;;  %v194_v40 = vpack.c.bf16 %v115_v35, %v114_v34  ;;  %v27_v42 = vld [vmem:[%s1405_s0 + $0x48] sm:$0xff]  ;;  %v29_v44 = vld [vmem:[%s1405_s0 + $0x58] sm:$0xff]  ;;  %v146_v46 = vpack.c.bf16 %v22_v38, %v18_v37  ;;  %v148_v47 = vpack.c.bf16 %v24_v41, %v20_v39  ;;  %v26_v50 = vld [vmem:[%s1405_s0 + $0x40] sm:$0xff] }
  0x1a   :  { %643 = vmatpush3.bf16.msra.mxu0 %v180_v11  ;;  %v31_v43 = vld [vmem:[%s1405_s0 + $0x68] sm:$0xff]  ;;  %v33_v45 = vld [vmem:[%s1405_s0 + $0x78] sm:$0xff]  ;;  %v30_v51 = vld [vmem:[%s1405_s0 + $0x60] sm:$0xff] }
  0x1b   :  { %707 = vmatpush3.bf16.msra.mxu1 %v196_v15  ;;  %644 = vmatprep.subr.bf16.mxu0 %v187_v16  ;;  %v151_v48 = vpack.c.bf16 %v31_v43, %v27_v42  ;;  %v153_v49 = vpack.c.bf16 %v33_v45, %v29_v44  ;;  %v28_v52 = vld [vmem:[%s1405_s0 + $0x50] sm:$0xff]  ;;  %v35_v54 = vld [vmem:[%s1405_s0 + $0x88] sm:$0xff]  ;;  %v37_v56 = vld [vmem:[%s1405_s0 + $0x98] sm:$0xff]  ;;  %v150_v58 = vpack.c.bf16 %v30_v51, %v26_v50 }
  0x1c   :  { %708 = vmatprep.subr.bf16.mxu1 %v203_v20  ;;  %v32_v53 = vld [vmem:[%s1405_s0 + $0x70] sm:$0xff]  ;;  %v39_v55 = vld [vmem:[%s1405_s0 + $0xa8] sm:$0xff]  ;;  %v41_v57 = vld [vmem:[%s1405_s0 + $0xb8] sm:$0xff] }
  0x1d   :  { %v152_v59 = vpack.c.bf16 %v32_v53, %v28_v52  ;;  %v155_v60 = vpack.c.bf16 %v39_v55, %v35_v54  ;;  %v157_v61 = vpack.c.bf16 %v41_v57, %v37_v56  ;;  %v34_v62 = vld [vmem:[%s1405_s0 + $0x80] sm:$0xff]  ;;  %v36_v0 = vld [vmem:[%s1405_s0 + $0x90] sm:$0xff]  ;;  %v43_v2 = vld [vmem:[%s1405_s0 + $0xc8] sm:$0xff] }
  0x1e   :  { %645 = vmatpush3.bf16.msra.mxu0 %v179_v28  ;;  %v38_v63 = vld [vmem:[%s1405_s0 + $0xa0] sm:$0xff]  ;;  %v40_v1 = vld [vmem:[%s1405_s0 + $0xb0] sm:$0xff]  ;;  %v47_v3 = vld [vmem:[%s1405_s0 + $0xe8] sm:$0xff] }
  0x1f   :  { %709 = vmatpush3.bf16.msra.mxu1 %v195_v29  ;;  %646 = vmatprep.subr.bf16.mxu0 %v186_v30  ;;  %v45_v4 = vld [vmem:[%s1405_s0 + $0xd8] sm:$0xff]  ;;  %v154_v6 = vpack.c.bf16 %v38_v63, %v34_v62  ;;  %v156_v7 = vpack.c.bf16 %v40_v1, %v36_v0  ;;  %v159_v8 = vpack.c.bf16 %v47_v3, %v43_v2  ;;  %v42_v10 = vld [vmem:[%s1405_s0 + $0xc0] sm:$0xff]  ;;  %v44_v12 = vld [vmem:[%s1405_s0 + $0xd0] sm:$0xff] }
  0x20   :  { %710 = vmatprep.subr.bf16.mxu1 %v202_v33  ;;  %v49_v5 = vld [vmem:[%s1405_s0 + $0xf8] sm:$0xff]  ;;  %v46_v11 = vld [vmem:[%s1405_s0 + $0xe0] sm:$0xff]  ;;  %v48_v13 = vld [vmem:[%s1405_s0 + $0xf0] sm:$0xff] }
  0x21   :  { %v161_v9 = vpack.c.bf16 %v49_v5, %v45_v4  ;;  %v51_v14 = vld [vmem:[%s1405_s0 + $0x108] sm:$0xff]  ;;  %v53_v16 = vld [vmem:[%s1405_s0 + $0x118] sm:$0xff]  ;;  %v158_v18 = vpack.c.bf16 %v46_v11, %v42_v10  ;;  %v160_v19 = vpack.c.bf16 %v48_v13, %v44_v12  ;;  %v50_v22 = vld [vmem:[%s1405_s0 + $0x100] sm:$0xff] }
  0x22   :  { %647 = vmatpush3.bf16.msra.mxu0 %v178_v36  ;;  %v55_v15 = vld [vmem:[%s1405_s0 + $0x128] sm:$0xff]  ;;  %v57_v17 = vld [vmem:[%s1405_s0 + $0x138] sm:$0xff]  ;;  %v54_v23 = vld [vmem:[%s1405_s0 + $0x120] sm:$0xff] }
  0x23   :  { %711 = vmatpush3.bf16.msra.mxu1 %v194_v40  ;;  %v163_v20 = vpack.c.bf16 %v55_v15, %v51_v14  ;;  %v165_v21 = vpack.c.bf16 %v57_v17, %v53_v16  ;;  %v52_v24 = vld [vmem:[%s1405_s0 + $0x110] sm:$0xff]  ;;  %v59_v26 = vld [vmem:[%s1405_s0 + $0x148] sm:$0xff]  ;;  %v61_v28 = vld [vmem:[%s1405_s0 + $0x158] sm:$0xff]  ;;  %v162_v30 = vpack.c.bf16 %v54_v23, %v50_v22 }
  0x24   :  { %v56_v25 = vld [vmem:[%s1405_s0 + $0x130] sm:$0xff]  ;;  %v63_v27 = vld [vmem:[%s1405_s0 + $0x168] sm:$0xff]  ;;  %v65_v29 = vld [vmem:[%s1405_s0 + $0x178] sm:$0xff] }
  0x25   :  { %243 = vmatmul.mubr.bf16.vlgmr.msra.gmra.mxu0 %v146_v46  ;;  %v164_v31 = vpack.c.bf16 %v56_v25, %v52_v24  ;;  %v167_v32 = vpack.c.bf16 %v63_v27, %v59_v26  ;;  %v169_v33 = vpack.c.bf16 %v65_v29, %v61_v28  ;;  %v58_v34 = vld [vmem:[%s1405_s0 + $0x140] sm:$0xff]  ;;  %v60_v36 = vld [vmem:[%s1405_s0 + $0x150] sm:$0xff]  ;;  %v67_v38 = vld [vmem:[%s1405_s0 + $0x188] sm:$0xff] }
  0x26   :  { %340 = vmatmul.mubr.bf16.vlgmr.msra.gmra.mxu1 %v148_v47  ;;  %250 = vmatprep.mubr.bf16.mxu0 %v151_v48  ;;  %v62_v35 = vld [vmem:[%s1405_s0 + $0x160] sm:$0xff]  ;;  %v64_v37 = vld [vmem:[%s1405_s0 + $0x170] sm:$0xff]  ;;  %v71_v39 = vld [vmem:[%s1405_s0 + $0x1a8] sm:$0xff] }
  0x27   :  { %347 = vmatprep.mubr.bf16.mxu1 %v153_v49  ;;  %v69_v40 = vld [vmem:[%s1405_s0 + $0x198] sm:$0xff]  ;;  %v166_v42 = vpack.c.bf16 %v62_v35, %v58_v34  ;;  %v168_v43 = vpack.c.bf16 %v64_v37, %v60_v36  ;;  %v171_v44 = vpack.c.bf16 %v71_v39, %v67_v38  ;;  %v66_v46 = vld [vmem:[%s1405_s0 + $0x180] sm:$0xff]  ;;  %v68_v48 = vld [vmem:[%s1405_s0 + $0x190] sm:$0xff] }
  0x28   :  { %v73_v41 = vld [vmem:[%s1405_s0 + $0x1b8] sm:$0xff]  ;;  %v70_v47 = vld [vmem:[%s1405_s0 + $0x1a0] sm:$0xff]  ;;  %v72_v49 = vld [vmem:[%s1405_s0 + $0x1b0] sm:$0xff] }
  0x29   :  { %v173_v45 = vpack.c.bf16 %v73_v41, %v69_v40  ;;  %v75_v50 = vld [vmem:[%s1405_s0 + $0x1c8] sm:$0xff]  ;;  %v77_v52 = vld [vmem:[%s1405_s0 + $0x1d8] sm:$0xff]  ;;  %v170_v54 = vpack.c.bf16 %v70_v47, %v66_v46  ;;  %v172_v55 = vpack.c.bf16 %v72_v49, %v68_v48 }
  0x2a   :  { %v79_v51 = vld [vmem:[%s1405_s0 + $0x1e8] sm:$0xff]  ;;  %v81_v53 = vld [vmem:[%s1405_s0 + $0x1f8] sm:$0xff] }
  0x2b   :  { %v175_v56 = vpack.c.bf16 %v79_v51, %v75_v50  ;;  %v177_v57 = vpack.c.bf16 %v81_v53, %v77_v52 }
  0x2d   :  { %251 = vmatmul.mubr.bf16.gmra.mxu0 %v150_v58  ;;  %v74_v58 = vld [vmem:[%s1405_s0 + $0x1c0] sm:$0xff] }
  0x2e   :  { %348 = vmatmul.mubr.bf16.gmra.mxu1 %v152_v59  ;;  %258 = vmatprep.mubr.bf16.mxu0 %v155_v60  ;;  %v78_v59 = vld [vmem:[%s1405_s0 + $0x1e0] sm:$0xff]  ;;  %v76_v60 = vld [vmem:[%s1405_s0 + $0x1d0] sm:$0xff] }
  0x2f   :  { %355 = vmatprep.mubr.bf16.mxu1 %v157_v61  ;;  %v80_v61 = vld [vmem:[%s1405_s0 + $0x1f0] sm:$0xff]  ;;  %v174_v62 = vpack.c.bf16 %v78_v59, %v74_v58 }
  0x30   :  { %v176_v63 = vpack.c.bf16 %v80_v61, %v76_v60 }
  0x35   :  { %259 = vmatmul.mubr.bf16.gmra.mxu0 %v154_v6 }
  0x36   :  { %356 = vmatmul.mubr.bf16.gmra.mxu1 %v156_v7  ;;  %266 = vmatprep.mubr.bf16.mxu0 %v159_v8 }
  0x37   :  { %363 = vmatprep.mubr.bf16.mxu1 %v161_v9 }
  0x3d   :  { %267 = vmatmul.mubr.bf16.gmra.mxu0 %v158_v18 }
  0x3e   :  { %364 = vmatmul.mubr.bf16.gmra.mxu1 %v160_v19  ;;  %274 = vmatprep.mubr.bf16.mxu0 %v163_v20 }
  0x3f   :  { %371 = vmatprep.mubr.bf16.mxu1 %v165_v21 }
  0x45   :  { %275 = vmatmul.mubr.bf16.gmra.mxu0 %v162_v30 }
  0x46   :  { %372 = vmatmul.mubr.bf16.gmra.mxu1 %v164_v31  ;;  %282 = vmatprep.mubr.bf16.mxu0 %v167_v32 }
  0x47   :  { %379 = vmatprep.mubr.bf16.mxu1 %v169_v33 }
  0x4d   :  { %283 = vmatmul.mubr.bf16.gmra.mxu0 %v166_v42 }
  0x4e   :  { %380 = vmatmul.mubr.bf16.gmra.mxu1 %v168_v43  ;;  %290 = vmatprep.mubr.bf16.mxu0 %v171_v44 }
  0x4f   :  { %387 = vmatprep.mubr.bf16.mxu1 %v173_v45 }
  0x55   :  { %291 = vmatmul.mubr.bf16.gmra.mxu0 %v170_v54 }
  0x56   :  { %388 = vmatmul.mubr.bf16.gmra.mxu1 %v172_v55  ;;  %298 = vmatprep.mubr.bf16.mxu0 %v175_v56 }
  0x57   :  { %395 = vmatprep.mubr.bf16.mxu1 %v177_v57 }
  0x5d   :  { %299 = vmatmul.mubr.bf16.gmra.mxu0 %v174_v62 }
  0x5e   :  { %396 = vmatmul.mubr.bf16.gmra.mxu1 %v176_v63 }
  0xe5   :  { %v648_v0 = vpop.f32.mrf.mxu0 }
  0xe6   :  { %v712_v1 = vpop.f32.mrf.mxu1 }
  0xe7   :  { %v649_v2 = vpop.f32.mrf.mxu0 }
  0xe8   :  { %v713_v3 = vpop.f32.mrf.mxu1  ;;  %v650_v33 = vadd.f32 %v649_v2, %v648_v0 }
  0xe9   :  { %v651_v4 = vpop.f32.mrf.mxu0  ;;  %v714_v34 = vadd.f32 %v713_v3, %v712_v1 }
  0xea   :  { %v715_v5 = vpop.f32.mrf.mxu1 }
  0xeb   :  { %v652_v6 = vpop.f32.mrf.mxu0  ;;  %v1173_v44 = vadd.f32 %v714_v34, %v650_v33 }
  0xec   :  { %v716_v7 = vpop.f32.mrf.mxu1  ;;  %v653_v30 = vadd.f32 %v652_v6, %v651_v4 }
  0xed   :  { %v654_v8 = vpop.f32.mrf.mxu0  ;;  %v717_v31 = vadd.f32 %v716_v7, %v715_v5  ;;  %v405_v56 = vsel %vm1409_vm0, %v1173_v44, 0.0 }
  0xee   :  { %v718_v9 = vpop.f32.mrf.mxu1 }
  0xef   :  { %v655_v10 = vpop.f32.mrf.mxu0  ;;  %v1171_v40 = vadd.f32 %v717_v31, %v653_v30 }
  0xf0   :  { %v719_v11 = vpop.f32.mrf.mxu1  ;;  %v656_v36 = vadd.f32 %v655_v10, %v654_v8 }
  0xf1   :  { %v657_v12 = vpop.f32.mrf.mxu0  ;;  %v720_v37 = vadd.f32 %v719_v11, %v718_v9  ;;  %v406_v51 = vsel %vm1409_vm0, %v1171_v40, 0.0 }
  0xf2   :  { %v721_v13 = vpop.f32.mrf.mxu1  ;;  %v407_v63 = vadd.f32 %v406_v51, %v405_v56 }
  0xf3   :  { %v658_v14 = vpop.f32.mrf.mxu0  ;;  %v1175_v46 = vadd.f32 %v720_v37, %v656_v36 }
  0xf4   :  { %v722_v15 = vpop.f32.mrf.mxu1  ;;  %v659_v41 = vadd.f32 %v658_v14, %v657_v12 }
  0xf5   :  { %v660_v16 = vpop.f32.mrf.mxu0  ;;  %v723_v42 = vadd.f32 %v722_v15, %v721_v13  ;;  %v408_v58 = vsel %vm1409_vm0, %v1175_v46, 0.0 }
  0xf6   :  { %v724_v17 = vpop.f32.mrf.mxu1  ;;  %v409_v6 = vadd.f32 %v408_v58, %v407_v63 }
  0xf7   :  { %v661_v18 = vpop.f32.mrf.mxu0  ;;  %v1179_v52 = vadd.f32 %v723_v42, %v659_v41 }
  0xf8   :  { %v725_v19 = vpop.f32.mrf.mxu1  ;;  %v662_v47 = vadd.f32 %v661_v18, %v660_v16 }
  0xf9   :  { %v663_v20 = vpop.f32.mrf.mxu0  ;;  %v726_v48 = vadd.f32 %v725_v19, %v724_v17  ;;  %v410_v1 = vsel %vm1409_vm0, %v1179_v52, 0.0 }
  0xfa   :  { %v727_v21 = vpop.f32.mrf.mxu1  ;;  %v411_v13 = vadd.f32 %v410_v1, %v409_v6 }
  0xfb   :  { %v664_v22 = vpop.f32.mrf.mxu0  ;;  %v1185_v59 = vadd.f32 %v726_v48, %v662_v47 }
  0xfc   :  { %v728_v23 = vpop.f32.mrf.mxu1  ;;  %v665_v53 = vadd.f32 %v664_v22, %v663_v20 }
  0xfd   :  { %v666_v24 = vpop.f32.mrf.mxu0  ;;  %v729_v54 = vadd.f32 %v728_v23, %v727_v21  ;;  %v412_v8 = vsel %vm1409_vm0, %v1185_v59, 0.0 }
  0xfe   :  { %v730_v25 = vpop.f32.mrf.mxu1  ;;  %v413_v20 = vadd.f32 %v412_v8, %v411_v13 }
  0xff   :  { %v667_v26 = vpop.f32.mrf.mxu0  ;;  %v1189_v2 = vadd.f32 %v729_v54, %v665_v53 }
 0x100   :  { %v731_v27 = vpop.f32.mrf.mxu1  ;;  %v668_v60 = vadd.f32 %v667_v26, %v666_v24 }
 0x101   :  { %v669_v28 = vpop.f32.mrf.mxu0  ;;  %v732_v61 = vadd.f32 %v731_v27, %v730_v25  ;;  %v414_v15 = vsel %vm1409_vm0, %v1189_v2, 0.0 }
 0x102   :  { %v733_v29 = vpop.f32.mrf.mxu1  ;;  %v415_v27 = vadd.f32 %v414_v15, %v413_v20 }
 0x103   :  { %v670_v32 = vpop.f32.mrf.mxu0  ;;  %v1193_v9 = vadd.f32 %v732_v61, %v668_v60 }
 0x104   :  { %v734_v35 = vpop.f32.mrf.mxu1  ;;  %v671_v3 = vadd.f32 %v670_v32, %v669_v28 }
 0x105   :  { %v672_v38 = vpop.f32.mrf.mxu0  ;;  %v735_v4 = vadd.f32 %v734_v35, %v733_v29  ;;  %v416_v22 = vsel %vm1409_vm0, %v1193_v9, 0.0 }
 0x106   :  { %v736_v39 = vpop.f32.mrf.mxu1  ;;  %v417_v34 = vadd.f32 %v416_v22, %v415_v27 }
 0x107   :  { %v673_v43 = vpop.f32.mrf.mxu0  ;;  %v1197_v16 = vadd.f32 %v735_v4, %v671_v3 }
 0x108   :  { %v737_v45 = vpop.f32.mrf.mxu1  ;;  %v674_v10 = vadd.f32 %v673_v43, %v672_v38 }
 0x109   :  { %v675_v49 = vpop.f32.mrf.mxu0  ;;  %v738_v11 = vadd.f32 %v737_v45, %v736_v39  ;;  %v418_v29 = vsel %vm1409_vm0, %v1197_v16, 0.0 }
 0x10a   :  { %v739_v50 = vpop.f32.mrf.mxu1  ;;  %v419_v42 = vadd.f32 %v418_v29, %v417_v34 }
 0x10b   :  { %v676_v55 = vpop.f32.mrf.mxu0  ;;  %v1201_v23 = vadd.f32 %v738_v11, %v674_v10 }
 0x10c   :  { %v740_v57 = vpop.f32.mrf.mxu1  ;;  %v677_v17 = vadd.f32 %v676_v55, %v675_v49 }
 0x10d   :  { %v678_v62 = vpop.f32.mrf.mxu0  ;;  %v741_v18 = vadd.f32 %v740_v57, %v739_v50  ;;  %v420_v36 = vsel %vm1409_vm0, %v1201_v23, 0.0 }
 0x10e   :  { %v742_v0 = vpop.f32.mrf.mxu1  ;;  %v421_v49 = vadd.f32 %v420_v36, %v419_v42 }
 0x10f   :  { %v679_v5 = vpop.f32.mrf.mxu0  ;;  %v1205_v30 = vadd.f32 %v741_v18, %v677_v17 }
 0x110   :  { %v743_v7 = vpop.f32.mrf.mxu1  ;;  %v680_v24 = vadd.f32 %v679_v5, %v678_v62 }
 0x111   :  { %v681_v12 = vpop.f32.mrf.mxu0  ;;  %v744_v25 = vadd.f32 %v743_v7, %v742_v0  ;;  %v422_v45 = vsel %vm1409_vm0, %v1205_v30, 0.0 }
 0x112   :  { %v745_v14 = vpop.f32.mrf.mxu1  ;;  %v423_v57 = vadd.f32 %v422_v45, %v421_v49 }
 0x113   :  { %v682_v19 = vpop.f32.mrf.mxu0  ;;  %v1209_v37 = vadd.f32 %v744_v25, %v680_v24 }
 0x114   :  { %v746_v21 = vpop.f32.mrf.mxu1  ;;  %v683_v31 = vadd.f32 %v682_v19, %v681_v12 }
 0x115   :  { %v684_v26 = vpop.f32.mrf.mxu0  ;;  %v747_v32 = vadd.f32 %v746_v21, %v745_v14  ;;  %v424_v53 = vsel %vm1409_vm0, %v1209_v37, 0.0 }
 0x116   :  { %v748_v28 = vpop.f32.mrf.mxu1  ;;  %v425_v63 = vadd.f32 %v424_v53, %v423_v57 }
 0x117   :  { %v685_v33 = vpop.f32.mrf.mxu0  ;;  %v1213_v47 = vadd.f32 %v747_v32, %v683_v31 }
 0x118   :  { %v749_v35 = vpop.f32.mrf.mxu1  ;;  %v686_v38 = vadd.f32 %v685_v33, %v684_v26 }
 0x119   :  { %v750_v39 = vadd.f32 %v749_v35, %v748_v28  ;;  %v687_v41 = vpop.f32.mrf.mxu0  ;;  %v426_v60 = vsel %vm1409_vm0, %v1213_v47, 0.0 }
 0x11a   :  { %v751_v43 = vpop.f32.mrf.mxu1  ;;  %v427_v6 = vadd.f32 %v426_v60, %v425_v63 }
 0x11b   :  { %v688_v48 = vpop.f32.mrf.mxu0  ;;  %v1217_v54 = vadd.f32 %v750_v39, %v686_v38 }
 0x11c   :  { %v689_v50 = vadd.f32 %v688_v48, %v687_v41  ;;  %v752_v51 = vpop.f32.mrf.mxu1 }
 0x11d   :  { %v753_v55 = vadd.f32 %v752_v51, %v751_v43  ;;  %v690_v56 = vpop.f32.mrf.mxu0  ;;  %v428_v3 = vsel %vm1409_vm0, %v1217_v54, 0.0 }
 0x11e   :  { %v754_v58 = vpop.f32.mrf.mxu1  ;;  %v429_v12 = vadd.f32 %v428_v3, %v427_v6 }
 0x11f   :  { %v1221_v61 = vadd.f32 %v753_v55, %v689_v50  ;;  %v691_v62 = vpop.f32.mrf.mxu0 }
 0x120   :  { %v692_v0 = vadd.f32 %v691_v62, %v690_v56  ;;  %v755_v1 = vpop.f32.mrf.mxu1 }
 0x121   :  { %v756_v4 = vadd.f32 %v755_v1, %v754_v58  ;;  %v693_v5 = vpop.f32.mrf.mxu0  ;;  %v430_v8 = vsel %vm1409_vm0, %v1221_v61, 0.0 }
 0x122   :  { %v757_v7 = vpop.f32.mrf.mxu1  ;;  %v431_v18 = vadd.f32 %v430_v8, %v429_v12 }
 0x123   :  { %v1227_v10 = vadd.f32 %v756_v4, %v692_v0  ;;  %v694_v11 = vpop.f32.mrf.mxu0 }
 0x124   :  { %v695_v13 = vadd.f32 %v694_v11, %v693_v5  ;;  %v758_v14 = vpop.f32.mrf.mxu1 }
 0x125   :  { %v432_v15 = vsel %vm1409_vm0, %v1227_v10, 0.0  ;;  %v759_v17 = vadd.f32 %v758_v14, %v757_v7 }
 0x126   :  { %v433_v20 = vadd.f32 %v432_v15, %v431_v18 }
 0x127   :  { %v401_v19 = vadd.f32 %v759_v17, %v695_v13 }
 0x129   :  { %v434_v21 = vsel %vm1409_vm0, %v401_v19, 0.0 }
 0x12a   :  { %v435_v22 = vadd.f32 %v434_v21, %v433_v20 }
 0x12c   :  { %v436_v24 = vrot.slane %v435_v22, 4 }
 0x12e   :  { %v437_v25 = vadd.f32 %v436_v24, %v435_v22 }
 0x130   :  { %v438_v26 = vrot.slane %v437_v25, 2 }
 0x132   :  { %v439_v27 = vadd.f32 %v438_v26, %v437_v25 }
 0x134   :  { %v440_v28 = vrot.slane %v439_v27, 1 }
 0x136   :  { %v441_v29 = vadd.f32 %v440_v28, %v439_v27 }
 0x138   :  { %v443_v31 = vmul.f32 0.0078125, %v441_v29 }
 0x13a   :  { %v1233_v32 = vsub.f32 %v1173_v44, %v443_v31  ;;  %v1236_v33 = vsub.f32 %v1171_v40, %v443_v31  ;;  %v1239_v34 = vsub.f32 %v1175_v46, %v443_v31  ;;  %v1242_v35 = vsub.f32 %v1179_v52, %v443_v31 }
 0x13b   :  { %v1249_v39 = vsub.f32 %v1185_v59, %v443_v31  ;;  %v1254_v40 = vsub.f32 %v1189_v2, %v443_v31  ;;  %v1261_v43 = vsub.f32 %v1193_v9, %v443_v31  ;;  %v1267_v2 = vsub.f32 %v1197_v16, %v443_v31 }
 0x13c   :  { %v460_v36 = vmul.f32 %v1233_v32, %v1233_v32  ;;  %v461_v38 = vmul.f32 %v1236_v33, %v1236_v33  ;;  %v462_v44 = vmul.f32 %v1239_v34, %v1239_v34  ;;  %v463_v46 = vmul.f32 %v1242_v35, %v1242_v35 }
 0x13d   :  { %v464_v59 = vmul.f32 %v1249_v39, %v1249_v39  ;;  %v465_v49 = vmul.f32 %v1254_v40, %v1254_v40  ;;  %v1273_v53 = vsub.f32 %v1201_v23, %v443_v31  ;;  %v466_v9 = vmul.f32 %v1261_v43, %v1261_v43 }
 0x13e   :  { %v476_v52 = vsel %vm1409_vm0, %v460_v36, 0.0  ;;  %v477_v41 = vsel %vm1409_vm0, %v461_v38, 0.0  ;;  %v479_v45 = vsel %vm1409_vm0, %v462_v44, 0.0  ;;  %v481_v50 = vsel %vm1409_vm0, %v463_v46, 0.0 }
 0x13f   :  { %v478_v42 = vadd.f32 %v477_v41, %v476_v52  ;;  %v483_v55 = vsel %vm1409_vm0, %v464_v59, 0.0  ;;  %v1279_v57 = vsub.f32 %v1205_v30, %v443_v31  ;;  %v467_v16 = vmul.f32 %v1267_v2, %v1267_v2 }
 0x140   :  { %v485_v58 = vsel %vm1409_vm0, %v465_v49, 0.0  ;;  %v1285_v62 = vsub.f32 %v1209_v37, %v443_v31  ;;  %v468_v23 = vmul.f32 %v1273_v53, %v1273_v53  ;;  %v487_v63 = vsel %vm1409_vm0, %v466_v9, 0.0 }
 0x141   :  { %v480_v48 = vadd.f32 %v479_v45, %v478_v42  ;;  %v455_v1 = vsub.f32 %v1213_v47, %v443_v31  ;;  %v469_v30 = vmul.f32 %v1279_v57, %v1279_v57  ;;  %v489_v3 = vsel %vm1409_vm0, %v467_v16, 0.0 }
 0x142   :  { %v456_v5 = vsub.f32 %v1217_v54, %v443_v31  ;;  %v470_v37 = vmul.f32 %v1285_v62, %v1285_v62  ;;  %v491_v6 = vsel %vm1409_vm0, %v468_v23, 0.0  ;;  %v457_v8 = vsub.f32 %v1221_v61, %v443_v31 }
 0x143   :  { %v482_v51 = vadd.f32 %v481_v50, %v480_v48  ;;  %v471_v11 = vmul.f32 %v455_v1, %v455_v1  ;;  %v493_v12 = vsel %vm1409_vm0, %v469_v30, 0.0  ;;  %v458_v13 = vsub.f32 %v1227_v10, %v443_v31  ;;  %v514_v48 = vld [vmem:[%s1406_s2] sm:$0x1] }
 0x144   :  { %v472_v14 = vmul.f32 %v456_v5, %v456_v5  ;;  %v495_v15 = vsel %vm1409_vm0, %v470_v37, 0.0  ;;  %v459_v18 = vsub.f32 %v401_v19, %v443_v31  ;;  %v473_v54 = vmul.f32 %v457_v8, %v457_v8  ;;  %v631_v30 = vld [vmem:[%s1407_s3] ss:$0 sm:$0xff] }
 0x145   :  { %v484_v56 = vadd.f32 %v483_v55, %v482_v51  ;;  %v497_v20 = vsel %vm1409_vm0, %v471_v11, 0.0  ;;  %v474_v22 = vmul.f32 %v458_v13, %v458_v13  ;;  %v519_v59 = vlaneseq }
 0x146   :  { %v499_v24 = vsel %vm1409_vm0, %v472_v14, 0.0  ;;  %v475_v61 = vmul.f32 %v459_v18, %v459_v18  ;;  %v501_v26 = vsel %vm1409_vm0, %v473_v54, 0.0 }
 0x147   :  { %v486_v60 = vadd.f32 %v485_v58, %v484_v56  ;;  %v503_v28 = vsel %vm1409_vm0, %v474_v22, 0.0  ;;  %v520_v45 = vshrl.u32 %v519_v59, 7 }
 0x148   :  { %v505_v29 = vsel %vm1409_vm0, %v475_v61, 0.0  ;;  %vm1411_vm0 = vmmov %vm1410_vm13 }
 0x149   :  { %v488_v0 = vadd.f32 %v487_v63, %v486_v60  ;;  %v521_v49 = vsub.s32 0, %v520_v45 }
 0x14b   :  { %v490_v4 = vadd.f32 %v489_v3, %v488_v0 }
 0x14d   :  { %v492_v7 = vadd.f32 %v491_v6, %v490_v4 }
 0x14f   :  { %v494_v47 = vadd.f32 %v493_v12, %v492_v7 }
 0x151   :  { %v496_v17 = vadd.f32 %v495_v15, %v494_v47 }
 0x153   :  { %v498_v21 = vadd.f32 %v497_v20, %v496_v17 }
 0x155   :  { %v500_v25 = vadd.f32 %v499_v24, %v498_v21 }
 0x157   :  { %v502_v27 = vadd.f32 %v501_v26, %v500_v25 }
 0x159   :  { %v504_v10 = vadd.f32 %v503_v28, %v502_v27 }
 0x15b   :  { %v506_v36 = vadd.f32 %v505_v29, %v504_v10 }
 0x15d   :  { %v507_v38 = vrot.slane %v506_v36, 4 }
 0x15f   :  { %v508_v19 = vadd.f32 %v507_v38, %v506_v36 }
 0x161   :  { %v509_v31 = vrot.slane %v508_v19, 2 }
 0x163   :  { %v510_v44 = vadd.f32 %v509_v31, %v508_v19 }
 0x165   :  { %v511_v46 = vrot.slane %v510_v44, 1 }
 0x167   :  { %v512_v52 = vadd.f32 %v511_v46, %v510_v44 }
 0x169   :  { %v513_v41 = vmul.f32 0.0078125, %v512_v52 }
 0x16b   :  { %v515_v42 = vadd.f32 1e-05, %v513_v41 }
 0x16d   :  { %760 = vrsqrt.f32 %v515_v42 }
 0x17a   :  { %v761_v50 = vpop.eup %760 }
 0x17b   :  { %v517_v51 = vmul.f32 %v761_v50, %v514_v48 }
 0x17d   :  { %v522_v9 = vrot.slane %v517_v51, %v521_v49 }
 0x17f   :  { %v524_v55 = vmul.f32 %v522_v9, %v1233_v32  ;;  %v525_v56 = vmul.f32 %v522_v9, %v1236_v33  ;;  %v526_v16 = vmul.f32 %v522_v9, %v1239_v34  ;;  %v527_v58 = vmul.f32 %v522_v9, %v1242_v35 }
 0x180   :  { %v528_v60 = vmul.f32 %v522_v9, %v1249_v39  ;;  %v529_v23 = vmul.f32 %v522_v9, %v1254_v40  ;;  %v530_v63 = vmul.f32 %v522_v9, %v1261_v43  ;;  %v531_v0 = vmul.f32 %v522_v9, %v1267_v2 }
 0x181   :  { %v532_v32 = vmul.f32 %v522_v9, %v1273_v53  ;;  %v533_v33 = vmul.f32 %v522_v9, %v1279_v57  ;;  %v534_v34 = vmul.f32 %v522_v9, %v1285_v62  ;;  %v535_v3 = vmul.f32 %v522_v9, %v455_v1 }
 0x182   :  { %v536_v35 = vmul.f32 %v522_v9, %v456_v5  ;;  %v537_v4 = vmul.f32 %v522_v9, %v457_v8  ;;  %v538_v39 = vmul.f32 %v522_v9, %v458_v13  ;;  %v539_v37 = vmul.f32 %v522_v9, %v459_v18 }
 0x183   :  { %v547_v40 = vadd.f32 %v631_v30, %v524_v55  ;;  %v548_v6 = vadd.f32 %v631_v30, %v525_v56  ;;  %v549_v43 = vadd.f32 %v631_v30, %v526_v16  ;;  %v550_v7 = vadd.f32 %v631_v30, %v527_v58 }
 0x184   :  { %v551_v2 = vadd.f32 %v631_v30, %v528_v60  ;;  %v552_v11 = vadd.f32 %v631_v30, %v529_v23  ;;  %v553_v12 = vadd.f32 %v631_v30, %v530_v63  ;;  %v554_v47 = vadd.f32 %v631_v30, %v531_v0 }
 0x185   :  { %v555_v14 = vadd.f32 %v631_v30, %v532_v32  ;;  %v556_v15 = vadd.f32 %v631_v30, %v533_v33  ;;  %v557_v53 = vadd.f32 %v631_v30, %v534_v34  ;;  %v558_v17 = vadd.f32 %v631_v30, %v535_v3 }
 0x186   :  { %v559_v57 = vadd.f32 %v631_v30, %v536_v35  ;;  %v560_v54 = vadd.f32 %v631_v30, %v537_v4  ;;  %v561_v62 = vadd.f32 %v631_v30, %v538_v39  ;;  %v562_v1 = vadd.f32 %v631_v30, %v539_v37 }
 0x187   :  { %vm563_vm1 = vcmp.gt.f32.partialorder %v547_v40, 0.0  ;;  %vm564_vm2 = vcmp.gt.f32.partialorder %v548_v6, 0.0  ;;  %vm565_vm3 = vcmp.gt.f32.partialorder %v549_v43, 0.0  ;;  %vm566_vm4 = vcmp.gt.f32.partialorder %v550_v7, 0.0 }
 0x188   :  { %vm567_vm5 = vcmp.gt.f32.partialorder %v551_v2, 0.0  ;;  %vm568_vm6 = vcmp.gt.f32.partialorder %v552_v11, 0.0  ;;  %vm569_vm7 = vcmp.gt.f32.partialorder %v553_v12, 0.0  ;;  %vm570_vm8 = vcmp.gt.f32.partialorder %v554_v47, 0.0 }
 0x189   :  { %vm571_vm9 = vcmp.gt.f32.partialorder %v555_v14, 0.0  ;;  %vm572_vm10 = vcmp.gt.f32.partialorder %v556_v15, 0.0  ;;  %vm573_vm11 = vcmp.gt.f32.partialorder %v557_v53, 0.0  ;;  %vm574_vm12 = vcmp.gt.f32.partialorder %v558_v17, 0.0 }
 0x18a   :  { %vm576_vm14 = vcmp.gt.f32.partialorder %v560_v54, 0.0  ;;  %vm577_vm15 = vcmp.gt.f32.partialorder %v561_v62, 0.0  ;;  %v579_v5 = vmul.f32 0.2, %v547_v40  ;;  %v580_v8 = vmul.f32 0.2, %v548_v6 }
 0x18b   :  { %v581_v13 = vmul.f32 0.2, %v549_v43  ;;  %v582_v18 = vmul.f32 0.2, %v550_v7  ;;  %v583_v20 = vmul.f32 0.2, %v551_v2 }
 0x18c   :  { %v584_v21 = vmul.f32 0.2, %v552_v11  ;;  %v585_v22 = vmul.f32 0.2, %v553_v12  ;;  %v586_v24 = vmul.f32 0.2, %v554_v47  ;;  %v595_v61 = vsel %vm563_vm1, %v547_v40, %v579_v5  ;;  %vm1412_vm1 = vmmov %vm1411_vm0 }
 0x18d   :  { %v587_v25 = vmul.f32 0.2, %v555_v14  ;;  %v588_v26 = vmul.f32 0.2, %v556_v15  ;;  %v589_v27 = vmul.f32 0.2, %v557_v53  ;;  %v596_v10 = vsel %vm564_vm2, %v548_v6, %v580_v8  ;;  %vm1413_vm2 = vmmov %vm1411_vm0 }
 0x18e   :  { %v590_v28 = vmul.f32 0.2, %v558_v17  ;;  %611 = vst.msk [vmem:[%s1408_s4] sm:$0xff] %vm1410_vm13, %v595_v61  ;;  %v591_v29 = vmul.f32 0.2, %v559_v57  ;;  %v597_v19 = vsel %vm565_vm3, %v549_v43, %v581_v13  ;;  %v598_v44 = vsel %vm566_vm4, %v550_v7, %v582_v18  ;;  %vm1414_vm3 = vmmov %vm1411_vm0 }
 0x18f   :  { %v592_v36 = vmul.f32 0.2, %v560_v54  ;;  %v593_v38 = vmul.f32 0.2, %v561_v62  ;;  %612 = vst.msk [vmem:[%s1408_s4 + $0x8] sm:$0xff] %vm1411_vm0, %v596_v10  ;;  %v599_v46 = vsel %vm567_vm5, %v551_v2, %v583_v20  ;;  %v600_v52 = vsel %vm568_vm6, %v552_v11, %v584_v21  ;;  %614 = vst.msk [vmem:[%s1408_s4 + $0x18] sm:$0xff] %vm1411_vm0, %v598_v44 }
 0x190   :  { %v594_v31 = vmul.f32 0.2, %v562_v1  ;;  %613 = vst.msk [vmem:[%s1408_s4 + $0x10] sm:$0xff] %vm1412_vm1, %v597_v19  ;;  %v601_v41 = vsel %vm569_vm7, %v553_v12, %v585_v22  ;;  %v602_v42 = vsel %vm570_vm8, %v554_v47, %v586_v24  ;;  %v603_v59 = vsel %vm571_vm9, %v555_v14, %v587_v25  ;;  %vm1416_vm5 = vmmov %vm1411_vm0 }
 0x191   :  { %v604_v45 = vsel %vm572_vm10, %v556_v15, %v588_v26  ;;  %615 = vst.msk [vmem:[%s1408_s4 + $0x20] sm:$0xff] %vm1413_vm2, %v599_v46  ;;  %v605_v48 = vsel %vm573_vm11, %v557_v53, %v589_v27  ;;  %v606_v49 = vsel %vm574_vm12, %v558_v17, %v590_v28  ;;  %vm1415_vm4 = vcmp.gt.f32.partialorder %v559_v57, 0.0  ;;  %vm1417_vm6 = vmmov %vm1411_vm0 }
 0x192   :  { %616 = vst.msk [vmem:[%s1408_s4 + $0x28] sm:$0xff] %vm1414_vm3, %v600_v52  ;;  %v607_v50 = vsel %vm1415_vm4, %v559_v57, %v591_v29  ;;  %v608_v51 = vsel %vm576_vm14, %v560_v54, %v592_v36  ;;  %vm1418_vm7 = vmmov %vm1411_vm0  ;;  %v609_v9 = vsel %vm577_vm15, %v561_v62, %v593_v38  ;;  %vm1420_vm9 = vcmp.gt.f32.partialorder %v562_v1, 0.0 }
 0x193   :  { %617 = vst.msk [vmem:[%s1408_s4 + $0x30] sm:$0xff] %vm1416_vm5, %v601_v41  ;;  %vm1419_vm8 = vmmov %vm1411_vm0  ;;  %v610_v55 = vsel %vm1420_vm9, %v562_v1, %v594_v31 }
 0x194   :  { %618 = vst.msk [vmem:[%s1408_s4 + $0x38] sm:$0xff] %vm1417_vm6, %v602_v42  ;;  %vm1421_vm10 = vmmov %vm1411_vm0 }
 0x195   :  { %619 = vst.msk [vmem:[%s1408_s4 + $0x40] sm:$0xff] %vm1418_vm7, %v603_v59  ;;  %vm1422_vm11 = vmmov %vm1411_vm0 }
 0x196   :  { %620 = vst.msk [vmem:[%s1408_s4 + $0x48] sm:$0xff] %vm1419_vm8, %v604_v45  ;;  %vm1423_vm12 = vmmov %vm1411_vm0 }
 0x197   :  { %621 = vst.msk [vmem:[%s1408_s4 + $0x50] sm:$0xff] %vm1421_vm10, %v605_v48  ;;  %vm1424_vm13 = vmmov %vm1411_vm0 }
 0x198   :  { %622 = vst.msk [vmem:[%s1408_s4 + $0x58] sm:$0xff] %vm1422_vm11, %v606_v49  ;;  %vm1425_vm14 = vmmov %vm1411_vm0 }
 0x199   :  { %623 = vst.msk [vmem:[%s1408_s4 + $0x60] sm:$0xff] %vm1423_vm12, %v607_v50  ;;  %vm1426_vm15 = vmmov %vm1411_vm0 }
 0x19a   :  { %624 = vst.msk [vmem:[%s1408_s4 + $0x68] sm:$0xff] %vm1424_vm13, %v608_v51 }
 0x19b   :  { %625 = vst.msk [vmem:[%s1408_s4 + $0x70] sm:$0xff] %vm1425_vm14, %v609_v9 }
 0x19c   :  { %626 = vst.msk [vmem:[%s1408_s4 + $0x78] sm:$0xff] %vm1426_vm15, %v610_v55 }

// kernel: discriminator_forward.7
= control target key start
LH: loop header
LB: loop body
LE: loop exit
PB: predicated region body
PF: predicated region fallthrough
CT: control target
= control target key end

     0   :  { %vm765_vm0 = vmmov 0   ;;  %vm535_vm5 = vcmask 261120   ;;  %vm609_vm6 = vcmask 1041408   ;;  %vm619_vm7 = vcmask 1024   ;;  %s1310_s1 = inlined_call_operand.vmem [shape: f32[1024,128], index: 1, kind: input, shape index: {}]   ;;  %s1311_s0 = inlined_call_operand.vmem [shape: f32[32,1024], index: 0, kind: input, shape index: {}]   ;;  %s1312_s2 = inlined_call_operand.vmem [shape: f32[1,128], index: 2, kind: input, shape index: {}]   ;;  %s1313_s3 = inlined_call_operand.vmem [shape: f32[1,128], index: 3, kind: input, shape index: {}]   ;;  %s1314_s4 = inlined_call_operand.vmem [shape: f32[32,128], index: 4, kind: input, shape index: {}]   ;;  %s1315_s5 = inlined_call_operand.vmem [shape: f32[2,32], index: 5, kind: input, shape index: {}]   ;;  %s1316_s6 = inlined_call_operand.vmem [shape: f32[2,1], index: 6, kind: output, shape index: {}]  }
   0x1   :  { %v86_v0 = vld [vmem:[%s1310_s1 + $0xf0] sm:$0xff]  ;;  %v87_v1 = vld [vmem:[%s1310_s1 + $0xf8] sm:$0xff]  ;;  %v84_v11 = vld [vmem:[%s1310_s1 + $0xe0] sm:$0xff] }
   0x2   :  { %v118_v2 = vld [vmem:[%s1310_s1 + $0x1f0] sm:$0xff]  ;;  %v215_v3 = vpack.c.bf16 %v87_v1, %v86_v0  ;;  %v119_v4 = vld [vmem:[%s1310_s1 + $0x1f8] sm:$0xff]  ;;  %v85_v13 = vld [vmem:[%s1310_s1 + $0xe8] sm:$0xff] }
   0x3   :  { %v70_v5 = vld [vmem:[%s1310_s1 + $0x70] sm:$0xff]  ;;  %v71_v6 = vld [vmem:[%s1310_s1 + $0x78] sm:$0xff]  ;;  %v231_v7 = vpack.c.bf16 %v119_v4, %v118_v2  ;;  %v116_v14 = vld [vmem:[%s1310_s1 + $0x1e0] sm:$0xff]  ;;  %v214_v16 = vpack.c.bf16 %v85_v13, %v84_v11 }
   0x4   :  { %v207_v8 = vpack.c.bf16 %v71_v6, %v70_v5  ;;  %v102_v9 = vld [vmem:[%s1310_s1 + $0x170] sm:$0xff]  ;;  %v103_v10 = vld [vmem:[%s1310_s1 + $0x178] sm:$0xff]  ;;  %628 = vmatprep.subr.bf16.mxu0 %v215_v3  ;;  %v117_v15 = vld [vmem:[%s1310_s1 + $0x1e8] sm:$0xff] }
   0x5   :  { %v223_v12 = vpack.c.bf16 %v103_v10, %v102_v9  ;;  %656 = vmatprep.subr.bf16.mxu1 %v231_v7  ;;  %v230_v17 = vpack.c.bf16 %v117_v15, %v116_v14  ;;  %v68_v18 = vld [vmem:[%s1310_s1 + $0x60] sm:$0xff]  ;;  %v69_v19 = vld [vmem:[%s1310_s1 + $0x68] sm:$0xff]  ;;  %v82_v23 = vld [vmem:[%s1310_s1 + $0xd0] sm:$0xff] }
   0x6   :  { %629 = vmatpush3.bf16.msra.mxu0 %v207_v8  ;;  %v100_v20 = vld [vmem:[%s1310_s1 + $0x160] sm:$0xff]  ;;  %v206_v21 = vpack.c.bf16 %v69_v19, %v68_v18  ;;  %v101_v22 = vld [vmem:[%s1310_s1 + $0x168] sm:$0xff]  ;;  %v83_v24 = vld [vmem:[%s1310_s1 + $0xd8] sm:$0xff] }
   0x7   :  { %657 = vmatpush3.bf16.msra.mxu1 %v223_v12  ;;  %630 = vmatprep.subr.bf16.mxu0 %v214_v16  ;;  %v222_v25 = vpack.c.bf16 %v101_v22, %v100_v20  ;;  %v213_v26 = vpack.c.bf16 %v83_v24, %v82_v23  ;;  %v114_v27 = vld [vmem:[%s1310_s1 + $0x1d0] sm:$0xff]  ;;  %v115_v28 = vld [vmem:[%s1310_s1 + $0x1d8] sm:$0xff]  ;;  %v80_v35 = vld [vmem:[%s1310_s1 + $0xc0] sm:$0xff] }
   0x8   :  { %658 = vmatprep.subr.bf16.mxu1 %v230_v17  ;;  %v66_v29 = vld [vmem:[%s1310_s1 + $0x50] sm:$0xff]  ;;  %v229_v30 = vpack.c.bf16 %v115_v28, %v114_v27  ;;  %v67_v31 = vld [vmem:[%s1310_s1 + $0x58] sm:$0xff]  ;;  %v81_v36 = vld [vmem:[%s1310_s1 + $0xc8] sm:$0xff] }
   0x9   :  { %v98_v32 = vld [vmem:[%s1310_s1 + $0x150] sm:$0xff]  ;;  %v99_v33 = vld [vmem:[%s1310_s1 + $0x158] sm:$0xff]  ;;  %v205_v34 = vpack.c.bf16 %v67_v31, %v66_v29  ;;  %v112_v37 = vld [vmem:[%s1310_s1 + $0x1c0] sm:$0xff]  ;;  %v212_v39 = vpack.c.bf16 %v81_v36, %v80_v35 }
   0xa   :  { %631 = vmatpush3.bf16.msra.mxu0 %v206_v21  ;;  %v221_v38 = vpack.c.bf16 %v99_v33, %v98_v32  ;;  %v113_v40 = vld [vmem:[%s1310_s1 + $0x1c8] sm:$0xff]  ;;  %v64_v41 = vld [vmem:[%s1310_s1 + $0x40] sm:$0xff]  ;;  %v78_v46 = vld [vmem:[%s1310_s1 + $0xb0] sm:$0xff] }
   0xb   :  { %659 = vmatpush3.bf16.msra.mxu1 %v222_v25  ;;  %632 = vmatprep.subr.bf16.mxu0 %v213_v26  ;;  %v65_v42 = vld [vmem:[%s1310_s1 + $0x48] sm:$0xff]  ;;  %v228_v43 = vpack.c.bf16 %v113_v40, %v112_v37  ;;  %v96_v44 = vld [vmem:[%s1310_s1 + $0x140] sm:$0xff]  ;;  %v79_v47 = vld [vmem:[%s1310_s1 + $0xb8] sm:$0xff] }
   0xc   :  { %660 = vmatprep.subr.bf16.mxu1 %v229_v30  ;;  %v97_v45 = vld [vmem:[%s1310_s1 + $0x148] sm:$0xff]  ;;  %v110_v48 = vld [vmem:[%s1310_s1 + $0x1b0] sm:$0xff]  ;;  %v111_v49 = vld [vmem:[%s1310_s1 + $0x1b8] sm:$0xff]  ;;  %v204_v50 = vpack.c.bf16 %v65_v42, %v64_v41  ;;  %v211_v52 = vpack.c.bf16 %v79_v47, %v78_v46 }
   0xd   :  { %v220_v51 = vpack.c.bf16 %v97_v45, %v96_v44  ;;  %v62_v53 = vld [vmem:[%s1310_s1 + $0x30] sm:$0xff]  ;;  %v63_v54 = vld [vmem:[%s1310_s1 + $0x38] sm:$0xff]  ;;  %v227_v56 = vpack.c.bf16 %v111_v49, %v110_v48  ;;  %v76_v58 = vld [vmem:[%s1310_s1 + $0xa0] sm:$0xff] }
   0xe   :  { %633 = vmatpush3.bf16.msra.mxu0 %v205_v34  ;;  %v94_v55 = vld [vmem:[%s1310_s1 + $0x130] sm:$0xff]  ;;  %v95_v57 = vld [vmem:[%s1310_s1 + $0x138] sm:$0xff]  ;;  %v77_v59 = vld [vmem:[%s1310_s1 + $0xa8] sm:$0xff]  ;;  %v203_v62 = vpack.c.bf16 %v63_v54, %v62_v53 }
   0xf   :  { %661 = vmatpush3.bf16.msra.mxu1 %v221_v38  ;;  %634 = vmatprep.subr.bf16.mxu0 %v212_v39  ;;  %v108_v60 = vld [vmem:[%s1310_s1 + $0x1a0] sm:$0xff]  ;;  %v109_v61 = vld [vmem:[%s1310_s1 + $0x1a8] sm:$0xff]  ;;  %v219_v63 = vpack.c.bf16 %v95_v57, %v94_v55  ;;  %v210_v0 = vpack.c.bf16 %v77_v59, %v76_v58  ;;  %v74_v6 = vld [vmem:[%s1310_s1 + $0x90] sm:$0xff] }
  0x10   :  { %662 = vmatprep.subr.bf16.mxu1 %v228_v43  ;;  %v60_v1 = vld [vmem:[%s1310_s1 + $0x20] sm:$0xff]  ;;  %v61_v2 = vld [vmem:[%s1310_s1 + $0x28] sm:$0xff]  ;;  %v226_v4 = vpack.c.bf16 %v109_v61, %v108_v60  ;;  %v75_v7 = vld [vmem:[%s1310_s1 + $0x98] sm:$0xff] }
  0x11   :  { %v92_v3 = vld [vmem:[%s1310_s1 + $0x120] sm:$0xff]  ;;  %v93_v5 = vld [vmem:[%s1310_s1 + $0x128] sm:$0xff]  ;;  %v106_v8 = vld [vmem:[%s1310_s1 + $0x190] sm:$0xff]  ;;  %v202_v11 = vpack.c.bf16 %v61_v2, %v60_v1  ;;  %v209_v16 = vpack.c.bf16 %v75_v7, %v74_v6 }
  0x12   :  { %635 = vmatpush3.bf16.msra.mxu0 %v204_v50  ;;  %v107_v9 = vld [vmem:[%s1310_s1 + $0x198] sm:$0xff]  ;;  %v58_v10 = vld [vmem:[%s1310_s1 + $0x10] sm:$0xff]  ;;  %v218_v15 = vpack.c.bf16 %v93_v5, %v92_v3  ;;  %v72_v17 = vld [vmem:[%s1310_s1 + $0x80] sm:$0xff] }
  0x13   :  { %663 = vmatpush3.bf16.msra.mxu1 %v220_v51  ;;  %636 = vmatprep.subr.bf16.mxu0 %v211_v52  ;;  %v59_v12 = vld [vmem:[%s1310_s1 + $0x18] sm:$0xff]  ;;  %v90_v13 = vld [vmem:[%s1310_s1 + $0x110] sm:$0xff]  ;;  %v25_v18 = vld [vmem:[%s1311_s0 + $0x8] sm:$0xff]  ;;  %v225_v20 = vpack.c.bf16 %v107_v9, %v106_v8 }
  0x14   :  { %664 = vmatprep.subr.bf16.mxu1 %v227_v56  ;;  %v91_v14 = vld [vmem:[%s1310_s1 + $0x118] sm:$0xff]  ;;  %v33_v19 = vld [vmem:[%s1311_s0 + $0x48] sm:$0xff]  ;;  %v104_v25 = vld [vmem:[%s1310_s1 + $0x180] sm:$0xff]  ;;  %v201_v28 = vpack.c.bf16 %v59_v12, %v58_v10 }
  0x15   :  { %v73_v21 = vld [vmem:[%s1310_s1 + $0x88] sm:$0xff]  ;;  %v185_v22 = vpack.c.bf16 %v33_v19, %v25_v18  ;;  %v27_v23 = vld [vmem:[%s1311_s0 + $0x18] sm:$0xff]  ;;  %v217_v29 = vpack.c.bf16 %v91_v14, %v90_v13  ;;  %v56_v31 = vld [vmem:[%s1310_s1] sm:$0xff] }
  0x16   :  { %637 = vmatpush3.bf16.msra.mxu0 %v203_v62  ;;  %v35_v24 = vld [vmem:[%s1311_s0 + $0x58] sm:$0xff]  ;;  %v105_v26 = vld [vmem:[%s1310_s1 + $0x188] sm:$0xff]  ;;  %v208_v30 = vpack.c.bf16 %v73_v21, %v72_v17  ;;  %v88_v33 = vld [vmem:[%s1310_s1 + $0x100] sm:$0xff] }
  0x17   :  { %665 = vmatpush3.bf16.msra.mxu1 %v219_v63  ;;  %638 = vmatprep.subr.bf16.mxu0 %v210_v0  ;;  %v187_v27 = vpack.c.bf16 %v35_v24, %v27_v23  ;;  %v57_v32 = vld [vmem:[%s1310_s1 + $0x8] sm:$0xff]  ;;  %v224_v34 = vpack.c.bf16 %v105_v26, %v104_v25  ;;  %v150_v36 = vld [vmem:[%s1310_s1 + $0x2f0] sm:$0xff]  ;;  %v151_v37 = vld [vmem:[%s1310_s1 + $0x2f8] sm:$0xff] }
  0x18   :  { %666 = vmatprep.subr.bf16.mxu1 %v226_v4  ;;  %296 = vmatprep.mubr.bf16.mxu0 %v185_v22  ;;  %v89_v35 = vld [vmem:[%s1310_s1 + $0x108] sm:$0xff]  ;;  %v24_v38 = vld [vmem:[%s1311_s0] sm:$0xff]  ;;  %v182_v39 = vld [vmem:[%s1310_s1 + $0x3f0] sm:$0xff]  ;;  %v200_v41 = vpack.c.bf16 %v57_v32, %v56_v31  ;;  %v247_v46 = vpack.c.bf16 %v151_v37, %v150_v36 }
  0x19   :  { %345 = vmatprep.mubr.bf16.mxu1 %v187_v27  ;;  %v183_v40 = vld [vmem:[%s1310_s1 + $0x3f8] sm:$0xff]  ;;  %v32_v42 = vld [vmem:[%s1311_s0 + $0x40] sm:$0xff]  ;;  %v26_v43 = vld [vmem:[%s1311_s0 + $0x10] sm:$0xff]  ;;  %v216_v45 = vpack.c.bf16 %v89_v35, %v88_v33 }
  0x1a   :  { %639 = vmatpush3.bf16.msra.mxu0 %v202_v11  ;;  %v34_v44 = vld [vmem:[%s1311_s0 + $0x50] sm:$0xff]  ;;  %v135_v48 = vld [vmem:[%s1310_s1 + $0x278] sm:$0xff]  ;;  %v263_v50 = vpack.c.bf16 %v183_v40, %v182_v39  ;;  %v148_v52 = vld [vmem:[%s1310_s1 + $0x2e0] sm:$0xff]  ;;  %v184_v54 = vpack.c.bf16 %v32_v42, %v24_v38 }
  0x1b   :  { %667 = vmatpush3.bf16.msra.mxu1 %v218_v15  ;;  %640 = vmatprep.subr.bf16.mxu0 %v209_v16  ;;  %v134_v47 = vld [vmem:[%s1310_s1 + $0x270] sm:$0xff]  ;;  %v167_v51 = vld [vmem:[%s1310_s1 + $0x378] sm:$0xff]  ;;  %v149_v53 = vld [vmem:[%s1310_s1 + $0x2e8] sm:$0xff]  ;;  %v186_v57 = vpack.c.bf16 %v34_v44, %v26_v43 }
  0x1c   :  { %668 = vmatprep.subr.bf16.mxu1 %v225_v20  ;;  %v166_v49 = vld [vmem:[%s1310_s1 + $0x370] sm:$0xff]  ;;  %v180_v55 = vld [vmem:[%s1310_s1 + $0x3e0] sm:$0xff]  ;;  %v181_v56 = vld [vmem:[%s1310_s1 + $0x3e8] sm:$0xff]  ;;  %v239_v58 = vpack.c.bf16 %v135_v48, %v134_v47  ;;  %v246_v61 = vpack.c.bf16 %v149_v53, %v148_v52 }
  0x1d   :  { %v132_v59 = vld [vmem:[%s1310_s1 + $0x260] sm:$0xff]  ;;  %v255_v60 = vpack.c.bf16 %v167_v51, %v166_v49  ;;  %v133_v62 = vld [vmem:[%s1310_s1 + $0x268] sm:$0xff]  ;;  %v262_v1 = vpack.c.bf16 %v181_v56, %v180_v55  ;;  %v146_v2 = vld [vmem:[%s1310_s1 + $0x2d0] sm:$0xff] }
  0x1e   :  { %641 = vmatpush3.bf16.msra.mxu0 %v201_v28  ;;  %v164_v63 = vld [vmem:[%s1310_s1 + $0x360] sm:$0xff]  ;;  %v165_v0 = vld [vmem:[%s1310_s1 + $0x368] sm:$0xff]  ;;  %v147_v3 = vld [vmem:[%s1310_s1 + $0x2d8] sm:$0xff]  ;;  %v238_v8 = vpack.c.bf16 %v133_v62, %v132_v59 }
  0x1f   :  { %669 = vmatpush3.bf16.msra.mxu1 %v217_v29  ;;  %642 = vmatprep.subr.bf16.mxu0 %v208_v30  ;;  %v178_v4 = vld [vmem:[%s1310_s1 + $0x3d0] sm:$0xff]  ;;  %v179_v5 = vld [vmem:[%s1310_s1 + $0x3d8] sm:$0xff]  ;;  %v41_v11 = vld [vmem:[%s1311_s0 + $0x88] sm:$0xff]  ;;  %v254_v14 = vpack.c.bf16 %v165_v0, %v164_v63  ;;  %v245_v15 = vpack.c.bf16 %v147_v3, %v146_v2 }
  0x20   :  { %670 = vmatprep.subr.bf16.mxu1 %v224_v34  ;;  %v130_v6 = vld [vmem:[%s1310_s1 + $0x250] sm:$0xff]  ;;  %v131_v7 = vld [vmem:[%s1310_s1 + $0x258] sm:$0xff]  ;;  %v49_v12 = vld [vmem:[%s1311_s0 + $0xc8] sm:$0xff]  ;;  %v261_v20 = vpack.c.bf16 %v179_v5, %v178_v4 }
  0x21   :  { %v162_v9 = vld [vmem:[%s1310_s1 + $0x350] sm:$0xff]  ;;  %v163_v10 = vld [vmem:[%s1310_s1 + $0x358] sm:$0xff]  ;;  %v144_v16 = vld [vmem:[%s1310_s1 + $0x2c0] sm:$0xff]  ;;  %v193_v18 = vpack.c.bf16 %v49_v12, %v41_v11  ;;  %v237_v28 = vpack.c.bf16 %v131_v7, %v130_v6 }
  0x22   :  { %643 = vmatpush3.bf16.msra.mxu0 %v200_v41  ;;  %v43_v13 = vld [vmem:[%s1311_s0 + $0x98] sm:$0xff]  ;;  %v145_v17 = vld [vmem:[%s1310_s1 + $0x2c8] sm:$0xff]  ;;  %v176_v21 = vld [vmem:[%s1310_s1 + $0x3c0] sm:$0xff]  ;;  %v253_v31 = vpack.c.bf16 %v163_v10, %v162_v9 }
  0x23   :  { %671 = vmatpush3.bf16.msra.mxu1 %v216_v45  ;;  %684 = vmatprep.subr.bf16.mxu0 %v247_v46  ;;  %v51_v19 = vld [vmem:[%s1311_s0 + $0xd8] sm:$0xff]  ;;  %v177_v22 = vld [vmem:[%s1310_s1 + $0x3c8] sm:$0xff]  ;;  %v40_v24 = vld [vmem:[%s1311_s0 + $0x80] sm:$0xff]  ;;  %v244_v32 = vpack.c.bf16 %v145_v17, %v144_v16 }
  0x24   :  { %712 = vmatprep.subr.bf16.mxu1 %v263_v50  ;;  %v195_v23 = vpack.c.bf16 %v51_v19, %v43_v13  ;;  %v48_v25 = vld [vmem:[%s1311_s0 + $0xc0] sm:$0xff]  ;;  %v42_v26 = vld [vmem:[%s1311_s0 + $0x90] sm:$0xff]  ;;  %v129_v34 = vld [vmem:[%s1310_s1 + $0x248] sm:$0xff]  ;;  %v260_v36 = vpack.c.bf16 %v177_v22, %v176_v21 }
  0x25   :  { %297 = vmatmul.mubr.bf16.vlgmr.msra.gmra.mxu0 %v184_v54  ;;  %v50_v27 = vld [vmem:[%s1311_s0 + $0xd0] sm:$0xff]  ;;  %v192_v29 = vpack.c.bf16 %v48_v25, %v40_v24  ;;  %v128_v33 = vld [vmem:[%s1310_s1 + $0x240] sm:$0xff]  ;;  %v161_v37 = vld [vmem:[%s1310_s1 + $0x348] sm:$0xff] }
  0x26   :  { %346 = vmatmul.mubr.bf16.vlgmr.msra.gmra.mxu1 %v186_v57  ;;  %685 = vmatpush3.bf16.msra.mxu0 %v239_v58  ;;  %v194_v30 = vpack.c.bf16 %v50_v27, %v42_v26  ;;  %v160_v35 = vld [vmem:[%s1310_s1 + $0x340] sm:$0xff]  ;;  %v142_v38 = vld [vmem:[%s1310_s1 + $0x2b0] sm:$0xff]  ;;  %v143_v39 = vld [vmem:[%s1310_s1 + $0x2b8] sm:$0xff]  ;;  %v236_v42 = vpack.c.bf16 %v129_v34, %v128_v33 }
  0x27   :  { %713 = vmatpush3.bf16.msra.mxu1 %v255_v60  ;;  %686 = vmatprep.subr.bf16.mxu0 %v246_v61  ;;  %v174_v40 = vld [vmem:[%s1310_s1 + $0x3b0] sm:$0xff]  ;;  %v175_v41 = vld [vmem:[%s1310_s1 + $0x3b8] sm:$0xff]  ;;  %v252_v43 = vpack.c.bf16 %v161_v37, %v160_v35  ;;  %v243_v44 = vpack.c.bf16 %v143_v39, %v142_v38  ;;  %v140_v50 = vld [vmem:[%s1310_s1 + $0x2a0] sm:$0xff] }
  0x28   :  { %714 = vmatprep.subr.bf16.mxu1 %v262_v1  ;;  %304 = vmatprep.mubr.bf16.mxu0 %v193_v18  ;;  %v126_v45 = vld [vmem:[%s1310_s1 + $0x230] sm:$0xff]  ;;  %v127_v46 = vld [vmem:[%s1310_s1 + $0x238] sm:$0xff]  ;;  %v259_v48 = vpack.c.bf16 %v175_v41, %v174_v40  ;;  %v141_v51 = vld [vmem:[%s1310_s1 + $0x2a8] sm:$0xff] }
  0x29   :  { %353 = vmatprep.mubr.bf16.mxu1 %v195_v23  ;;  %v158_v47 = vld [vmem:[%s1310_s1 + $0x330] sm:$0xff]  ;;  %v159_v49 = vld [vmem:[%s1310_s1 + $0x338] sm:$0xff]  ;;  %v172_v52 = vld [vmem:[%s1310_s1 + $0x3a0] sm:$0xff]  ;;  %v235_v55 = vpack.c.bf16 %v127_v46, %v126_v45  ;;  %v242_v60 = vpack.c.bf16 %v141_v51, %v140_v50 }
  0x2a   :  { %687 = vmatpush3.bf16.msra.mxu0 %v238_v8  ;;  %v173_v53 = vld [vmem:[%s1310_s1 + $0x3a8] sm:$0xff]  ;;  %v124_v54 = vld [vmem:[%s1310_s1 + $0x220] sm:$0xff]  ;;  %v31_v58 = vld [vmem:[%s1311_s0 + $0x38] sm:$0xff]  ;;  %v251_v59 = vpack.c.bf16 %v159_v49, %v158_v47 }
  0x2b   :  { %715 = vmatpush3.bf16.msra.mxu1 %v254_v14  ;;  %688 = vmatprep.subr.bf16.mxu0 %v245_v15  ;;  %v29_v56 = vld [vmem:[%s1311_s0 + $0x28] sm:$0xff]  ;;  %v156_v62 = vld [vmem:[%s1310_s1 + $0x320] sm:$0xff]  ;;  %v39_v0 = vld [vmem:[%s1311_s0 + $0x78] sm:$0xff]  ;;  %v258_v1 = vpack.c.bf16 %v173_v53, %v172_v52 }
  0x2c   :  { %716 = vmatprep.subr.bf16.mxu1 %v261_v20  ;;  %v37_v57 = vld [vmem:[%s1311_s0 + $0x68] sm:$0xff]  ;;  %v138_v3 = vld [vmem:[%s1310_s1 + $0x290] sm:$0xff]  ;;  %v139_v4 = vld [vmem:[%s1310_s1 + $0x298] sm:$0xff]  ;;  %v191_v5 = vpack.c.bf16 %v39_v0, %v31_v58 }
  0x2d   :  { %305 = vmatmul.mubr.bf16.gmra.mxu0 %v192_v29  ;;  %v125_v61 = vld [vmem:[%s1310_s1 + $0x228] sm:$0xff]  ;;  %v189_v63 = vpack.c.bf16 %v37_v57, %v29_v56  ;;  %v170_v6 = vld [vmem:[%s1310_s1 + $0x390] sm:$0xff]  ;;  %v171_v7 = vld [vmem:[%s1310_s1 + $0x398] sm:$0xff]  ;;  %v241_v10 = vpack.c.bf16 %v139_v4, %v138_v3 }
  0x2e   :  { %689 = vmatpush3.bf16.msra.mxu0 %v237_v28  ;;  %354 = vmatmul.mubr.bf16.gmra.mxu1 %v194_v30  ;;  %v157_v2 = vld [vmem:[%s1310_s1 + $0x328] sm:$0xff]  ;;  %v234_v8 = vpack.c.bf16 %v125_v61, %v124_v54  ;;  %v122_v11 = vld [vmem:[%s1310_s1 + $0x210] sm:$0xff]  ;;  %v123_v12 = vld [vmem:[%s1310_s1 + $0x218] sm:$0xff]  ;;  %v257_v14 = vpack.c.bf16 %v171_v7, %v170_v6 }
  0x2f   :  { %717 = vmatpush3.bf16.msra.mxu1 %v253_v31  ;;  %690 = vmatprep.subr.bf16.mxu0 %v244_v32  ;;  %v250_v9 = vpack.c.bf16 %v157_v2, %v156_v62  ;;  %v154_v13 = vld [vmem:[%s1310_s1 + $0x310] sm:$0xff]  ;;  %v155_v15 = vld [vmem:[%s1310_s1 + $0x318] sm:$0xff]  ;;  %v136_v16 = vld [vmem:[%s1310_s1 + $0x280] sm:$0xff]  ;;  %v233_v20 = vpack.c.bf16 %v123_v12, %v122_v11 }
  0x30   :  { %718 = vmatprep.subr.bf16.mxu1 %v260_v36  ;;  %394 = vmatprep.mubr.bf16.mxu0 %v189_v63  ;;  %v137_v17 = vld [vmem:[%s1310_s1 + $0x288] sm:$0xff]  ;;  %v168_v18 = vld [vmem:[%s1310_s1 + $0x380] sm:$0xff]  ;;  %v249_v21 = vpack.c.bf16 %v155_v15, %v154_v13  ;;  %v30_v31 = vld [vmem:[%s1311_s0 + $0x30] sm:$0xff] }
  0x31   :  { %443 = vmatprep.mubr.bf16.mxu1 %v191_v5  ;;  %v169_v19 = vld [vmem:[%s1310_s1 + $0x388] sm:$0xff]  ;;  %v240_v22 = vpack.c.bf16 %v137_v17, %v136_v16  ;;  %v120_v23 = vld [vmem:[%s1310_s1 + $0x200] sm:$0xff]  ;;  %v38_v33 = vld [vmem:[%s1311_s0 + $0x70] sm:$0xff] }
  0x32   :  { %691 = vmatpush3.bf16.msra.mxu0 %v236_v42  ;;  %v121_v24 = vld [vmem:[%s1310_s1 + $0x208] sm:$0xff]  ;;  %v256_v25 = vpack.c.bf16 %v169_v19, %v168_v18  ;;  %v152_v26 = vld [vmem:[%s1310_s1 + $0x300] sm:$0xff]  ;;  %v47_v36 = vld [vmem:[%s1311_s0 + $0xb8] sm:$0xff]  ;;  %v190_v39 = vpack.c.bf16 %v38_v33, %v30_v31 }
  0x33   :  { %719 = vmatpush3.bf16.msra.mxu1 %v252_v43  ;;  %692 = vmatprep.subr.bf16.mxu0 %v243_v44  ;;  %v153_v27 = vld [vmem:[%s1310_s1 + $0x308] sm:$0xff]  ;;  %v232_v28 = vpack.c.bf16 %v121_v24, %v120_v23  ;;  %v28_v29 = vld [vmem:[%s1311_s0 + $0x20] sm:$0xff]  ;;  %v55_v37 = vld [vmem:[%s1311_s0 + $0xf8] sm:$0xff] }
  0x34   :  { %720 = vmatprep.subr.bf16.mxu1 %v259_v48  ;;  %v36_v30 = vld [vmem:[%s1311_s0 + $0x60] sm:$0xff]  ;;  %v248_v32 = vpack.c.bf16 %v153_v27, %v152_v26  ;;  %v45_v34 = vld [vmem:[%s1311_s0 + $0xa8] sm:$0xff]  ;;  %v199_v41 = vpack.c.bf16 %v55_v37, %v47_v36  ;;  %v46_v44 = vld [vmem:[%s1311_s0 + $0xb0] sm:$0xff]  ;;  %v764_v48 = vmov 0.0  }
  0x35   :  { %v53_v35 = vld [vmem:[%s1311_s0 + $0xe8] sm:$0xff]  ;;  %v188_v38 = vpack.c.bf16 %v36_v30, %v28_v29  ;;  %v44_v42 = vld [vmem:[%s1311_s0 + $0xa0] sm:$0xff]  ;;  %v54_v45 = vld [vmem:[%s1311_s0 + $0xf0] sm:$0xff] }
  0x36   :  { %693 = vmatpush3.bf16.msra.mxu0 %v235_v55  ;;  %v197_v40 = vpack.c.bf16 %v53_v35, %v45_v34  ;;  %v52_v43 = vld [vmem:[%s1311_s0 + $0xe0] sm:$0xff]  ;;  %v198_v47 = vpack.c.bf16 %v54_v45, %v46_v44 }
  0x37   :  { %721 = vmatpush3.bf16.msra.mxu1 %v251_v59  ;;  %694 = vmatprep.subr.bf16.mxu0 %v242_v60  ;;  %v196_v46 = vpack.c.bf16 %v52_v43, %v44_v42 }
  0x38   :  { %722 = vmatprep.subr.bf16.mxu1 %v258_v1 }
  0x3a   :  { %695 = vmatpush3.bf16.msra.mxu0 %v234_v8 }
  0x3b   :  { %723 = vmatpush3.bf16.msra.mxu1 %v250_v9  ;;  %696 = vmatprep.subr.bf16.mxu0 %v241_v10 }
  0x3c   :  { %724 = vmatprep.subr.bf16.mxu1 %v257_v14 }
  0x3e   :  { %697 = vmatpush3.bf16.msra.mxu0 %v233_v20 }
  0x3f   :  { %725 = vmatpush3.bf16.msra.mxu1 %v249_v21  ;;  %698 = vmatprep.subr.bf16.mxu0 %v240_v22 }
  0x40   :  { %726 = vmatprep.subr.bf16.mxu1 %v256_v25 }
  0x42   :  { %699 = vmatpush3.bf16.msra.mxu0 %v232_v28 }
  0x43   :  { %727 = vmatpush3.bf16.msra.mxu1 %v248_v32  ;;  %745 = vmatprep.subr.mxu0 %v764_v48 }
  0x45   :  { %395 = vmatmul.mubr.bf16.vlgmr.msra.gmra.mxu0 %v188_v38 }
  0x46   :  { %444 = vmatmul.mubr.bf16.vlgmr.msra.gmra.mxu1 %v190_v39  ;;  %402 = vmatprep.mubr.bf16.mxu0 %v197_v40 }
  0x47   :  { %451 = vmatprep.mubr.bf16.mxu1 %v199_v41 }
  0x4d   :  { %403 = vmatmul.mubr.bf16.gmra.mxu0 %v196_v46 }
  0x4e   :  { %452 = vmatmul.mubr.bf16.gmra.mxu1 %v198_v47  ;;  %753 = vmatprep.mubr.msk.f32.mxu0 %vm765_vm0, %v764_v48 }
  0xe5   :  { %v644_v49 = vpop.f32.mrf.mxu0 }
  0xe6   :  { %v672_v50 = vpop.f32.mrf.mxu1 }
  0xe7   :  { %v645_v51 = vpop.f32.mrf.mxu0 }
  0xe8   :  { %v673_v52 = vpop.f32.mrf.mxu1  ;;  %v646_v8 = vadd.f32 %v645_v51, %v644_v49 }
  0xe9   :  { %v647_v53 = vpop.f32.mrf.mxu0  ;;  %v674_v9 = vadd.f32 %v673_v52, %v672_v50 }
  0xea   :  { %v675_v54 = vpop.f32.mrf.mxu1 }
  0xeb   :  { %v648_v55 = vpop.f32.mrf.mxu0  ;;  %v348_v19 = vadd.f32 %v674_v9, %v646_v8 }
  0xec   :  { %v676_v56 = vpop.f32.mrf.mxu1  ;;  %v649_v4 = vadd.f32 %v648_v55, %v647_v53 }
  0xed   :  { %v650_v57 = vpop.f32.mrf.mxu0  ;;  %v677_v5 = vadd.f32 %v676_v56, %v675_v54 }
  0xee   :  { %v678_v58 = vpop.f32.mrf.mxu1 }
  0xef   :  { %v651_v59 = vpop.f32.mrf.mxu0  ;;  %v351_v14 = vadd.f32 %v677_v5, %v649_v4 }
  0xf0   :  { %v679_v60 = vpop.f32.mrf.mxu1  ;;  %v652_v11 = vadd.f32 %v651_v59, %v650_v57 }
  0xf1   :  { %v653_v61 = vpop.f32.mrf.mxu0  ;;  %v680_v12 = vadd.f32 %v679_v60, %v678_v58 }
  0xf2   :  { %v681_v62 = vpop.f32.mrf.mxu1 }
  0xf3   :  { %v654_v63 = vpop.f32.mrf.mxu0  ;;  %v356_v22 = vadd.f32 %v680_v12, %v652_v11  ;;  %v494_v11 = vlaneseq }
  0xf4   :  { %v682_v0 = vpop.f32.mrf.mxu1  ;;  %v655_v23 = vadd.f32 %v654_v63, %v653_v61 }
  0xf5   :  { %v683_v25 = vadd.f32 %v682_v0, %v681_v62  ;;  %v495_v12 = vshrl.u32 %v494_v11, 7 }
  0xf7   :  { %v359_v37 = vadd.f32 %v683_v25, %v655_v23 }
 0x105   :  { %v700_v1 = vpop.f32.mrf.mxu0 }
 0x106   :  { %v728_v2 = vpop.f32.mrf.mxu1 }
 0x107   :  { %v701_v3 = vpop.f32.mrf.mxu0 }
 0x108   :  { %v729_v6 = vpop.f32.mrf.mxu1  ;;  %v702_v15 = vadd.f32 %v701_v3, %v700_v1 }
 0x109   :  { %v703_v7 = vpop.f32.mrf.mxu0  ;;  %v730_v31 = vadd.f32 %v729_v6, %v728_v2 }
 0x10a   :  { %v731_v10 = vpop.f32.mrf.mxu1  ;;  %v397_v26 = vadd.f32 %v702_v15, %v348_v19 }
 0x10b   :  { %v704_v13 = vpop.f32.mrf.mxu0 }
 0x10c   :  { %v705_v16 = vadd.f32 %v704_v13, %v703_v7  ;;  %v732_v17 = vpop.f32.mrf.mxu1  ;;  %v446_v38 = vadd.f32 %v730_v31, %v397_v26  ;;  %v489_v13 = vld [vmem:[%s1312_s2] sm:$0x1] }
 0x10d   :  { %v706_v18 = vpop.f32.mrf.mxu0  ;;  %v733_v27 = vadd.f32 %v732_v17, %v731_v10 }
 0x10e   :  { %v400_v20 = vadd.f32 %v705_v16, %v351_v14  ;;  %v734_v21 = vpop.f32.mrf.mxu1  ;;  %v496_v14 = vsub.s32 0, %v495_v12 }
 0x10f   :  { %v707_v24 = vpop.f32.mrf.mxu0 }
 0x110   :  { %v708_v28 = vadd.f32 %v707_v24, %v706_v18  ;;  %v735_v29 = vpop.f32.mrf.mxu1  ;;  %v449_v32 = vadd.f32 %v733_v27, %v400_v20  ;;  %v625_v18 = vld [vmem:[%s1313_s3] ss:$0 sm:$0xff]  ;;  %v529_v27 = vld [vmem:[%s1314_s4 + $0x18] sm:$0xff] }
 0x111   :  { %v709_v30 = vpop.f32.mrf.mxu0  ;;  %v736_v34 = vadd.f32 %v735_v29, %v734_v21 }
 0x112   :  { %v405_v33 = vadd.f32 %v708_v28, %v356_v22  ;;  %v737_v35 = vpop.f32.mrf.mxu1  ;;  %v460_v42 = vadd.f32 %v449_v32, %v446_v38 }
 0x113   :  { %v710_v36 = vpop.f32.mrf.mxu0 }
 0x114   :  { %v454_v39 = vadd.f32 %v736_v34, %v405_v33  ;;  %v711_v40 = vadd.f32 %v710_v36, %v709_v30  ;;  %v738_v41 = vpop.f32.mrf.mxu1  ;;  %v528_v33 = vld [vmem:[%s1314_s4 + $0x10] sm:$0xff] }
 0x115   :  { %v739_v44 = vadd.f32 %v738_v41, %v737_v35 }
 0x116   :  { %v408_v43 = vadd.f32 %v711_v40, %v359_v37  ;;  %v461_v45 = vadd.f32 %v460_v42, %v454_v39  ;;  %v527_v37 = vld [vmem:[%s1314_s4 + $0x8] sm:$0xff]  ;;  %v526_v40 = vld [vmem:[%s1314_s4] sm:$0xff] }
 0x118   :  { %v457_v46 = vadd.f32 %v739_v44, %v408_v43  ;;  %v534_v43 = vld [vmem:[%s1315_s5] sm:$0x3] }
 0x11a   :  { %v462_v47 = vadd.f32 %v461_v45, %v457_v46 }
 0x11c   :  { %v463_v49 = vrot.slane %v462_v47, 4 }
 0x11e   :  { %v464_v50 = vadd.f32 %v463_v49, %v462_v47 }
 0x120   :  { %v465_v51 = vrot.slane %v464_v50, 2 }
 0x122   :  { %v466_v52 = vadd.f32 %v465_v51, %v464_v50 }
 0x124   :  { %v467_v53 = vrot.slane %v466_v52, 1 }
 0x126   :  { %v468_v54 = vadd.f32 %v467_v53, %v466_v52 }
 0x128   :  { %v470_v55 = vmul.f32 0.03125, %v468_v54 }
 0x12a   :  { %v471_v56 = vsub.f32 %v446_v38, %v470_v55  ;;  %v472_v57 = vsub.f32 %v449_v32, %v470_v55  ;;  %v473_v58 = vsub.f32 %v454_v39, %v470_v55  ;;  %v474_v59 = vsub.f32 %v457_v46, %v470_v55 }
 0x12c   :  { %v475_v60 = vmul.f32 %v471_v56, %v471_v56  ;;  %v476_v61 = vmul.f32 %v472_v57, %v472_v57  ;;  %v477_v62 = vmul.f32 %v473_v58, %v473_v58  ;;  %v478_v0 = vmul.f32 %v474_v59, %v474_v59 }
 0x12e   :  { %v479_v63 = vadd.f32 %v476_v61, %v475_v60 }
 0x130   :  { %v480_v1 = vadd.f32 %v479_v63, %v477_v62 }
 0x132   :  { %v481_v2 = vadd.f32 %v480_v1, %v478_v0 }
 0x134   :  { %v482_v3 = vrot.slane %v481_v2, 4 }
 0x136   :  { %v483_v4 = vadd.f32 %v482_v3, %v481_v2 }
 0x138   :  { %v484_v5 = vrot.slane %v483_v4, 2 }
 0x13a   :  { %v485_v6 = vadd.f32 %v484_v5, %v483_v4 }
 0x13c   :  { %v486_v7 = vrot.slane %v485_v6, 1 }
 0x13e   :  { %v487_v8 = vadd.f32 %v486_v7, %v485_v6 }
 0x140   :  { %v488_v9 = vmul.f32 0.03125, %v487_v8 }
 0x142   :  { %v490_v10 = vadd.f32 1e-05, %v488_v9 }
 0x144   :  { %758 = vrsqrt.f32 %v490_v10 }
 0x151   :  { %v759_v15 = vpop.eup %758 }
 0x152   :  { %v492_v16 = vmul.f32 %v759_v15, %v489_v13 }
 0x154   :  { %v497_v17 = vrot.slane %v492_v16, %v496_v14 }
 0x156   :  { %v502_v19 = vmul.f32 %v497_v17, %v474_v59  ;;  %v501_v20 = vmul.f32 %v497_v17, %v473_v58  ;;  %v500_v21 = vmul.f32 %v497_v17, %v472_v57  ;;  %v499_v22 = vmul.f32 %v497_v17, %v471_v56 }
 0x158   :  { %v513_v23 = vadd.f32 %v625_v18, %v502_v19  ;;  %v512_v24 = vadd.f32 %v625_v18, %v501_v20  ;;  %v511_v25 = vadd.f32 %v625_v18, %v500_v21  ;;  %v510_v26 = vadd.f32 %v625_v18, %v499_v22 }
 0x15a   :  { %vm517_vm1 = vcmp.gt.f32.partialorder %v513_v23, 0.0  ;;  %v521_v28 = vmul.f32 0.2, %v513_v23  ;;  %vm516_vm2 = vcmp.gt.f32.partialorder %v512_v24, 0.0  ;;  %v520_v29 = vmul.f32 0.2, %v512_v24 }
 0x15b   :  { %vm515_vm3 = vcmp.gt.f32.partialorder %v511_v25, 0.0  ;;  %v519_v30 = vmul.f32 0.2, %v511_v25  ;;  %v518_v34 = vmul.f32 0.2, %v510_v26  ;;  %vm514_vm4 = vcmp.gt.f32.partialorder %v510_v26, 0.0 }
 0x15c   :  { %v525_v31 = vsel %vm517_vm1, %v513_v23, %v521_v28  ;;  %v524_v32 = vsel %vm516_vm2, %v512_v24, %v520_v29 }
 0x15d   :  { %v533_v35 = vmul.f32 %v529_v27, %v525_v31  ;;  %v523_v36 = vsel %vm515_vm3, %v511_v25, %v519_v30  ;;  %v532_v38 = vmul.f32 %v528_v33, %v524_v32  ;;  %v522_v39 = vsel %vm514_vm4, %v510_v26, %v518_v34 }
 0x15e   :  { %v531_v41 = vmul.f32 %v527_v37, %v523_v36  ;;  %v530_v42 = vmul.f32 %v526_v40, %v522_v39 }
 0x15f   :  { %746 = vmatpush3.msra.mxu0 %v533_v35 }
 0x160   :  { %747 = vmatprep.subr.mxu0 %v764_v48 }
 0x161   :  { %748 = vmatpush3.msra.mxu0 %v532_v38 }
 0x162   :  { %749 = vmatprep.subr.mxu0 %v764_v48 }
 0x163   :  { %750 = vmatpush3.msra.mxu0 %v531_v41 }
 0x164   :  { %751 = vmatprep.subr.mxu0 %v764_v48 }
 0x165   :  { %752 = vmatpush3.msra.mxu0 %v530_v42 }
 0x166   :  { %754 = vmatmul.mubr.msk.f32.vlgmr.msra.gmra.mxu0 %vm535_vm5, %v534_v43 }
 0x226   :  { %v605_v44 = vpop.f32.mrf.mxu0 }
 0x227   :  { %v610_v45 = vsel %vm609_vm6, %v605_v44, 0.0 }
 0x228   :  { %v755_v46 = vpop.f32.mrf.mxu0  ;;  %611 = vadd.xlane.f32.xlu0 %v610_v45 }
 0x2b1   :  { %v612_v47 = vpop.xlane.xlu0 %611 }
 0x2b2   :  { %v627_v49 = vmul.f32 -1.442695, %v612_v47 }
 0x2b4   :  { %760 = vpow2.f32 %v627_v49 }
 0x2c1   :  { %v761_v50 = vpop.eup %760 }
 0x2c2   :  { %v616_v51 = vadd.f32 1.0, %v761_v50 }
 0x2c4   :  { %762 = vrcp.f32 %v616_v51 }
 0x2d1   :  { %v763_v52 = vpop.eup %762 }
 0x2d2   :  { %620 = vst.msk [vmem:[%s1316_s6] sm:$0x3] %vm619_vm7, %v763_v52 }

</bundles_post_ra>
